<compile_context>
chip_gen: v5e
topology: v5e:2x2
jax: 0.10.0
libtpu: 0.0.40
codegen_flags: <defaults>
</compile_context>

<pallas_src>
import math
from functools import partial

import jax
import jax.numpy as jnp
import numpy as np
from jax import lax
from jax.experimental import pallas as pl
from jax.experimental.pallas import tpu as pltpu


def _round_up(x, m):
    return ((x + m - 1) // m) * m


# --------------------------------------------------------------------------- #
# Pallas kernel: pure load + two MXU Gram contractions.
# Inputs are pre-scaled by sqrt(prec) column-wise in the wrapper.
# --------------------------------------------------------------------------- #
def _gram_kernel(xiT_ref, yT_ref, xx_ref, xy_ref, *, accumulate):
    xi = xiT_ref[0]          # (f_pad, tn)  bf16, inducing points on lanes
    y = yT_ref[...]          # (c_pad, tn)  bf16, s-invariant (hoisted DMA)

    # Contract over lanes (inducing points) for both operands.  This A@B^T form
    # may emit a per-step vxpose on the XLU path; at f_pad<=64 / c_pad<=32 the
    # XLU slot has slack, so keep the lane-dense layout (no wasted lanes).
    xx = lax.dot_general(xi, xi, dimension_numbers=(((1,), (1,)), ((), ())),
                         preferred_element_type=jnp.float32)
    xy = lax.dot_general(xi, y, dimension_numbers=(((1,), (1,)), ((), ())),
                         preferred_element_type=jnp.float32)

    if accumulate:
        # Multi-step reduction sharing one resident output block per sample.
        @pl.when(pl.program_id(1) == 0)
        def _():
            xx_ref[...] = jnp.zeros_like(xx_ref)
            xy_ref[...] = jnp.zeros_like(xy_ref)
        xx_ref[0] = xx_ref[0] + xx
        xy_ref[0] = xy_ref[0] + xy
    else:
        # Single step per output block (nb == 1, or split-reduction partials).
        xx_ref[0] = xx
        xy_ref[0] = xy


def _gram_pallas(xiT, yT, *, nb, tn, split_reduction):
    """xiT: [S, f_pad, nb*tn] bf16 (sqrt(prec)-scaled),
       yT : [c_pad, nb*tn]   bf16 (sqrt(prec)-scaled, s-invariant).
       Returns (xx, xy) f32 with leading dim S (or nb partials if split)."""
    S, f_pad, n_pad = xiT.shape
    c_pad = yT.shape[0]
    assert nb * tn == n_pad
    accumulate = (nb > 1) and not split_reduction

    if split_reduction:
        # One partial Gram per reduction block; both grid axes parallel so the
        # blocks can be sharded across TensorCores (v7x, S == 1 case).
        out_lead = nb
        out_idx = lambda s, n: (n, 0, 0)
        dims = ("parallel", "parallel")
    else:
        out_lead = S
        out_idx = lambda s, n: (s, 0, 0)
        dims = ("parallel", "arbitrary")           # reduction axis last

    return pl.pallas_call(
        partial(_gram_kernel, accumulate=accumulate),
        out_shape=(jax.ShapeDtypeStruct((out_lead, f_pad, f_pad), jnp.float32),
                   jax.ShapeDtypeStruct((out_lead, f_pad, c_pad), jnp.float32)),
        grid_spec=pltpu.PrefetchScalarGridSpec(
            num_scalar_prefetch=0,
            grid=(S, nb),
            in_specs=[
                # per-sample lane-dense Xi^T tile (inducing points on lanes)
                pl.BlockSpec((1, f_pad, tn), lambda s, n: (s, 0, n)),
                # s-invariant Y^T tile: constant-per-s block index -> hoisted DMA
                pl.BlockSpec((c_pad, tn), lambda s, n: (0, n)),
            ],
            out_specs=[
                # NOTE: output lane widths are f_pad / c_pad (< 128) -> masked
                # partial stores; fine at these KB-scale output blocks.  If F or
                # C_out grow, keep the last output dim a multiple of 128.
                pl.BlockSpec((1, f_pad, f_pad), out_idx),
                pl.BlockSpec((1, f_pad, c_pad), out_idx),
            ]),
        compiler_params=pltpu.CompilerParams(
            dimension_semantics=dims,
            vmem_limit_bytes=32 * 1024 * 1024),
    )(xiT, yT)


def gram_stats(Xi, Yt, prec_vec):
    """Xi: [S, Pi, F], Yt: [C_out, Pi], prec_vec: [Pi]  ->
       (XiLXi [S, F, F], XiLY [S, F, C_out]) in f32 via the Pallas kernel."""
    S, Pi, F = Xi.shape
    C_out = Yt.shape[0]
    f_pad = _round_up(F, 16)          # bf16 sublane packing
    c_pad = _round_up(C_out, 16)

    # Single reduction step whenever it fits a conservative VMEM budget
    # (double-buffered bf16 xiT + yT tiles); at these shapes nb == 1.
    vmem_budget = 8 * 1024 * 1024
    bytes_per_lane = 2 * 2 * (f_pad + c_pad)          # double-buffer * bf16 * rows
    tn_cap = max(128, (vmem_budget // bytes_per_lane) // 128 * 128)
    tn = min(_round_up(Pi, 128), tn_cap)
    nb = -(-_round_up(Pi, 128) // tn)
    if nb > 1:
        tn = _round_up(-(-Pi // nb), 128)

    # v7x has two TensorCores: with a single sample, split the reduction across
    # a parallel grid axis (partial Grams summed below) so both cores are busy.
    split_reduction = (S == 1) and (Pi >= 256)
    if split_reduction and nb < 2:
        nb = 2
        tn = _round_up(-(-Pi // nb), 128)
    n_pad = nb * tn                    # zero-padded columns contribute nothing

    # Fold diag(prec) into both operands as sqrt(prec) column scaling; the
    # scale / pad / cast fuse into a single XLA pass over each operand.
    sqp = jnp.pad(jnp.sqrt(prec_vec.astype(jnp.float32)), (0, n_pad - Pi))
    xiT = jnp.swapaxes(Xi.astype(jnp.float32), -1, -2)                  # [S, F, Pi]
    xiT = (jnp.pad(xiT, ((0, 0), (0, f_pad - F), (0, n_pad - Pi))) * sqp
           ).astype(jnp.bfloat16)                                        # [S, f_pad, n_pad]
    yT = (jnp.pad(Yt.astype(jnp.float32),
                  ((0, c_pad - C_out), (0, n_pad - Pi))) * sqp
          ).astype(jnp.bfloat16)                                         # [c_pad, n_pad]

    xx, xy = _gram_pallas(xiT, yT, nb=nb, tn=tn, split_reduction=split_reduction)
    if split_reduction:
        xx = jnp.sum(xx, axis=0, keepdims=True)
        xy = jnp.sum(xy, axis=0, keepdims=True)
    return xx[:, :F, :F], xy[:, :F, :C_out]


# --------------------------------------------------------------------------- #
# Glue (plain JAX): Cholesky-based rsample, logP/logQ
# --------------------------------------------------------------------------- #
def gi_linear_weights_forward(X, u, log_prec_scaled, z_key, *,
                              inducing_batch, log_prec_lr=1.0):
    """GILinearWeights.forward (first call: self._sample is None; prec_L is None;
    precs == 1, i.e. neuron_prec=False at construction).

    X : [S, B, F]       (F = in_features (+1 if the caller appended the bias column))
    u : [C_out, Pi, 1]  inducing targets
    log_prec_scaled : [1, 1, Pi]

    Returns:
      sample : [S, C_out, F]   rsampled weights (what forward returns)
      logpq  : [S]             logP - logQ (stored as self.logpq in torch)
    """
    S, _, F = X.shape
    C_out, Pi, _ = u.shape
    assert Pi == inducing_batch

    Xi = X[:, :inducing_batch, :].astype(jnp.float32)                   # [S, Pi, F]
    prec_vec = jnp.exp(log_prec_lr * log_prec_scaled).reshape(Pi)
    # TODO(synk): neuron_prec=True (per-output precisions) and full_prec (prec_L)
    # parameter paths are not implemented; this is the default precs==1 branch.

    # ---- Pallas hot path: XiLXi = Xi^T diag(prec) Xi, XiLY = Xi^T diag(prec) Y ----
    # NOTE: bf16 MXU inputs with f32 accumulation feed a Cholesky; the +F*I prior
    # keeps prec_mat well-conditioned at these scales.
    XiLXi, XiLY = gram_stats(Xi, u[..., 0].astype(jnp.float32), prec_vec)

    XLX = XiLXi[:, None]                                    # [S, 1, F, F]
    XLY = jnp.swapaxes(XiLY, -1, -2)[..., None]             # [S, C_out, F, 1]

    # NealPrior over in_shape=(in_features + bias,): variance 1/fan_in -> prec = F*I.
    prior_scale = float(F)
    prec_mat = XLX + prior_scale * jnp.eye(F, dtype=jnp.float32)

    # TODO(synk): Cholesky / triangular solves are sequential FxF factorizations with
    # no clean Pallas TPU equivalent; kept in jnp / jax.scipy (XLA).
    L = jnp.linalg.cholesky(prec_mat)                        # [S, 1, F, F]
    logdet_prec = 2.0 * jnp.sum(
        jnp.log(jnp.diagonal(L, axis1=-2, axis2=-1)), axis=-1)           # [S, 1]
    logdet_prec = jnp.sum(jnp.broadcast_to(logdet_prec, (S, C_out)), axis=-1)    # [S]

    # First-call branch of rsample_logpq_weights (self._sample is None).
    Z = jax.random.normal(z_key, (S, C_out, F, 1), dtype=jnp.float32)
    Lb = jnp.broadcast_to(L, (S, C_out, F, F))
    dW = jax.scipy.linalg.solve_triangular(Lb, Z, lower=True, trans='T')  # L^T dW = Z
    mean = jax.scipy.linalg.cho_solve((Lb, True), XLY)                    # prec^{-1} XLY
    sample = (mean + dW)[..., 0]                                          # [S, C_out, F]

    # logP = mvnormal_log_prob_unnorm(prior_prec, sample^T), prior_prec = F*I.
    # TODO(synk): bayesfunc's exact normalization-constant convention unverified;
    # using -0.5*tr(W Lambda W^T) + 0.5*out_features*logdet(Lambda).
    logP = (-0.5 * prior_scale * jnp.sum(sample ** 2, axis=(-1, -2))
            + 0.5 * C_out * F * math.log(prior_scale))
    logQ = -0.5 * jnp.sum(Z ** 2, axis=(-1, -2, -3)) + 0.5 * logdet_prec
    logpq = logP - logQ
    return sample, logpq


# --------------------------------------------------------------------------- #
if __name__ == "__main__":
    key = jax.random.PRNGKey(0)
    kx, ku, kp, kz = jax.random.split(key, 4)

    # Small shapes consistent with the module; Pi=600 pads to a single 640-lane
    # reduction tile (nb == 1) through the kernel's direct-store path.
    S, B, in_features, out_features = 2, 640, 32, 16
    inducing_batch = 600
    log_prec_init, log_prec_lr = -4.0, 1.0

    X = jax.random.normal(kx, (S, B, in_features), dtype=jnp.float32)
    u = jax.random.normal(ku, (out_features, inducing_batch, 1), dtype=jnp.float32)
    # __init__ sets log_prec_scaled = lp_init * ones; perturb per point so the
    # fused sqrt(prec) column scaling is actually exercised by the check below.
    log_prec_scaled = ((log_prec_init / log_prec_lr)
                       + 0.5 * jax.random.normal(kp, (1, 1, inducing_batch),
                                                 dtype=jnp.float32))

    fwd = jax.jit(partial(gi_linear_weights_forward,
                          inducing_batch=inducing_batch,
                          log_prec_lr=log_prec_lr))
    sample, logpq = fwd(X, u, log_prec_scaled, kz)
    jax.block_until_ready((sample, logpq))

    assert sample.shape == (S, out_features, in_features)
    assert logpq.shape == (S,)
    assert np.all(np.isfinite(np.asarray(sample)))
    assert np.all(np.isfinite(np.asarray(logpq)))

    # Cross-check the Pallas Gram kernel against a plain-JAX f32 reference
    # (bf16 MXU inputs with f32 accumulation -> modest tolerance).
    Xi = X[:, :inducing_batch, :]
    Yt = u[..., 0]
    prec_vec = jnp.exp(log_prec_lr * log_prec_scaled).reshape(-1)
    xtx, xty = gram_stats(Xi, Yt, prec_vec)
    xtx_ref = jnp.einsum('spf,p,spg->sfg', Xi, prec_vec, Xi)
    xty_ref = jnp.einsum('spf,p,cp->sfc', Xi, prec_vec, Yt)
    np.testing.assert_allclose(np.asarray(xtx), np.asarray(xtx_ref),
                               rtol=2e-2, atol=2e-2)
    np.testing.assert_allclose(np.asarray(xty), np.asarray(xty_ref),
                               rtol=2e-2, atol=2e-2)

    # Also exercise the S == 1 split-reduction path (two-TensorCore plan on v7x).
    xtx1, xty1 = gram_stats(Xi[:1], Yt, prec_vec)
    np.testing.assert_allclose(np.asarray(xtx1), np.asarray(xtx_ref[:1]),
                               rtol=2e-2, atol=2e-2)
    np.testing.assert_allclose(np.asarray(xty1), np.asarray(xty_ref[:1]),
                               rtol=2e-2, atol=2e-2)

    print("KERNEL_OK")
</pallas_src>

<mosaic_0001>
module attributes {stable_mosaic.version = 11 : i64} {
  func.func @_gram_kernel(%arg0: i32, %arg1: i32, %arg2: memref<1x32x640xbf16, #tpu.memory_space<vmem>>, %arg3: memref<16x640xbf16, #tpu.memory_space<vmem>>, %arg4: memref<1x32x32xf32, #tpu.memory_space<vmem>>, %arg5: memref<1x32x16xf32, #tpu.memory_space<vmem>>) attributes {dimension_semantics = [#tpu.dimension_semantics<parallel>, #tpu.dimension_semantics<arbitrary>], iteration_bounds = array<i64: 2, 1>, scalar_prefetch = 0 : i64, scratch_operands = 0 : i64, tpu.core_type = #tpu.core_type<tc>, window_params = [{transform_indices = @transform_0, window_bounds = array<i64: 1, 32, 640>}, {transform_indices = @transform_1, window_bounds = array<i64: 16, 640>}, {transform_indices = @transform_2, window_bounds = array<i64: 1, 32, 32>}, {transform_indices = @transform_3, window_bounds = array<i64: 1, 32, 16>}]} {
    %c0 = arith.constant 0 : index
    %c0_0 = arith.constant 0 : index
    %c0_1 = arith.constant 0 : index
    %0 = vector.load %arg2[%c0, %c0_0, %c0_1] : memref<1x32x640xbf16, #tpu.memory_space<vmem>>, vector<1x32x640xbf16>
    %1 = vector.shape_cast %0 : vector<1x32x640xbf16> to vector<32x640xbf16>
    %c0_2 = arith.constant 0 : index
    %c0_3 = arith.constant 0 : index
    %2 = vector.load %arg3[%c0_2, %c0_3] : memref<16x640xbf16, #tpu.memory_space<vmem>>, vector<16x640xbf16>
    %cst = arith.constant dense<0.000000e+00> : vector<32x32xf32>
    %3 = tpu.matmul %1, %1, %cst {dimension_numbers = #tpu.dot_dimension_numbers<[1], [1], [0], [0], [0, 0, 1, 0], [], []>} : vector<32x640xbf16>, vector<32x640xbf16>, vector<32x32xf32> -> vector<32x32xf32>
    %cst_4 = arith.constant dense<0.000000e+00> : vector<32x16xf32>
    %4 = tpu.matmul %1, %2, %cst_4 {dimension_numbers = #tpu.dot_dimension_numbers<[1], [1], [0], [0], [0, 0, 1, 0], [], []>} : vector<32x640xbf16>, vector<16x640xbf16>, vector<32x16xf32> -> vector<32x16xf32>
    %c0_5 = arith.constant 0 : index
    %c0_6 = arith.constant 0 : index
    %c0_7 = arith.constant 0 : index
    %5 = vector.load %arg4[%c0_5, %c0_6, %c0_7] : memref<1x32x32xf32, #tpu.memory_space<vmem>>, vector<1x32x32xf32>
    %6 = vector.shape_cast %5 : vector<1x32x32xf32> to vector<32x32xf32>
    %7 = vector.shape_cast %3 : vector<32x32xf32> to vector<1x32x32xf32>
    tpu.vector_store %arg4[%c0_5, %c0_6, %c0_7], %7 {strides = array<i32>} : memref<1x32x32xf32, #tpu.memory_space<vmem>>, vector<1x32x32xf32>,
    %c0_8 = arith.constant 0 : index
    %c0_9 = arith.constant 0 : index
    %c0_10 = arith.constant 0 : index
    %8 = vector.load %arg5[%c0_8, %c0_9, %c0_10] : memref<1x32x16xf32, #tpu.memory_space<vmem>>, vector<1x32x16xf32>
    %9 = vector.shape_cast %8 : vector<1x32x16xf32> to vector<32x16xf32>
    %10 = vector.shape_cast %4 : vector<32x16xf32> to vector<1x32x16xf32>
    tpu.vector_store %arg5[%c0_8, %c0_9, %c0_10], %10 {strides = array<i32>} : memref<1x32x16xf32, #tpu.memory_space<vmem>>, vector<1x32x16xf32>,
    return
  }
  func.func @transform_0(%arg0: i32, %arg1: i32) -> (i32, i32, i32) {
    %c0_i32 = arith.constant 0 : i32
    %c0_i32_0 = arith.constant 0 : i32
    return %arg0, %c0_i32, %arg1 : i32, i32, i32
  }
  func.func @transform_1(%arg0: i32, %arg1: i32) -> (i32, i32) {
    %c0_i32 = arith.constant 0 : i32
    %c0_i32_0 = arith.constant 0 : i32
    return %c0_i32, %arg1 : i32, i32
  }
  func.func @transform_2(%arg0: i32, %arg1: i32) -> (i32, i32, i32) {
    %c0_i32 = arith.constant 0 : i32
    %c0_i32_0 = arith.constant 0 : i32
    %c0_i32_1 = arith.constant 0 : i32
    return %arg0, %c0_i32, %c0_i32_0 : i32, i32, i32
  }
  func.func @transform_3(%arg0: i32, %arg1: i32) -> (i32, i32, i32) {
    %c0_i32 = arith.constant 0 : i32
    %c0_i32_0 = arith.constant 0 : i32
    %c0_i32_1 = arith.constant 0 : i32
    return %arg0, %c0_i32, %c0_i32_0 : i32, i32, i32
  }
}

</mosaic_0001>

<bundles_post_ra>
// kernel: custom-call.5
= control target key start
LH: loop header
LB: loop body
LE: loop exit
PB: predicated region body
PF: predicated region fallthrough
CT: control target
= control target key end

     0   :  { %s2349_s6 = smov 0   ;;  %s2351_s7 = smov 0   ;;  %s2922_s0 = inlined_call_operand.vmem [shape: f32[2,1,32,32], index: 0, kind: input, shape index: {}]   ;;  %s2923_s1 = inlined_call_operand.vmem [shape: f32[2,1,32,32], index: 1, kind: output, shape index: {}]  }
   0x1   :  { %s2353_s8 = smov 0  }
   0x2 LB: > { %s1927_s9 = sadd.s32 4294967295, %s2336_s8   ;;  %s33_s10 = sadd.s32 1, %s2332_s7  ;;  %s2336_s8 = sphi %s2353_s8, %s7_s8   ;;  %s2332_s7 = sphi %s2351_s7, %s2925_s7   ;;  %s2328_s6 = sphi %s2349_s6, %s2924_s6  }
   0x3   : > { %p35_p0 = scmp.ge.s32.totalorder %s33_s10, 2  ;;  %p1929_p1 = scmp.ge.s32.totalorder %s2336_s8, 2 }
   0x4   : > { %s49_s11 = sand.u32 (!%p1929_p1), 1, %s2336_s8   ;;  %s2222_s12 = sshll.u32 (!%p1929_p1), %s2332_s7, 5 }
   0x5   : > { %s2927_s10 = smov (%p35_p0, %s33_s10), 0  ;;  %47 = sbr.rel (%p1929_p1) target bundleno = 15 (0xf), region = 16 }
   0x6   : > { %s1930_s13 = sshll.u32 (!%p1929_p1), %s49_s11, 5  ;;  %s58_s16 = scalar_lea.vmem (!%p1929_p1), %s2922_s0, %s2222_s12 }
   0x7   : > { %s51_s17 = scalar_lea.vmem (!%p1929_p1), [#allocation0], %s1930_s13 }
   0xa   : > { %v93_v0 = vld [vmem:[%s58_s16] sm:$0xff]  ;;  %v95_v1 = vld [vmem:[%s58_s16 + $0x8] sm:$0xff]  ;;  %v97_v2 = vld [vmem:[%s58_s16 + $0x10] sm:$0xff] }
   0xb   : > { %94 = vst [vmem:[%s51_s17] sm:$0xff] %v93_v0  ;;  %v99_v3 = vld [vmem:[%s58_s16 + $0x18] sm:$0xff] }
   0xc   : > { %96 = vst [vmem:[%s51_s17 + $0x8] sm:$0xff] %v95_v1 }
   0xd   : > { %98 = vst [vmem:[%s51_s17 + $0x10] sm:$0xff] %v97_v2 }
   0xe   : > { %100 = vst [vmem:[%s51_s17 + $0x18] sm:$0xff] %v99_v3 }
   0xf PF: > { %p1933_p2 = scmp.ge.s32.totalorder %s2336_s8, 1  ;;  %p105_p3 = scmp.lt.s32.totalorder %s2336_s8, 3 }
  0x11   : > { %p106_p4 = pnand %p1933_p2, %p105_p3 }
  0x12   : > { %s112_s18 = sand.u32 (!%p106_p4), 1, %s1927_s9   ;;  %s2223_s22 = sshll.u32 (!%p106_p4), %s2328_s6, 5 }
  0x13   : > { %109 = sbr.rel (%p106_p4) target bundleno = 5002 (0x138a), region = 54  ;;  %s1934_s19 = sshll.u32 (!%p106_p4), %s112_s18, 5 }
  0x14   : > { %s2376_s20 = scalar_lea.vmem (!%p106_p4), [#allocation1], %s1934_s19  ;;  %s2384_s21 = scalar_lea.vmem (!%p106_p4), [#allocation0], %s1934_s19 }
  0x15   : > { %s2890_s25 = scalar_lea.vmem (!%p106_p4), %s2923_s1, %s2223_s22 }
  0x18   : > { %v2338_v4 = vmov 0.0   ;;  %v132_v8 = vld [vmem:[%s2384_s21] ss:$0 sm:$0xff]  ;;  %vm130_vm3 = vcmask 7168   ;;  %v2400_v25 = vld [vmem:[%s2384_s21 + $0x8] sm:$0xff]  ;;  %vm196_vm5 = vcmask 15368  }
  0x19   : > { %123 = vst [vmem:[%s2376_s20] sm:$0xff] %v2338_v4  ;;  %v2388_v16 = vld [vmem:[%s2384_s21] sm:$0xff]  ;;  %vm222_vm6 = vcmask 1047553   ;;  %vm266_vm11 = vcmask 23568   ;;  %vm292_vm12 = vcmask 1047554  }
  0x1a   : > { %v1949_v32 = vld [vmem:[%s2384_s21 + $0x1] ss:$0 sm:$0xff]  ;;  %vm223_vm9 = vmand %vm196_vm5, %vm222_vm6  ;;  %v1960_v56 = vld [vmem:[%s2384_s21 + $0x2] ss:$0 sm:$0xff] }
  0x1b   : > { %vm293_vm15 = vmand %vm266_vm11, %vm292_vm12 }
  0x20   : > { %v131_v5 = vld [vmem:[%s2376_s20] ss:$0 sm:$0xff] }
  0x21   : > { %v133_v6 = vmul.f32 %v131_v5, %v131_v5  ;;  %v2380_v7 = vmul.f32 0.0, %v131_v5 }
  0x23   : > { %134 = vadd.xlane.f32.xlu0 %v133_v6  ;;  %162 = vadd.xlane.f32.xlu2 %v2380_v7 }
  0x2b   : > { %150 = vadd.xlane.f32.xlu0 %v2380_v7 }
  0x96   : > { %v135_v9 = vpop.xlane.xlu0 %134  ;;  %v163_v24 = vpop.xlane.xlu2 %162 }
  0x97   : > { %v136_v10 = vsub.f32 %v132_v8, %v135_v9  ;;  %v164_v27 = vsub.f32 %v2400_v25, %v163_v24 }
  0x99   : > { %2249 = vrsqrt.f32 %v136_v10  ;;  %vm143_vm1 = vweird.f32 %v136_v10 }
  0x9e   : > { %v151_v15 = vpop.xlane.xlu0 %150 }
  0x9f   : > { %v2250_v11 = vpop.eup %2249  ;;  %v152_v18 = vsub.f32 %v2388_v16, %v151_v15 }
  0xa0   : > { %v138_v12 = vmul.f32 %v2250_v11, %v136_v10  ;;  %vm144_vm0 = vweird.f32 %v2250_v11 }
  0xa1   : > { %vm145_vm2 = vmor %vm143_vm1, %vm144_vm0  ;;  %vm336_vm1 = vcmask 31768  }
  0xa2   : > { %v139_v13 = vmul.f32 %v2250_v11, %v138_v12 }
  0xa4   : > { %v140_v14 = vmul.f32 0.5, %v139_v13 }
  0xa6   : > { %v141_v17 = vsub.f32 1.5, %v140_v14 }
  0xa8   : > { %v142_v19 = vmul.f32 %v2250_v11, %v141_v17 }
  0xaa   : > { %v2391_v20 = vsel %vm145_vm2, %v2250_v11, %v142_v19  ;;  %vm362_vm2 = vcmask 1047555  }
  0xab   : > { %v153_v21 = vmul.f32 %v152_v18, %v2391_v20  ;;  %v165_v28 = vmul.f32 %v164_v27, %v2391_v20  ;;  %v1971_v18 = vld [vmem:[%s2384_s21 + $0x3] ss:$0 sm:$0xff] }
  0xad   : > { %v154_v22 = vsel %vm130_vm3, %v153_v21, 0.0  ;;  %v166_v30 = vsel %vm130_vm3, %v165_v28, 0.0 }
  0xae   : > { %156 = vst [vmem:[%s2376_s20] sm:$0xff] %v154_v22 }
  0xb5   : > { %v2397_v23 = vld [vmem:[%s2376_s20 + $0x1] ss:$0 sm:$0xff] }
  0xb6   : > { %v201_v26 = vmul.f32 %v2397_v23, %v2397_v23  ;;  %v217_v29 = vmul.f32 %v2397_v23, %v154_v22  ;;  %v231_v31 = vmul.f32 %v2397_v23, %v166_v30 }
  0xb8   : > { %202 = vadd.xlane.f32.xlu1 %v201_v26 }
  0xc0   : > { %218 = vadd.xlane.f32.xlu1 %v217_v29 }
  0xc8   : > { %232 = vadd.xlane.f32.xlu1 %v231_v31 }
 0x12b   : > { %v203_v33 = vpop.xlane.xlu1 %202 }
 0x12c   : > { %v204_v34 = vsub.f32 %v1949_v32, %v203_v33 }
 0x12e   : > { %2251 = vrsqrt.f32 %v204_v34  ;;  %vm211_vm7 = vweird.f32 %v204_v34 }
 0x133   : > { %v219_v37 = vpop.xlane.xlu1 %218 }
 0x134   : > { %v2252_v35 = vpop.eup %2251  ;;  %v220_v42 = vsub.f32 %v2388_v16, %v219_v37 }
 0x135   : > { %v206_v36 = vmul.f32 %v2252_v35, %v204_v34  ;;  %vm212_vm4 = vweird.f32 %v2252_v35 }
 0x136   : > { %vm213_vm8 = vmor %vm211_vm7, %vm212_vm4 }
 0x137   : > { %v207_v38 = vmul.f32 %v2252_v35, %v206_v36 }
 0x139   : > { %v208_v39 = vmul.f32 0.5, %v207_v38  ;;  %v2455_v38 = vld [vmem:[%s2384_s21 + $0x10] sm:$0xff] }
 0x13b   : > { %v209_v40 = vsub.f32 1.5, %v208_v39  ;;  %v233_v44 = vpop.xlane.xlu1 %232 }
 0x13c   : > { %v234_v47 = vsub.f32 %v2400_v25, %v233_v44 }
 0x13d   : > { %v210_v41 = vmul.f32 %v2252_v35, %v209_v40 }
 0x13f   : > { %v2411_v43 = vsel %vm213_vm8, %v2252_v35, %v210_v41  ;;  %vm363_vm8 = vmand %vm336_vm1, %vm362_vm2 }
 0x140   : > { %v221_v45 = vmul.f32 %v220_v42, %v2411_v43  ;;  %v235_v49 = vmul.f32 %v234_v47, %v2411_v43 }
 0x142   : > { %v224_v46 = vsel %vm223_vm9, %v221_v45, 0.0  ;;  %v236_v50 = vsel %vm196_vm5, %v235_v49, 0.0 }
 0x143   : > { %v225_v48 = vadd.f32 %v224_v46, %v154_v22  ;;  %v237_v51 = vadd.f32 %v236_v50, %v166_v30 }
 0x145   : > { %226 = vst [vmem:[%s2376_s20] sm:$0xff] %v225_v48 }
 0x14c   : > { %v2421_v52 = vld [vmem:[%s2376_s20 + $0x2] ss:$0 sm:$0xff] }
 0x14d   : > { %v287_v53 = vmul.f32 %v2421_v52, %v225_v48  ;;  %v271_v54 = vmul.f32 %v2421_v52, %v2421_v52  ;;  %v301_v55 = vmul.f32 %v2421_v52, %v237_v51 }
 0x14f   : > { %288 = vadd.xlane.f32.xlu0 %v287_v53  ;;  %272 = vadd.xlane.f32.xlu2 %v271_v54  ;;  %v1982_v53 = vld [vmem:[%s2384_s21 + $0x4] ss:$0 sm:$0xff] }
 0x150   : > { %302 = vadd.xlane.f32.xlu1 %v301_v55 }
 0x1c2   : > { %v273_v57 = vpop.xlane.xlu2 %272  ;;  %v289_v63 = vpop.xlane.xlu0 %288 }
 0x1c3   : > { %v274_v58 = vsub.f32 %v1960_v56, %v273_v57  ;;  %v290_v2 = vsub.f32 %v2388_v16, %v289_v63  ;;  %v303_v4 = vpop.xlane.xlu1 %302 }
 0x1c4   : > { %v304_v8 = vsub.f32 %v2400_v25, %v303_v4 }
 0x1c5   : > { %2253 = vrsqrt.f32 %v274_v58  ;;  %vm281_vm13 = vweird.f32 %v274_v58 }
 0x1cb   : > { %v2254_v59 = vpop.eup %2253 }
 0x1cc   : > { %v276_v60 = vmul.f32 %v2254_v59, %v274_v58  ;;  %vm282_vm10 = vweird.f32 %v2254_v59 }
 0x1cd   : > { %vm283_vm14 = vmor %vm281_vm13, %vm282_vm10  ;;  %vm406_vm10 = vcmask 39968   ;;  %vm432_vm13 = vcmask 1047556  }
 0x1ce   : > { %v277_v61 = vmul.f32 %v2254_v59, %v276_v60 }
 0x1d0   : > { %v278_v62 = vmul.f32 0.5, %v277_v61 }
 0x1d2   : > { %v279_v0 = vsub.f32 1.5, %v278_v62 }
 0x1d4   : > { %v280_v1 = vmul.f32 %v2254_v59, %v279_v0 }
 0x1d6   : > { %v2429_v3 = vsel %vm283_vm14, %v2254_v59, %v280_v1 }
 0x1d7   : > { %v291_v5 = vmul.f32 %v290_v2, %v2429_v3  ;;  %v305_v10 = vmul.f32 %v304_v8, %v2429_v3 }
 0x1d9   : > { %v294_v6 = vsel %vm293_vm15, %v291_v5, 0.0  ;;  %v306_v11 = vsel %vm266_vm11, %v305_v10, 0.0 }
 0x1da   : > { %v295_v9 = vadd.f32 %v294_v6, %v225_v48  ;;  %v307_v12 = vadd.f32 %v306_v11, %v237_v51 }
 0x1dc   : > { %296 = vst [vmem:[%s2376_s20] sm:$0xff] %v295_v9 }
 0x1e3   : > { %v2439_v13 = vld [vmem:[%s2376_s20 + $0x3] ss:$0 sm:$0xff] }
 0x1e4   : > { %v357_v14 = vmul.f32 %v2439_v13, %v295_v9  ;;  %v341_v15 = vmul.f32 %v2439_v13, %v2439_v13  ;;  %v371_v17 = vmul.f32 %v2439_v13, %v307_v12 }
 0x1e6   : > { %358 = vadd.xlane.f32.xlu0 %v357_v14  ;;  %342 = vadd.xlane.f32.xlu2 %v341_v15 }
 0x1e7   : > { %372 = vadd.xlane.f32.xlu1 %v371_v17 }
 0x1ee   : > { %175 = vadd.xlane.f32.xlu2 %v2380_v7 }
 0x259   : > { %v343_v19 = vpop.xlane.xlu2 %342  ;;  %v359_v28 = vpop.xlane.xlu0 %358 }
 0x25a   : > { %v344_v21 = vsub.f32 %v1971_v18, %v343_v19  ;;  %v360_v31 = vsub.f32 %v2388_v16, %v359_v28  ;;  %v373_v33 = vpop.xlane.xlu1 %372 }
 0x25b   : > { %v374_v36 = vsub.f32 %v2400_v25, %v373_v33  ;;  %v1993_v33 = vld [vmem:[%s2384_s21 + $0x5] ss:$0 sm:$0xff] }
 0x25c   : > { %2255 = vrsqrt.f32 %v344_v21  ;;  %vm351_vm4 = vweird.f32 %v344_v21 }
 0x261   : > { %v176_v39 = vpop.xlane.xlu2 %175 }
 0x262   : > { %v2256_v22 = vpop.eup %2255  ;;  %v177_v41 = vsub.f32 %v2455_v38, %v176_v39 }
 0x263   : > { %v346_v24 = vmul.f32 %v2256_v22, %v344_v21  ;;  %vm352_vm0 = vweird.f32 %v2256_v22 }
 0x264   : > { %vm353_vm7 = vmor %vm351_vm4, %vm352_vm0  ;;  %v178_v44 = vmul.f32 %v177_v41, %v2391_v20 }
 0x265   : > { %v347_v26 = vmul.f32 %v2256_v22, %v346_v24  ;;  %vm433_vm0 = vmand %vm406_vm10, %vm432_vm13 }
 0x266   : > { %v179_v50 = vsel %vm130_vm3, %v178_v44, 0.0 }
 0x267   : > { %v348_v27 = vmul.f32 0.5, %v347_v26  ;;  %v244_v51 = vmul.f32 %v2397_v23, %v179_v50 }
 0x269   : > { %v349_v29 = vsub.f32 1.5, %v348_v27 }
 0x26b   : > { %v350_v30 = vmul.f32 %v2256_v22, %v349_v29 }
 0x26d   : > { %v2448_v32 = vsel %vm353_vm7, %v2256_v22, %v350_v30  ;;  %vm476_vm7 = vcmask 48168  }
 0x26e   : > { %v361_v34 = vmul.f32 %v360_v31, %v2448_v32  ;;  %v375_v40 = vmul.f32 %v374_v36, %v2448_v32 }
 0x270   : > { %v364_v35 = vsel %vm363_vm8, %v361_v34, 0.0  ;;  %v376_v42 = vsel %vm336_vm1, %v375_v40, 0.0  ;;  %vm502_vm8 = vcmask 1047557  }
 0x271   : > { %v365_v37 = vadd.f32 %v364_v35, %v295_v9  ;;  %v377_v45 = vadd.f32 %v376_v42, %v307_v12 }
 0x273   : > { %366 = vst [vmem:[%s2376_s20] sm:$0xff] %v365_v37 }
 0x27a   : > { %v2463_v46 = vld [vmem:[%s2376_s20 + $0x4] ss:$0 sm:$0xff] }
 0x27b   : > { %v427_v47 = vmul.f32 %v2463_v46, %v365_v37  ;;  %v411_v48 = vmul.f32 %v2463_v46, %v2463_v46  ;;  %v441_v49 = vmul.f32 %v2463_v46, %v377_v45 }
 0x27d   : > { %428 = vadd.xlane.f32.xlu2 %v427_v47  ;;  %412 = vadd.xlane.f32.xlu0 %v411_v48 }
 0x27e   : > { %442 = vadd.xlane.f32.xlu1 %v441_v49 }
 0x285   : > { %245 = vadd.xlane.f32.xlu0 %v244_v51 }
 0x2f0   : > { %v413_v54 = vpop.xlane.xlu0 %412  ;;  %v429_v2 = vpop.xlane.xlu2 %428 }
 0x2f1   : > { %v414_v55 = vsub.f32 %v1982_v53, %v413_v54  ;;  %v430_v6 = vsub.f32 %v2388_v16, %v429_v2  ;;  %v443_v12 = vpop.xlane.xlu1 %442 }
 0x2f2   : > { %v444_v14 = vsub.f32 %v2400_v25, %v443_v12 }
 0x2f3   : > { %2257 = vrsqrt.f32 %v414_v55  ;;  %vm421_vm14 = vweird.f32 %v414_v55 }
 0x2f8   : > { %v246_v56 = vpop.xlane.xlu0 %245 }
 0x2f9   : > { %v2258_v57 = vpop.eup %2257  ;;  %v247_v58 = vsub.f32 %v2455_v38, %v246_v56 }
 0x2fa   : > { %v416_v59 = vmul.f32 %v2258_v57, %v414_v55  ;;  %vm422_vm9 = vweird.f32 %v2258_v57 }
 0x2fb   : > { %v248_v60 = vmul.f32 %v247_v58, %v2411_v43  ;;  %vm423_vm15 = vmor %vm421_vm14, %vm422_vm9 }
 0x2fc   : > { %v417_v61 = vmul.f32 %v2258_v57, %v416_v59 }
 0x2fd   : > { %v249_v62 = vsel %vm196_vm5, %v248_v60, 0.0 }
 0x2fe   : > { %v418_v63 = vmul.f32 0.5, %v417_v61  ;;  %v250_v0 = vadd.f32 %v249_v62, %v179_v50 }
 0x300   : > { %v419_v1 = vsub.f32 1.5, %v418_v63  ;;  %v314_v4 = vmul.f32 %v2421_v52, %v250_v0 }
 0x302   : > { %v420_v5 = vmul.f32 %v2258_v57, %v419_v1  ;;  %315 = vadd.xlane.f32.xlu1 %v314_v4 }
 0x304   : > { %v2477_v8 = vsel %vm423_vm15, %v2258_v57, %v420_v5 }
 0x305   : > { %v431_v9 = vmul.f32 %v430_v6, %v2477_v8  ;;  %v445_v15 = vmul.f32 %v444_v14, %v2477_v8 }
 0x307   : > { %v434_v10 = vsel %vm433_vm0, %v431_v9, 0.0  ;;  %v446_v21 = vsel %vm406_vm10, %v445_v15, 0.0  ;;  %vm546_vm0 = vcmask 56368  }
 0x308   : > { %v435_v11 = vadd.f32 %v434_v10, %v365_v37  ;;  %v447_v22 = vadd.f32 %v446_v21, %v377_v45  ;;  %v2500_v37 = vld [vmem:[%s2384_s21 + $0x18] sm:$0xff] }
 0x30a   : > { %436 = vst [vmem:[%s2376_s20] sm:$0xff] %v435_v11 }
 0x311   : > { %v2486_v17 = vld [vmem:[%s2376_s20 + $0x5] ss:$0 sm:$0xff] }
 0x312   : > { %v497_v18 = vmul.f32 %v2486_v17, %v435_v11  ;;  %v481_v19 = vmul.f32 %v2486_v17, %v2486_v17  ;;  %v511_v24 = vmul.f32 %v2486_v17, %v447_v22 }
 0x314   : > { %498 = vadd.xlane.f32.xlu0 %v497_v18  ;;  %482 = vadd.xlane.f32.xlu2 %v481_v19  ;;  %v2004_v18 = vld [vmem:[%s2384_s21 + $0x6] ss:$0 sm:$0xff] }
 0x31c   : > { %188 = vadd.xlane.f32.xlu0 %v2380_v7  ;;  %512 = vadd.xlane.f32.xlu2 %v511_v24 }
 0x375   : > { %v316_v26 = vpop.xlane.xlu1 %315 }
 0x376   : > { %v317_v27 = vsub.f32 %v2455_v38, %v316_v26 }
 0x378   : > { %v318_v28 = vmul.f32 %v317_v27, %v2429_v3 }
 0x37a   : > { %v319_v29 = vsel %vm266_vm11, %v318_v28, 0.0 }
 0x37b   : > { %v320_v30 = vadd.f32 %v319_v29, %v250_v0 }
 0x37d   : > { %v384_v31 = vmul.f32 %v2439_v13, %v320_v30 }
 0x37f   : > { %385 = vadd.xlane.f32.xlu2 %v384_v31 }
 0x387   : > { %v499_v34 = vpop.xlane.xlu0 %498  ;;  %v483_v35 = vpop.xlane.xlu2 %482 }
 0x388   : > { %v484_v36 = vsub.f32 %v1993_v33, %v483_v35  ;;  %v500_v51 = vsub.f32 %v2388_v16, %v499_v34 }
 0x38a   : > { %2259 = vrsqrt.f32 %v484_v36  ;;  %vm491_vm9 = vweird.f32 %v484_v36 }
 0x38f   : > { %v189_v7 = vpop.xlane.xlu0 %188 }
 0x390   : > { %v2260_v39 = vpop.eup %2259  ;;  %v190_v40 = vsub.f32 %v2500_v37, %v189_v7 }
 0x391   : > { %v486_v41 = vmul.f32 %v2260_v39, %v484_v36  ;;  %vm492_vm4 = vweird.f32 %v2260_v39 }
 0x392   : > { %v191_v42 = vmul.f32 %v190_v40, %v2391_v20  ;;  %vm493_vm14 = vmor %vm491_vm9, %vm492_vm4  ;;  %vm572_vm4 = vcmask 1047558  }
 0x393   : > { %v487_v44 = vmul.f32 %v2260_v39, %v486_v41 }
 0x394   : > { %v192_v45 = vsel %vm130_vm3, %v191_v42, 0.0  ;;  %vm503_vm3 = vmand %vm476_vm7, %vm502_vm8 }
 0x395   : > { %v488_v47 = vmul.f32 0.5, %v487_v44  ;;  %v257_v49 = vmul.f32 %v2397_v23, %v192_v45  ;;  %v513_v23 = vpop.xlane.xlu2 %512 }
 0x396   : > { %v514_v56 = vsub.f32 %v2400_v25, %v513_v23 }
 0x397   : > { %v489_v48 = vsub.f32 1.5, %v488_v47  ;;  %258 = vadd.xlane.f32.xlu2 %v257_v49 }
 0x399   : > { %v490_v50 = vmul.f32 %v2260_v39, %v489_v48 }
 0x39b   : > { %v2507_v53 = vsel %vm493_vm14, %v2260_v39, %v490_v50  ;;  %vm573_vm14 = vmand %vm546_vm0, %vm572_vm4 }
 0x39c   : > { %v501_v20 = vmul.f32 %v500_v51, %v2507_v53  ;;  %v515_v57 = vmul.f32 %v514_v56, %v2507_v53 }
 0x39e   : > { %v504_v54 = vsel %vm503_vm3, %v501_v20, 0.0  ;;  %v516_v61 = vsel %vm476_vm7, %v515_v57, 0.0  ;;  %v2015_v57 = vld [vmem:[%s2384_s21 + $0x7] ss:$0 sm:$0xff] }
 0x39f   : > { %v505_v55 = vadd.f32 %v504_v54, %v435_v11  ;;  %v517_v62 = vadd.f32 %v516_v61, %v447_v22 }
 0x3a1   : > { %506 = vst [vmem:[%s2376_s20] sm:$0xff] %v505_v55 }
 0x3a8   : > { %v2516_v58 = vld [vmem:[%s2376_s20 + $0x6] ss:$0 sm:$0xff] }
 0x3a9   : > { %v567_v59 = vmul.f32 %v2516_v58, %v505_v55  ;;  %v551_v60 = vmul.f32 %v2516_v58, %v2516_v58  ;;  %v581_v63 = vmul.f32 %v2516_v58, %v517_v62 }
 0x3ab   : > { %568 = vadd.xlane.f32.xlu0 %v567_v59  ;;  %552 = vadd.xlane.f32.xlu1 %v551_v60 }
 0x3b3   : > { %582 = vadd.xlane.f32.xlu1 %v581_v63 }
 0x3f2   : > { %v386_v0 = vpop.xlane.xlu2 %385 }
 0x3f3   : > { %v387_v1 = vsub.f32 %v2455_v38, %v386_v0 }
 0x3f5   : > { %v388_v2 = vmul.f32 %v387_v1, %v2448_v32 }
 0x3f7   : > { %v389_v4 = vsel %vm336_vm1, %v388_v2, 0.0 }
 0x3f8   : > { %v390_v5 = vadd.f32 %v389_v4, %v320_v30 }
 0x3fa   : > { %v454_v6 = vmul.f32 %v2463_v46, %v390_v5 }
 0x3fc   : > { %455 = vadd.xlane.f32.xlu0 %v454_v6 }
 0x40a   : > { %v259_v9 = vpop.xlane.xlu2 %258 }
 0x40b   : > { %v260_v10 = vsub.f32 %v2500_v37, %v259_v9 }
 0x40d   : > { %v261_v11 = vmul.f32 %v260_v10, %v2411_v43 }
 0x40f   : > { %v262_v12 = vsel %vm196_vm5, %v261_v11, 0.0 }
 0x410   : > { %v263_v14 = vadd.f32 %v262_v12, %v192_v45 }
 0x412   : > { %v327_v15 = vmul.f32 %v2421_v52, %v263_v14 }
 0x414   : > { %328 = vadd.xlane.f32.xlu0 %v327_v15 }
 0x41e   : > { %v553_v19 = vpop.xlane.xlu1 %552  ;;  %v569_v28 = vpop.xlane.xlu0 %568 }
 0x41f   : > { %v554_v21 = vsub.f32 %v2004_v18, %v553_v19  ;;  %v570_v52 = vsub.f32 %v2388_v16, %v569_v28 }
 0x421   : > { %2261 = vrsqrt.f32 %v554_v21  ;;  %vm561_vm5 = vweird.f32 %v554_v21 }
 0x426   : > { %v583_v31 = vpop.xlane.xlu1 %582 }
 0x427   : > { %v2262_v22 = vpop.eup %2261  ;;  %v584_v35 = vsub.f32 %v2400_v25, %v583_v31 }
 0x428   : > { %v556_v24 = vmul.f32 %v2262_v22, %v554_v21  ;;  %vm562_vm15 = vweird.f32 %v2262_v22 }
 0x429   : > { %vm563_vm9 = vmor %vm561_vm5, %vm562_vm15  ;;  %vm616_vm5 = vcmask 64568  }
 0x42a   : > { %v557_v26 = vmul.f32 %v2262_v22, %v556_v24 }
 0x42c   : > { %v558_v27 = vmul.f32 0.5, %v557_v26 }
 0x42e   : > { %v559_v29 = vsub.f32 1.5, %v558_v27 }
 0x430   : > { %v560_v43 = vmul.f32 %v2262_v22, %v559_v29 }
 0x432   : > { %v2533_v30 = vsel %vm563_vm9, %v2262_v22, %v560_v43 }
 0x433   : > { %v571_v33 = vmul.f32 %v570_v52, %v2533_v30  ;;  %v585_v7 = vmul.f32 %v584_v35, %v2533_v30  ;;  %v2026_v52 = vld [vmem:[%s2384_s21 + $0x8] ss:$0 sm:$0xff] }
 0x435   : > { %v574_v34 = vsel %vm573_vm14, %v571_v33, 0.0  ;;  %v586_v39 = vsel %vm546_vm0, %v585_v7, 0.0 }
 0x436   : > { %v575_v36 = vadd.f32 %v574_v34, %v505_v55  ;;  %v587_v40 = vadd.f32 %v586_v39, %v517_v62 }
 0x438   : > { %576 = vst [vmem:[%s2376_s20] sm:$0xff] %v575_v36 }
 0x43f   : > { %v2543_v16 = vld [vmem:[%s2376_s20 + $0x7] ss:$0 sm:$0xff] }
 0x440   : > { %v621_v41 = vmul.f32 %v2543_v16, %v2543_v16  ;;  %v651_v42 = vmul.f32 %v2543_v16, %v587_v40 }
 0x442   : > { %622 = vadd.xlane.f32.xlu1 %v621_v41  ;;  %652 = vadd.xlane.f32.xlu2 %v651_v42 }
 0x46f   : > { %v456_v44 = vpop.xlane.xlu0 %455 }
 0x470   : > { %v457_v45 = vsub.f32 %v2455_v38, %v456_v44 }
 0x472   : > { %v458_v47 = vmul.f32 %v457_v45, %v2477_v8 }
 0x474   : > { %v459_v48 = vsel %vm406_vm10, %v458_v47, 0.0 }
 0x475   : > { %v460_v49 = vadd.f32 %v459_v48, %v390_v5 }
 0x477   : > { %v524_v50 = vmul.f32 %v2486_v17, %v460_v49 }
 0x479   : > { %525 = vadd.xlane.f32.xlu1 %v524_v50 }
 0x487   : > { %v329_v51 = vpop.xlane.xlu0 %328 }
 0x488   : > { %v330_v20 = vsub.f32 %v2500_v37, %v329_v51 }
 0x48a   : > { %v331_v54 = vmul.f32 %v330_v20, %v2429_v3 }
 0x48c   : > { %v332_v55 = vsel %vm266_vm11, %v331_v54, 0.0 }
 0x48d   : > { %v333_v23 = vadd.f32 %v332_v55, %v263_v14 }
 0x48f   : > { %v397_v56 = vmul.f32 %v2439_v13, %v333_v23 }
 0x491   : > { %398 = vadd.xlane.f32.xlu0 %v397_v56 }
 0x4b5   : > { %v623_v59 = vpop.xlane.xlu1 %622  ;;  %v653_v1 = vpop.xlane.xlu2 %652 }
 0x4b6   : > { %v624_v60 = vsub.f32 %v2015_v57, %v623_v59  ;;  %v654_v4 = vsub.f32 %v2400_v25, %v653_v1 }
 0x4b8   : > { %2263 = vrsqrt.f32 %v624_v60  ;;  %vm631_vm15 = vweird.f32 %v624_v60 }
 0x4be   : > { %v2264_v61 = vpop.eup %2263 }
 0x4bf   : > { %v626_v62 = vmul.f32 %v2264_v61, %v624_v60  ;;  %vm632_vm3 = vweird.f32 %v2264_v61 }
 0x4c0   : > { %vm633_vm11 = vmor %vm631_vm15, %vm632_vm3  ;;  %vm686_vm3 = vcmask 72768   ;;  %vm744_vm15 = vcmask 80968  }
 0x4c1   : > { %v627_v63 = vmul.f32 %v2264_v61, %v626_v62 }
 0x4c3   : > { %v628_v0 = vmul.f32 0.5, %v627_v63  ;;  %v2037_v63 = vld [vmem:[%s2384_s21 + $0x9] ss:$0 sm:$0xff] }
 0x4c5   : > { %v629_v2 = vsub.f32 1.5, %v628_v0 }
 0x4c7   : > { %v630_v3 = vmul.f32 %v2264_v61, %v629_v2 }
 0x4c9   : > { %v2558_v13 = vsel %vm633_vm11, %v2264_v61, %v630_v3 }
 0x4ca   : > { %v655_v5 = vmul.f32 %v654_v4, %v2558_v13 }
 0x4cc   : > { %v656_v6 = vsel %vm616_vm5, %v655_v5, 0.0 }
 0x4cd   : > { %v657_v9 = vadd.f32 %v656_v6, %v587_v40 }
 0x4cf   : > { %2018 = vst [vmem:[%s2376_s20 + $0x8] sm:$0xff] %v657_v9 }
 0x4d6   : > { %v2564_v10 = vld [vmem:[%s2376_s20 + $0x8] ss:$0 sm:$0xff] }
 0x4d7   : > { %v709_v11 = vmul.f32 %v2564_v10, %v657_v9  ;;  %v691_v12 = vmul.f32 %v2564_v10, %v2564_v10 }
 0x4d9   : > { %710 = vadd.xlane.f32.xlu1 %v709_v11  ;;  %692 = vadd.xlane.f32.xlu2 %v691_v12 }
 0x4ec   : > { %v526_v14 = vpop.xlane.xlu1 %525 }
 0x4ed   : > { %v527_v15 = vsub.f32 %v2455_v38, %v526_v14 }
 0x4ef   : > { %v528_v18 = vmul.f32 %v527_v15, %v2507_v53 }
 0x4f1   : > { %v529_v19 = vsel %vm476_vm7, %v528_v18, 0.0 }
 0x4f2   : > { %v530_v21 = vadd.f32 %v529_v19, %v460_v49 }
 0x4f4   : > { %v594_v22 = vmul.f32 %v2516_v58, %v530_v21 }
 0x4f6   : > { %595 = vadd.xlane.f32.xlu2 %v594_v22 }
 0x504   : > { %v399_v24 = vpop.xlane.xlu0 %398 }
 0x505   : > { %v400_v26 = vsub.f32 %v2500_v37, %v399_v24 }
 0x507   : > { %v401_v27 = vmul.f32 %v400_v26, %v2448_v32 }
 0x509   : > { %v402_v28 = vsel %vm336_vm1, %v401_v27, 0.0 }
 0x50a   : > { %v403_v29 = vadd.f32 %v402_v28, %v333_v23 }
 0x50c   : > { %v467_v43 = vmul.f32 %v2463_v46, %v403_v29 }
 0x50e   : > { %468 = vadd.xlane.f32.xlu0 %v467_v43 }
 0x54c   : > { %v693_v31 = vpop.xlane.xlu2 %692  ;;  %v711_v40 = vpop.xlane.xlu1 %710 }
 0x54d   : > { %v694_v33 = vsub.f32 %v2026_v52, %v693_v31  ;;  %v712_v41 = vsub.f32 %v2400_v25, %v711_v40 }
 0x54f   : > { %2265 = vrsqrt.f32 %v694_v33  ;;  %vm701_vm14 = vweird.f32 %v694_v33 }
 0x555   : > { %v2266_v34 = vpop.eup %2265 }
 0x556   : > { %v696_v35 = vmul.f32 %v2266_v34, %v694_v33  ;;  %vm702_vm9 = vweird.f32 %v2266_v34 }
 0x557   : > { %vm703_vm1 = vmor %vm701_vm14, %vm702_vm9 }
 0x558   : > { %v697_v36 = vmul.f32 %v2266_v34, %v696_v35  ;;  %vm773_vm14 = vmand %vm744_vm15, %vm222_vm6 }
 0x55a   : > { %v698_v7 = vmul.f32 0.5, %v697_v36 }
 0x55c   : > { %v699_v39 = vsub.f32 1.5, %v698_v7 }
 0x55e   : > { %v700_v32 = vmul.f32 %v2266_v34, %v699_v39 }
 0x560   : > { %v2579_v46 = vsel %vm703_vm1, %v2266_v34, %v700_v32  ;;  %vm804_vm1 = vcmask 89168  }
 0x561   : > { %v713_v42 = vmul.f32 %v712_v41, %v2579_v46  ;;  %v2048_v41 = vld [vmem:[%s2384_s21 + $0xa] ss:$0 sm:$0xff] }
 0x563   : > { %v714_v44 = vsel %vm686_vm3, %v713_v42, 0.0 }
 0x564   : > { %v715_v45 = vadd.f32 %v714_v44, %v657_v9 }
 0x566   : > { %2029 = vst [vmem:[%s2376_s20 + $0x8] sm:$0xff] %v715_v45 }
 0x569   : > { %v596_v47 = vpop.xlane.xlu2 %595 }
 0x56a   : > { %v597_v48 = vsub.f32 %v2455_v38, %v596_v47 }
 0x56c   : > { %v598_v49 = vmul.f32 %v597_v48, %v2533_v30 }
 0x56d   : > { %v2587_v50 = vld [vmem:[%s2376_s20 + $0x9] ss:$0 sm:$0xff] }
 0x56e   : > { %v767_v51 = vmul.f32 %v2587_v50, %v715_v45  ;;  %v749_v20 = vmul.f32 %v2587_v50, %v2587_v50  ;;  %v599_v54 = vsel %vm546_vm0, %v598_v49, 0.0 }
 0x56f   : > { %v600_v55 = vadd.f32 %v599_v54, %v530_v21 }
 0x570   : > { %768 = vadd.xlane.f32.xlu0 %v767_v51  ;;  %750 = vadd.xlane.f32.xlu1 %v749_v20 }
 0x571   : > { %v664_v23 = vmul.f32 %v2543_v16, %v600_v55 }
 0x573   : > { %665 = vadd.xlane.f32.xlu2 %v664_v23 }
 0x581   : > { %v469_v56 = vpop.xlane.xlu0 %468 }
 0x582   : > { %v470_v57 = vsub.f32 %v2500_v37, %v469_v56 }
 0x584   : > { %v471_v59 = vmul.f32 %v470_v57, %v2477_v8 }
 0x586   : > { %v472_v60 = vsel %vm406_vm10, %v471_v59, 0.0 }
 0x587   : > { %v473_v61 = vadd.f32 %v472_v60, %v403_v29 }
 0x589   : > { %v537_v62 = vmul.f32 %v2486_v17, %v473_v61 }
 0x58b   : > { %538 = vadd.xlane.f32.xlu1 %v537_v62 }
 0x5e3   : > { %v751_v0 = vpop.xlane.xlu1 %750  ;;  %v769_v14 = vpop.xlane.xlu0 %768 }
 0x5e4   : > { %v752_v1 = vsub.f32 %v2037_v63, %v751_v0  ;;  %v770_v19 = vsub.f32 %v2400_v25, %v769_v14 }
 0x5e6   : > { %2267 = vrsqrt.f32 %v752_v1  ;;  %v666_v2 = vpop.xlane.xlu2 %665  ;;  %vm759_vm11 = vweird.f32 %v752_v1 }
 0x5e7   : > { %v667_v3 = vsub.f32 %v2455_v38, %v666_v2 }
 0x5e9   : > { %v668_v4 = vmul.f32 %v667_v3, %v2558_v13 }
 0x5eb   : > { %v669_v5 = vsel %vm616_vm5, %v668_v4, 0.0 }
 0x5ec   : > { %v2268_v6 = vpop.eup %2267  ;;  %v670_v9 = vadd.f32 %v669_v5, %v600_v55 }
 0x5ed   : > { %v754_v8 = vmul.f32 %v2268_v6, %v752_v1  ;;  %vm760_vm10 = vweird.f32 %v2268_v6 }
 0x5ee   : > { %v722_v11 = vmul.f32 %v2564_v10, %v670_v9  ;;  %vm761_vm9 = vmor %vm759_vm11, %vm760_vm10 }
 0x5ef   : > { %v755_v12 = vmul.f32 %v2268_v6, %v754_v8 }
 0x5f0   : > { %723 = vadd.xlane.f32.xlu2 %v722_v11 }
 0x5f1   : > { %v756_v17 = vmul.f32 0.5, %v755_v12 }
 0x5f3   : > { %v757_v15 = vsub.f32 1.5, %v756_v17 }
 0x5f5   : > { %v758_v18 = vmul.f32 %v2268_v6, %v757_v15  ;;  %v2059_v15 = vld [vmem:[%s2384_s21 + $0xb] ss:$0 sm:$0xff] }
 0x5f7   : > { %v2606_v21 = vsel %vm761_vm9, %v2268_v6, %v758_v18 }
 0x5f8   : > { %v771_v22 = vmul.f32 %v770_v19, %v2606_v21 }
 0x5fa   : > { %v774_v24 = vsel %vm773_vm14, %v771_v22, 0.0  ;;  %vm864_vm14 = vcmask 97368  }
 0x5fb   : > { %v775_v26 = vadd.f32 %v774_v24, %v715_v45 }
 0x5fd   : > { %2040 = vst [vmem:[%s2376_s20 + $0x8] sm:$0xff] %v775_v26 }
 0x5fe   : > { %v539_v27 = vpop.xlane.xlu1 %538 }
 0x5ff   : > { %v540_v28 = vsub.f32 %v2500_v37, %v539_v27 }
 0x601   : > { %v541_v29 = vmul.f32 %v540_v28, %v2507_v53 }
 0x603   : > { %v542_v33 = vsel %vm476_vm7, %v541_v29, 0.0  ;;  %v2652_v29 = vld [vmem:[%s2384_s21 + $0x8] sm:$0xff] }
 0x604   : > { %v2613_v43 = vld [vmem:[%s2376_s20 + $0xa] ss:$0 sm:$0xff]  ;;  %v543_v34 = vadd.f32 %v542_v33, %v473_v61 }
 0x605   : > { %v827_v52 = vmul.f32 %v2613_v43, %v775_v26  ;;  %v809_v31 = vmul.f32 %v2613_v43, %v2613_v43 }
 0x606   : > { %v607_v35 = vmul.f32 %v2516_v58, %v543_v34 }
 0x607   : > { %828 = vadd.xlane.f32.xlu1 %v827_v52  ;;  %810 = vadd.xlane.f32.xlu0 %v809_v31 }
 0x608   : > { %608 = vadd.xlane.f32.xlu2 %v607_v35 }
 0x663   : > { %v724_v36 = vpop.xlane.xlu2 %723 }
 0x664   : > { %v725_v7 = vsub.f32 %v2455_v38, %v724_v36 }
 0x666   : > { %v726_v53 = vmul.f32 %v725_v7, %v2579_v46 }
 0x668   : > { %v727_v39 = vsel %vm686_vm3, %v726_v53, 0.0 }
 0x669   : > { %v728_v40 = vadd.f32 %v727_v39, %v670_v9 }
 0x66b   : > { %v782_v32 = vmul.f32 %v2587_v50, %v728_v40 }
 0x66d   : > { %783 = vadd.xlane.f32.xlu0 %v782_v32 }
 0x67a   : > { %v811_v42 = vpop.xlane.xlu0 %810  ;;  %v829_v57 = vpop.xlane.xlu1 %828 }
 0x67b   : > { %v812_v44 = vsub.f32 %v2048_v41, %v811_v42  ;;  %v609_v45 = vpop.xlane.xlu2 %608 }
 0x67c   : > { %v610_v47 = vsub.f32 %v2500_v37, %v609_v45 }
 0x67d   : > { %2269 = vrsqrt.f32 %v812_v44  ;;  %vm819_vm10 = vweird.f32 %v812_v44 }
 0x67e   : > { %v611_v58 = vmul.f32 %v610_v47, %v2533_v30  ;;  %v830_v30 = vsub.f32 %v2400_v25, %v829_v57 }
 0x680   : > { %v612_v48 = vsel %vm546_vm0, %v611_v58, 0.0  ;;  %vm833_vm0 = vmand %vm804_vm1, %vm292_vm12 }
 0x681   : > { %v613_v51 = vadd.f32 %v612_v48, %v543_v34 }
 0x683   : > { %v2270_v49 = vpop.eup %2269  ;;  %v677_v54 = vmul.f32 %v2543_v16, %v613_v51 }
 0x684   : > { %v814_v20 = vmul.f32 %v2270_v49, %v812_v44  ;;  %vm820_vm7 = vweird.f32 %v2270_v49 }
 0x685   : > { %678 = vadd.xlane.f32.xlu2 %v677_v54  ;;  %vm821_vm11 = vmor %vm819_vm10, %vm820_vm7  ;;  %v2070_v54 = vld [vmem:[%s2384_s21 + $0xc] ss:$0 sm:$0xff] }
 0x686   : > { %v815_v55 = vmul.f32 %v2270_v49, %v814_v20 }
 0x688   : > { %v816_v23 = vmul.f32 0.5, %v815_v55 }
 0x68a   : > { %v817_v56 = vsub.f32 1.5, %v816_v23 }
 0x68c   : > { %v818_v59 = vmul.f32 %v2270_v49, %v817_v56 }
 0x68e   : > { %v2630_v60 = vsel %vm821_vm11, %v2270_v49, %v818_v59  ;;  %vm893_vm11 = vmand %vm864_vm14, %vm362_vm2 }
 0x68f   : > { %v831_v16 = vmul.f32 %v830_v30, %v2630_v60 }
 0x691   : > { %v834_v61 = vsel %vm833_vm0, %v831_v16, 0.0 }
 0x692   : > { %v835_v62 = vadd.f32 %v834_v61, %v775_v26 }
 0x694   : > { %2051 = vst [vmem:[%s2376_s20 + $0x8] sm:$0xff] %v835_v62 }
 0x69b   : > { %v2637_v63 = vld [vmem:[%s2376_s20 + $0xb] ss:$0 sm:$0xff] }
 0x69c   : > { %v869_v0 = vmul.f32 %v2637_v63, %v2637_v63  ;;  %v887_v1 = vmul.f32 %v2637_v63, %v835_v62 }
 0x69e   : > { %870 = vadd.xlane.f32.xlu1 %v869_v0  ;;  %888 = vadd.xlane.f32.xlu0 %v887_v1 }
 0x6e0   : > { %v784_v25 = vpop.xlane.xlu0 %783 }
 0x6e1   : > { %v785_v2 = vsub.f32 %v2455_v38, %v784_v25 }
 0x6e3   : > { %v786_v3 = vmul.f32 %v785_v2, %v2606_v21 }
 0x6e5   : > { %v787_v4 = vsel %vm744_vm15, %v786_v3, 0.0 }
 0x6e6   : > { %v788_v5 = vadd.f32 %v787_v4, %v728_v40 }
 0x6e8   : > { %v842_v6 = vmul.f32 %v2613_v43, %v788_v5 }
 0x6ea   : > { %843 = vadd.xlane.f32.xlu1 %v842_v6 }
 0x6f8   : > { %v679_v9 = vpop.xlane.xlu2 %678 }
 0x6f9   : > { %v680_v8 = vsub.f32 %v2500_v37, %v679_v9 }
 0x6fb   : > { %v681_v11 = vmul.f32 %v680_v8, %v2558_v13 }
 0x6fd   : > { %v682_v12 = vsel %vm616_vm5, %v681_v11, 0.0 }
 0x6fe   : > { %v683_v17 = vadd.f32 %v682_v12, %v613_v51 }
 0x700   : > { %v735_v14 = vmul.f32 %v2564_v10, %v683_v17 }
 0x702   : > { %736 = vadd.xlane.f32.xlu2 %v735_v14 }
 0x711   : > { %v871_v18 = vpop.xlane.xlu1 %870  ;;  %v889_v52 = vpop.xlane.xlu0 %888 }
 0x712   : > { %v872_v19 = vsub.f32 %v2059_v15, %v871_v18  ;;  %v890_v10 = vsub.f32 %v2652_v29, %v889_v52 }
 0x714   : > { %2271 = vrsqrt.f32 %v872_v19  ;;  %vm879_vm7 = vweird.f32 %v872_v19 }
 0x71a   : > { %v2272_v22 = vpop.eup %2271 }
 0x71b   : > { %v874_v24 = vmul.f32 %v2272_v22, %v872_v19  ;;  %vm880_vm9 = vweird.f32 %v2272_v22 }
 0x71c   : > { %vm881_vm10 = vmor %vm879_vm7, %vm880_vm9  ;;  %vm924_vm9 = vcmask 105568  }
 0x71d   : > { %v875_v26 = vmul.f32 %v2272_v22, %v874_v24 }
 0x71f   : > { %v876_v27 = vmul.f32 0.5, %v875_v26 }
 0x721   : > { %v877_v28 = vsub.f32 1.5, %v876_v27 }
 0x723   : > { %v878_v31 = vmul.f32 %v2272_v22, %v877_v28 }
 0x725   : > { %v2657_v33 = vsel %vm881_vm10, %v2272_v22, %v878_v31  ;;  %vm953_vm10 = vmand %vm924_vm9, %vm432_vm13 }
 0x726   : > { %v891_v34 = vmul.f32 %v890_v10, %v2657_v33 }
 0x728   : > { %v894_v35 = vsel %vm893_vm11, %v891_v34, 0.0 }
 0x729   : > { %v895_v36 = vadd.f32 %v894_v35, %v835_v62 }
 0x72b   : > { %2062 = vst [vmem:[%s2376_s20 + $0x8] sm:$0xff] %v895_v36 }
 0x732   : > { %v2662_v7 = vld [vmem:[%s2376_s20 + $0xc] ss:$0 sm:$0xff] }
 0x733   : > { %v929_v53 = vmul.f32 %v2662_v7, %v2662_v7  ;;  %v947_v39 = vmul.f32 %v2662_v7, %v895_v36 }
 0x735   : > { %930 = vadd.xlane.f32.xlu0 %v929_v53  ;;  %948 = vadd.xlane.f32.xlu2 %v947_v39  ;;  %v2705_v53 = vld [vmem:[%s2384_s21 + $0x10] sm:$0xff] }
 0x75d   : > { %v844_v40 = vpop.xlane.xlu1 %843 }
 0x75e   : > { %v845_v32 = vsub.f32 %v2455_v38, %v844_v40 }
 0x760   : > { %v846_v41 = vmul.f32 %v845_v32, %v2630_v60 }
 0x762   : > { %v847_v42 = vsel %vm804_vm1, %v846_v41, 0.0 }
 0x763   : > { %v848_v44 = vadd.f32 %v847_v42, %v788_v5 }
 0x765   : > { %v902_v45 = vmul.f32 %v2637_v63, %v848_v44 }
 0x767   : > { %903 = vadd.xlane.f32.xlu1 %v902_v45 }
 0x775   : > { %v737_v47 = vpop.xlane.xlu2 %736 }
 0x776   : > { %v738_v58 = vsub.f32 %v2500_v37, %v737_v47 }
 0x778   : > { %v739_v48 = vmul.f32 %v738_v58, %v2579_v46 }
 0x77a   : > { %v740_v49 = vsel %vm686_vm3, %v739_v48, 0.0 }
 0x77b   : > { %v741_v51 = vadd.f32 %v740_v49, %v683_v17 }
 0x77d   : > { %v795_v20 = vmul.f32 %v2587_v50, %v741_v51 }
 0x77f   : > { %796 = vadd.xlane.f32.xlu0 %v795_v20 }
 0x7a8   : > { %v931_v55 = vpop.xlane.xlu0 %930  ;;  %v949_v61 = vpop.xlane.xlu2 %948 }
 0x7a9   : > { %v932_v23 = vsub.f32 %v2070_v54, %v931_v55  ;;  %v950_v50 = vsub.f32 %v2652_v29, %v949_v61 }
 0x7ab   : > { %2273 = vrsqrt.f32 %v932_v23  ;;  %vm939_vm7 = vweird.f32 %v932_v23 }
 0x7b1   : > { %v2274_v56 = vpop.eup %2273 }
 0x7b2   : > { %v934_v57 = vmul.f32 %v2274_v56, %v932_v23  ;;  %vm940_vm0 = vweird.f32 %v2274_v56 }
 0x7b3   : > { %vm941_vm3 = vmor %vm939_vm7, %vm940_vm0  ;;  %vm984_vm0 = vcmask 113768  }
 0x7b4   : > { %v935_v59 = vmul.f32 %v2274_v56, %v934_v57  ;;  %v2092_v57 = vld [vmem:[%s2384_s21 + $0xe] ss:$0 sm:$0xff] }
 0x7b6   : > { %v936_v30 = vmul.f32 0.5, %v935_v59 }
 0x7b8   : > { %v937_v16 = vsub.f32 1.5, %v936_v30 }
 0x7ba   : > { %v938_v46 = vmul.f32 %v2274_v56, %v937_v16 }
 0x7bc   : > { %v2679_v62 = vsel %vm941_vm3, %v2274_v56, %v938_v46  ;;  %vm1013_vm3 = vmand %vm984_vm0, %vm502_vm8 }
 0x7bd   : > { %v951_v0 = vmul.f32 %v950_v50, %v2679_v62 }
 0x7bf   : > { %v954_v1 = vsel %vm953_vm10, %v951_v0, 0.0  ;;  %vm1044_vm10 = vcmask 121968  }
 0x7c0   : > { %v955_v25 = vadd.f32 %v954_v1, %v895_v36 }
 0x7c2   : > { %2073 = vst [vmem:[%s2376_s20 + $0x8] sm:$0xff] %v955_v25 }
 0x7c9   : > { %v2684_v2 = vld [vmem:[%s2376_s20 + $0xd] ss:$0 sm:$0xff] }
 0x7ca   : > { %v1007_v3 = vmul.f32 %v2684_v2, %v955_v25  ;;  %v989_v4 = vmul.f32 %v2684_v2, %v2684_v2 }
 0x7cc   : > { %1008 = vadd.xlane.f32.xlu0 %v1007_v3  ;;  %990 = vadd.xlane.f32.xlu2 %v989_v4 }
 0x7da   : > { %v904_v5 = vpop.xlane.xlu1 %903 }
 0x7db   : > { %v905_v6 = vsub.f32 %v2455_v38, %v904_v5  ;;  %v2081_v38 = vld [vmem:[%s2384_s21 + $0xd] ss:$0 sm:$0xff] }
 0x7dd   : > { %v906_v9 = vmul.f32 %v905_v6, %v2657_v33 }
 0x7df   : > { %v907_v8 = vsel %vm864_vm14, %v906_v9, 0.0 }
 0x7e0   : > { %v908_v11 = vadd.f32 %v907_v8, %v848_v44 }
 0x7e2   : > { %v962_v12 = vmul.f32 %v2662_v7, %v908_v11 }
 0x7e4   : > { %963 = vadd.xlane.f32.xlu1 %v962_v12 }
 0x7f2   : > { %v797_v17 = vpop.xlane.xlu0 %796 }
 0x7f3   : > { %v798_v14 = vsub.f32 %v2500_v37, %v797_v17 }
 0x7f5   : > { %v799_v15 = vmul.f32 %v798_v14, %v2606_v21 }
 0x7f7   : > { %v800_v18 = vsel %vm744_vm15, %v799_v15, 0.0 }
 0x7f8   : > { %v801_v19 = vadd.f32 %v800_v18, %v741_v51 }
 0x7fa   : > { %v855_v22 = vmul.f32 %v2613_v43, %v801_v19 }
 0x7fc   : > { %856 = vadd.xlane.f32.xlu1 %v855_v22 }
 0x83f   : > { %v991_v24 = vpop.xlane.xlu2 %990  ;;  %v1009_v34 = vpop.xlane.xlu0 %1008 }
 0x840   : > { %v992_v26 = vsub.f32 %v2081_v38, %v991_v24  ;;  %v1010_v43 = vsub.f32 %v2652_v29, %v1009_v34 }
 0x842   : > { %2275 = vrsqrt.f32 %v992_v26  ;;  %vm999_vm7 = vweird.f32 %v992_v26 }
 0x848   : > { %v2276_v27 = vpop.eup %2275 }
 0x849   : > { %v994_v28 = vmul.f32 %v2276_v27, %v992_v26  ;;  %vm1000_vm11 = vweird.f32 %v2276_v27 }
 0x84a   : > { %vm1001_vm15 = vmor %vm999_vm7, %vm1000_vm11 }
 0x84b   : > { %v995_v52 = vmul.f32 %v2276_v27, %v994_v28 }
 0x84d   : > { %v996_v31 = vmul.f32 0.5, %v995_v52 }
 0x84f   : > { %v997_v10 = vsub.f32 1.5, %v996_v31 }
 0x851   : > { %v998_v21 = vmul.f32 %v2276_v27, %v997_v10 }
 0x853   : > { %v2699_v35 = vsel %vm1001_vm15, %v2276_v27, %v998_v21  ;;  %vm1073_vm15 = vmand %vm1044_vm10, %vm572_vm4 }
 0x854   : > { %v1011_v36 = vmul.f32 %v1010_v43, %v2699_v35 }
 0x856   : > { %v1014_v39 = vsel %vm1013_vm3, %v1011_v36, 0.0 }
 0x857   : > { %v1015_v40 = vadd.f32 %v1014_v39, %v955_v25  ;;  %v964_v32 = vpop.xlane.xlu1 %963  ;;  %v2103_v39 = vld [vmem:[%s2384_s21 + $0xf] ss:$0 sm:$0xff] }
 0x858   : > { %v965_v41 = vsub.f32 %v2705_v53, %v964_v32 }
 0x859   : > { %2084 = vst [vmem:[%s2376_s20 + $0x8] sm:$0xff] %v1015_v40 }
 0x85a   : > { %v966_v42 = vmul.f32 %v965_v41, %v2679_v62 }
 0x85c   : > { %v967_v44 = vsel %vm924_vm9, %v966_v42, 0.0 }
 0x85d   : > { %v968_v45 = vadd.f32 %v967_v44, %v908_v11 }
 0x85f   : > { %v1022_v47 = vmul.f32 %v2684_v2, %v968_v45 }
 0x860   : > { %v2713_v58 = vld [vmem:[%s2376_s20 + $0xe] ss:$0 sm:$0xff] }
 0x861   : > { %v1049_v48 = vmul.f32 %v2713_v58, %v2713_v58  ;;  %1023 = vadd.xlane.f32.xlu2 %v1022_v47  ;;  %v1067_v49 = vmul.f32 %v2713_v58, %v1015_v40 }
 0x863   : > { %1050 = vadd.xlane.f32.xlu0 %v1049_v48 }
 0x869   : > { %1068 = vadd.xlane.f32.xlu2 %v1067_v49 }
 0x86f   : > { %v857_v51 = vpop.xlane.xlu1 %856 }
 0x870   : > { %v858_v20 = vsub.f32 %v2500_v37, %v857_v51 }
 0x872   : > { %v859_v54 = vmul.f32 %v858_v20, %v2630_v60 }
 0x874   : > { %v860_v55 = vsel %vm804_vm1, %v859_v54, 0.0 }
 0x875   : > { %v861_v23 = vadd.f32 %v860_v55, %v801_v19 }
 0x877   : > { %v915_v56 = vmul.f32 %v2637_v63, %v861_v23 }
 0x879   : > { %916 = vadd.xlane.f32.xlu1 %v915_v56 }
 0x8d4   : > { %v1024_v59 = vpop.xlane.xlu2 %1023 }
 0x8d5   : > { %v1025_v30 = vsub.f32 %v2705_v53, %v1024_v59 }
 0x8d6   : > { %v1051_v16 = vpop.xlane.xlu0 %1050 }
 0x8d7   : > { %v1052_v61 = vsub.f32 %v2092_v57, %v1051_v16  ;;  %v1026_v46 = vmul.f32 %v1025_v30, %v2699_v35 }
 0x8d9   : > { %2277 = vrsqrt.f32 %v1052_v61  ;;  %v1027_v50 = vsel %vm984_vm0, %v1026_v46, 0.0  ;;  %vm1059_vm11 = vweird.f32 %v1052_v61 }
 0x8da   : > { %v1028_v0 = vadd.f32 %v1027_v50, %v968_v45  ;;  %v2114_v50 = vld [vmem:[%s2384_s21 + $0x10] ss:$0 sm:$0xff] }
 0x8dc   : > { %v1082_v60 = vmul.f32 %v2713_v58, %v1028_v0  ;;  %v1069_v5 = vpop.xlane.xlu2 %1068 }
 0x8dd   : > { %v1070_v9 = vsub.f32 %v2652_v29, %v1069_v5 }
 0x8de   : > { %1083 = vadd.xlane.f32.xlu0 %v1082_v60 }
 0x8df   : > { %v2278_v1 = vpop.eup %2277 }
 0x8e0   : > { %v1054_v25 = vmul.f32 %v2278_v1, %v1052_v61  ;;  %vm1060_vm1 = vweird.f32 %v2278_v1 }
 0x8e1   : > { %vm1061_vm7 = vmor %vm1059_vm11, %vm1060_vm1  ;;  %vm1104_vm1 = vcmask 130168  }
 0x8e2   : > { %v1055_v3 = vmul.f32 %v2278_v1, %v1054_v25 }
 0x8e4   : > { %v1056_v63 = vmul.f32 0.5, %v1055_v3 }
 0x8e6   : > { %v1057_v4 = vsub.f32 1.5, %v1056_v63 }
 0x8e8   : > { %v1058_v6 = vmul.f32 %v2278_v1, %v1057_v4 }
 0x8ea   : > { %v2728_v8 = vsel %vm1061_vm7, %v2278_v1, %v1058_v6 }
 0x8eb   : > { %v1071_v11 = vmul.f32 %v1070_v9, %v2728_v8 }
 0x8ec   : > { %v917_v14 = vpop.xlane.xlu1 %916 }
 0x8ed   : > { %v1074_v12 = vsel %vm1073_vm15, %v1071_v11, 0.0  ;;  %v918_v15 = vsub.f32 %v2500_v37, %v917_v14  ;;  %vm1164_vm15 = vcmask 138368  }
 0x8ee   : > { %v1075_v17 = vadd.f32 %v1074_v12, %v1015_v40 }
 0x8ef   : > { %v919_v18 = vmul.f32 %v918_v15, %v2657_v33 }
 0x8f0   : > { %2095 = vst [vmem:[%s2376_s20 + $0x8] sm:$0xff] %v1075_v17 }
 0x8f1   : > { %v920_v19 = vsel %vm864_vm14, %v919_v18, 0.0 }
 0x8f2   : > { %v921_v22 = vadd.f32 %v920_v19, %v861_v23 }
 0x8f4   : > { %v975_v29 = vmul.f32 %v2662_v7, %v921_v22  ;;  %v2748_v7 = vld [vmem:[%s2384_s21 + $0x18] sm:$0xff] }
 0x8f6   : > { %976 = vadd.xlane.f32.xlu1 %v975_v29 }
 0x8f7   : > { %v2739_v38 = vld [vmem:[%s2376_s20 + $0xf] ss:$0 sm:$0xff] }
 0x8f8   : > { %v1109_v24 = vmul.f32 %v2739_v38, %v2739_v38 }
 0x8fa   : > { %1110 = vadd.xlane.f32.xlu2 %v1109_v24 }
 0x951   : > { %v1084_v26 = vpop.xlane.xlu0 %1083 }
 0x952   : > { %v1085_v37 = vsub.f32 %v2705_v53, %v1084_v26 }
 0x954   : > { %v1086_v27 = vmul.f32 %v1085_v37, %v2728_v8 }
 0x956   : > { %v1087_v33 = vsel %vm1044_vm10, %v1086_v27, 0.0 }
 0x957   : > { %v1088_v28 = vadd.f32 %v1087_v33, %v1028_v0 }
 0x959   : > { %v1142_v52 = vmul.f32 %v2739_v38, %v1088_v28 }
 0x95b   : > { %1143 = vadd.xlane.f32.xlu0 %v1142_v52 }
 0x969   : > { %v977_v31 = vpop.xlane.xlu1 %976 }
 0x96a   : > { %v978_v10 = vsub.f32 %v2748_v7, %v977_v31 }
 0x96c   : > { %v979_v34 = vmul.f32 %v978_v10, %v2679_v62 }
 0x96d   : > { %v1111_v40 = vpop.xlane.xlu2 %1110 }
 0x96e   : > { %v980_v21 = vsel %vm924_vm9, %v979_v34, 0.0  ;;  %v1112_v32 = vsub.f32 %v2103_v39, %v1111_v40 }
 0x96f   : > { %v981_v43 = vadd.f32 %v980_v21, %v921_v22 }
 0x970   : > { %2279 = vrsqrt.f32 %v1112_v32  ;;  %vm1119_vm3 = vweird.f32 %v1112_v32 }
 0x971   : > { %v1035_v36 = vmul.f32 %v2684_v2, %v981_v43 }
 0x973   : > { %1036 = vadd.xlane.f32.xlu1 %v1035_v36 }
 0x976   : > { %v2280_v41 = vpop.eup %2279 }
 0x977   : > { %v1114_v42 = vmul.f32 %v2280_v41, %v1112_v32  ;;  %vm1120_vm14 = vweird.f32 %v2280_v41 }
 0x978   : > { %vm1121_vm9 = vmor %vm1119_vm3, %vm1120_vm14  ;;  %vm1209_vm14 = vcmask 146568  }
 0x979   : > { %v1115_v44 = vmul.f32 %v2280_v41, %v1114_v42 }
 0x97b   : > { %v1116_v45 = vmul.f32 0.5, %v1115_v44 }
 0x97d   : > { %v1117_v47 = vsub.f32 1.5, %v1116_v45 }
 0x97f   : > { %v1118_v48 = vmul.f32 %v2280_v41, %v1117_v47 }
 0x981   : > { %v2756_v2 = vsel %vm1121_vm9, %v2280_v41, %v1118_v48 }
 0x9ce   : > { %v1144_v62 = vpop.xlane.xlu0 %1143 }
 0x9cf   : > { %v1145_v49 = vsub.f32 %v2705_v53, %v1144_v62 }
 0x9d1   : > { %v1146_v51 = vmul.f32 %v1145_v49, %v2756_v2 }
 0x9d3   : > { %v1147_v20 = vsel %vm1104_vm1, %v1146_v51, 0.0 }
 0x9d4   : > { %v1148_v54 = vadd.f32 %v1147_v20, %v1088_v28  ;;  %v2122_v28 = vld [vmem:[%s2384_s21 + $0x11] ss:$0 sm:$0xff] }
 0x9d6   : > { %2109 = vst [vmem:[%s2376_s20 + $0x10] sm:$0xff] %v1148_v54 }
 0x9dd   : > { %v2113_v55 = vld [vmem:[%s2376_s20 + $0x10] ss:$0 sm:$0xff] }
 0x9de   : > { %v1187_v23 = vmul.f32 %v2113_v55, %v1148_v54  ;;  %v1169_v56 = vmul.f32 %v2113_v55, %v2113_v55 }
 0x9e0   : > { %1188 = vadd.xlane.f32.xlu0 %v1187_v23  ;;  %1170 = vadd.xlane.f32.xlu2 %v1169_v56 }
 0x9e6   : > { %v1037_v57 = vpop.xlane.xlu1 %1036 }
 0x9e7   : > { %v1038_v59 = vsub.f32 %v2748_v7, %v1037_v57 }
 0x9e9   : > { %v1039_v30 = vmul.f32 %v1038_v59, %v2699_v35  ;;  %v2130_v59 = vld [vmem:[%s2384_s21 + $0x12] ss:$0 sm:$0xff] }
 0x9eb   : > { %v1040_v16 = vsel %vm984_vm0, %v1039_v30, 0.0 }
 0x9ec   : > { %v1041_v61 = vadd.f32 %v1040_v16, %v981_v43 }
 0x9ee   : > { %v1095_v46 = vmul.f32 %v2713_v58, %v1041_v61 }
 0x9f0   : > { %1096 = vadd.xlane.f32.xlu1 %v1095_v46 }
 0xa53   : > { %v1171_v0 = vpop.xlane.xlu2 %1170  ;;  %v1189_v4 = vpop.xlane.xlu0 %1188 }
 0xa54   : > { %v1172_v60 = vsub.f32 %v2114_v50, %v1171_v0  ;;  %v1190_v9 = vsub.f32 %v2705_v53, %v1189_v4 }
 0xa56   : > { %2281 = vrsqrt.f32 %v1172_v60  ;;  %vm1179_vm7 = vweird.f32 %v1172_v60 }
 0xa5c   : > { %v2282_v1 = vpop.eup %2281 }
 0xa5d   : > { %v1174_v25 = vmul.f32 %v2282_v1, %v1172_v60  ;;  %vm1180_vm11 = vweird.f32 %v2282_v1 }
 0xa5e   : > { %vm1181_vm0 = vmor %vm1179_vm7, %vm1180_vm11 }
 0xa5f   : > { %v1175_v3 = vmul.f32 %v2282_v1, %v1174_v25  ;;  %vm1238_vm11 = vmand %vm1209_vm14, %vm222_vm6 }
 0xa61   : > { %v1176_v63 = vmul.f32 0.5, %v1175_v3 }
 0xa63   : > { %v1177_v5 = vsub.f32 1.5, %v1176_v63  ;;  %v1097_v35 = vpop.xlane.xlu1 %1096 }
 0xa64   : > { %v1098_v58 = vsub.f32 %v2748_v7, %v1097_v35 }
 0xa65   : > { %v1178_v6 = vmul.f32 %v2282_v1, %v1177_v5 }
 0xa66   : > { %v1099_v17 = vmul.f32 %v1098_v58, %v2728_v8 }
 0xa67   : > { %v1182_v11 = vsel %vm1181_vm0, %v2282_v1, %v1178_v6  ;;  %vm1256_vm0 = vcmask 154768  }
 0xa68   : > { %v1191_v12 = vmul.f32 %v1190_v9, %v1182_v11  ;;  %v1100_v15 = vsel %vm1044_vm10, %v1099_v17, 0.0 }
 0xa69   : > { %v1101_v19 = vadd.f32 %v1100_v15, %v1041_v61 }
 0xa6a   : > { %v1192_v14 = vsel %vm1164_vm15, %v1191_v12, 0.0 }
 0xa6b   : > { %v1193_v18 = vadd.f32 %v1192_v14, %v1148_v54  ;;  %v1155_v22 = vmul.f32 %v2739_v38, %v1101_v19 }
 0xa6d   : > { %2117 = vst [vmem:[%s2376_s20 + $0x10] sm:$0xff] %v1193_v18  ;;  %1156 = vadd.xlane.f32.xlu0 %v1155_v22 }
 0xa74   : > { %v2121_v29 = vld [vmem:[%s2376_s20 + $0x11] ss:$0 sm:$0xff] }
 0xa75   : > { %v1214_v24 = vmul.f32 %v2121_v29, %v2121_v29  ;;  %v1232_v26 = vmul.f32 %v2121_v29, %v1193_v18 }
 0xa77   : > { %1215 = vadd.xlane.f32.xlu2 %v1214_v24  ;;  %1233 = vadd.xlane.f32.xlu1 %v1232_v26 }
 0xae0   : > { %v1157_v37 = vpop.xlane.xlu0 %1156 }
 0xae1   : > { %v1158_v27 = vsub.f32 %v2748_v7, %v1157_v37 }
 0xae3   : > { %v1159_v8 = vmul.f32 %v1158_v27, %v2756_v2 }
 0xae5   : > { %v1160_v33 = vsel %vm1104_vm1, %v1159_v8, 0.0 }
 0xae6   : > { %v1161_v52 = vadd.f32 %v1160_v33, %v1101_v19  ;;  %v2138_v19 = vld [vmem:[%s2384_s21 + $0x13] ss:$0 sm:$0xff] }
 0xae8   : > { %v1200_v10 = vmul.f32 %v2113_v55, %v1161_v52 }
 0xaea   : > { %v1216_v31 = vpop.xlane.xlu2 %1215  ;;  %1201 = vadd.xlane.f32.xlu2 %v1200_v10  ;;  %v1234_v32 = vpop.xlane.xlu1 %1233 }
 0xaeb   : > { %v1217_v34 = vsub.f32 %v2122_v28, %v1216_v31  ;;  %v1235_v42 = vsub.f32 %v2705_v53, %v1234_v32 }
 0xaed   : > { %2283 = vrsqrt.f32 %v1217_v34  ;;  %vm1224_vm3 = vweird.f32 %v1217_v34 }
 0xaf3   : > { %v2284_v21 = vpop.eup %2283 }
 0xaf4   : > { %v1219_v43 = vmul.f32 %v2284_v21, %v1217_v34  ;;  %vm1225_vm10 = vweird.f32 %v2284_v21 }
 0xaf5   : > { %vm1226_vm9 = vmor %vm1224_vm3, %vm1225_vm10 }
 0xaf6   : > { %v1220_v36 = vmul.f32 %v2284_v21, %v1219_v43  ;;  %vm1285_vm3 = vmand %vm1256_vm0, %vm292_vm12 }
 0xaf8   : > { %v1221_v39 = vmul.f32 0.5, %v1220_v36 }
 0xafa   : > { %v1222_v40 = vsub.f32 1.5, %v1221_v39 }
 0xafc   : > { %v1223_v41 = vmul.f32 %v2284_v21, %v1222_v40 }
 0xafe   : > { %v1227_v44 = vsel %vm1226_vm9, %v2284_v21, %v1223_v41 }
 0xaff   : > { %v1236_v45 = vmul.f32 %v1235_v42, %v1227_v44 }
 0xb01   : > { %v1239_v47 = vsel %vm1238_vm11, %v1236_v45, 0.0  ;;  %vm1303_vm11 = vcmask 162968  }
 0xb02   : > { %v1240_v48 = vadd.f32 %v1239_v47, %v1193_v18  ;;  %v2146_v47 = vld [vmem:[%s2384_s21 + $0x14] ss:$0 sm:$0xff] }
 0xb04   : > { %2125 = vst [vmem:[%s2376_s20 + $0x10] sm:$0xff] %v1240_v48 }
 0xb0b   : > { %v2129_v62 = vld [vmem:[%s2376_s20 + $0x12] ss:$0 sm:$0xff] }
 0xb0c   : > { %v1279_v49 = vmul.f32 %v2129_v62, %v1240_v48  ;;  %v1261_v51 = vmul.f32 %v2129_v62, %v2129_v62 }
 0xb0e   : > { %1280 = vadd.xlane.f32.xlu1 %v1279_v49  ;;  %1262 = vadd.xlane.f32.xlu0 %v1261_v51 }
 0xb5d   : > { %v1202_v20 = vpop.xlane.xlu2 %1201 }
 0xb5e   : > { %v1203_v54 = vsub.f32 %v2748_v7, %v1202_v20 }
 0xb60   : > { %v1204_v55 = vmul.f32 %v1203_v54, %v1182_v11 }
 0xb62   : > { %v1205_v23 = vsel %vm1164_vm15, %v1204_v55, 0.0 }
 0xb63   : > { %v1206_v56 = vadd.f32 %v1205_v23, %v1161_v52 }
 0xb65   : > { %v1247_v57 = vmul.f32 %v2121_v29, %v1206_v56 }
 0xb67   : > { %1248 = vadd.xlane.f32.xlu2 %v1247_v57 }
 0xb81   : > { %v1263_v30 = vpop.xlane.xlu0 %1262  ;;  %v1281_v60 = vpop.xlane.xlu1 %1280 }
 0xb82   : > { %v1264_v16 = vsub.f32 %v2130_v59, %v1263_v30  ;;  %v1282_v3 = vsub.f32 %v2705_v53, %v1281_v60 }
 0xb84   : > { %2285 = vrsqrt.f32 %v1264_v16  ;;  %vm1271_vm10 = vweird.f32 %v1264_v16 }
 0xb8a   : > { %v2286_v61 = vpop.eup %2285 }
 0xb8b   : > { %v1266_v46 = vmul.f32 %v2286_v61, %v1264_v16  ;;  %vm1272_vm7 = vweird.f32 %v2286_v61 }
 0xb8c   : > { %vm1273_vm15 = vmor %vm1271_vm10, %vm1272_vm7 }
 0xb8d   : > { %v1267_v50 = vmul.f32 %v2286_v61, %v1266_v46  ;;  %vm1332_vm10 = vmand %vm1303_vm11, %vm362_vm2 }
 0xb8f   : > { %v1268_v0 = vmul.f32 0.5, %v1267_v50 }
 0xb91   : > { %v1269_v1 = vsub.f32 1.5, %v1268_v0 }
 0xb93   : > { %v1270_v25 = vmul.f32 %v2286_v61, %v1269_v1 }
 0xb95   : > { %v1274_v63 = vsel %vm1273_vm15, %v2286_v61, %v1270_v25 }
 0xb96   : > { %v1283_v4 = vmul.f32 %v1282_v3, %v1274_v63 }
 0xb98   : > { %v1286_v5 = vsel %vm1285_vm3, %v1283_v4, 0.0  ;;  %vm1350_vm3 = vcmask 171168  }
 0xb99   : > { %v1287_v6 = vadd.f32 %v1286_v5, %v1240_v48  ;;  %v2154_v5 = vld [vmem:[%s2384_s21 + $0x15] ss:$0 sm:$0xff] }
 0xb9b   : > { %2133 = vst [vmem:[%s2376_s20 + $0x10] sm:$0xff] %v1287_v6 }
 0xba2   : > { %v2137_v35 = vld [vmem:[%s2376_s20 + $0x13] ss:$0 sm:$0xff] }
 0xba3   : > { %v1326_v9 = vmul.f32 %v2137_v35, %v1287_v6  ;;  %v1308_v58 = vmul.f32 %v2137_v35, %v2137_v35 }
 0xba5   : > { %1327 = vadd.xlane.f32.xlu1 %v1326_v9  ;;  %1309 = vadd.xlane.f32.xlu0 %v1308_v58 }
 0xbda   : > { %v1249_v11 = vpop.xlane.xlu2 %1248 }
 0xbdb   : > { %v1250_v12 = vsub.f32 %v2748_v7, %v1249_v11 }
 0xbdd   : > { %v1251_v17 = vmul.f32 %v1250_v12, %v1227_v44 }
 0xbdf   : > { %v1252_v14 = vsel %vm1209_vm14, %v1251_v17, 0.0 }
 0xbe0   : > { %v1253_v15 = vadd.f32 %v1252_v14, %v1206_v56 }
 0xbe2   : > { %v1294_v18 = vmul.f32 %v2129_v62, %v1253_v15 }
 0xbe4   : > { %1295 = vadd.xlane.f32.xlu2 %v1294_v18 }
 0xc18   : > { %v1310_v22 = vpop.xlane.xlu0 %1309  ;;  %v1328_v8 = vpop.xlane.xlu1 %1327 }
 0xc19   : > { %v1311_v29 = vsub.f32 %v2138_v19, %v1310_v22  ;;  %v1329_v52 = vsub.f32 %v2705_v53, %v1328_v8 }
 0xc1b   : > { %2287 = vrsqrt.f32 %v1311_v29  ;;  %vm1318_vm7 = vweird.f32 %v1311_v29 }
 0xc21   : > { %v2288_v24 = vpop.eup %2287 }
 0xc22   : > { %v1313_v26 = vmul.f32 %v2288_v24, %v1311_v29  ;;  %vm1319_vm9 = vweird.f32 %v2288_v24 }
 0xc23   : > { %vm1320_vm14 = vmor %vm1318_vm7, %vm1319_vm9 }
 0xc24   : > { %v1314_v37 = vmul.f32 %v2288_v24, %v1313_v26  ;;  %vm1379_vm7 = vmand %vm1350_vm3, %vm432_vm13 }
 0xc26   : > { %v1315_v27 = vmul.f32 0.5, %v1314_v37 }
 0xc28   : > { %v1316_v33 = vsub.f32 1.5, %v1315_v27 }
 0xc2a   : > { %v1317_v28 = vmul.f32 %v2288_v24, %v1316_v33 }
 0xc2c   : > { %v1321_v31 = vsel %vm1320_vm14, %v2288_v24, %v1317_v28 }
 0xc2d   : > { %v1330_v10 = vmul.f32 %v1329_v52, %v1321_v31 }
 0xc2f   : > { %v1333_v34 = vsel %vm1332_vm10, %v1330_v10, 0.0 }
 0xc30   : > { %v1334_v21 = vadd.f32 %v1333_v34, %v1287_v6 }
 0xc32   : > { %2141 = vst [vmem:[%s2376_s20 + $0x10] sm:$0xff] %v1334_v21 }
 0xc39   : > { %v2145_v43 = vld [vmem:[%s2376_s20 + $0x14] ss:$0 sm:$0xff] }
 0xc3a   : > { %v1373_v36 = vmul.f32 %v2145_v43, %v1334_v21  ;;  %v1355_v39 = vmul.f32 %v2145_v43, %v2145_v43 }
 0xc3c   : > { %1374 = vadd.xlane.f32.xlu2 %v1373_v36  ;;  %1356 = vadd.xlane.f32.xlu0 %v1355_v39 }
 0xc57   : > { %v1296_v40 = vpop.xlane.xlu2 %1295 }
 0xc58   : > { %v1297_v32 = vsub.f32 %v2748_v7, %v1296_v40 }
 0xc5a   : > { %v1298_v41 = vmul.f32 %v1297_v32, %v1274_v63  ;;  %v2162_v32 = vld [vmem:[%s2384_s21 + $0x16] ss:$0 sm:$0xff] }
 0xc5c   : > { %v1299_v42 = vsel %vm1256_vm0, %v1298_v41, 0.0 }
 0xc5d   : > { %v1300_v44 = vadd.f32 %v1299_v42, %v1253_v15 }
 0xc5f   : > { %v1341_v45 = vmul.f32 %v2137_v35, %v1300_v44 }
 0xc61   : > { %1342 = vadd.xlane.f32.xlu1 %v1341_v45 }
 0xcaf   : > { %v1357_v48 = vpop.xlane.xlu0 %1356  ;;  %v1375_v55 = vpop.xlane.xlu2 %1374 }
 0xcb0   : > { %v1358_v62 = vsub.f32 %v2146_v47, %v1357_v48  ;;  %v1376_v57 = vsub.f32 %v2705_v53, %v1375_v55 }
 0xcb2   : > { %2289 = vrsqrt.f32 %v1358_v62  ;;  %vm1365_vm9 = vweird.f32 %v1358_v62 }
 0xcb8   : > { %v2290_v49 = vpop.eup %2289 }
 0xcb9   : > { %v1360_v51 = vmul.f32 %v2290_v49, %v1358_v62  ;;  %vm1366_vm15 = vweird.f32 %v2290_v49 }
 0xcba   : > { %vm1367_vm0 = vmor %vm1365_vm9, %vm1366_vm15 }
 0xcbb   : > { %v1361_v20 = vmul.f32 %v2290_v49, %v1360_v51 }
 0xcbd   : > { %v1362_v54 = vmul.f32 0.5, %v1361_v20 }
 0xcbf   : > { %v1363_v23 = vsub.f32 1.5, %v1362_v54 }
 0xcc1   : > { %v1364_v56 = vmul.f32 %v2290_v49, %v1363_v23 }
 0xcc3   : > { %v1368_v59 = vsel %vm1367_vm0, %v2290_v49, %v1364_v56  ;;  %vm1444_vm0 = vcmask 187568  }
 0xcc4   : > { %v1377_v30 = vmul.f32 %v1376_v57, %v1368_v59 }
 0xcc6   : > { %v1380_v16 = vsel %vm1379_vm7, %v1377_v30, 0.0 }
 0xcc7   : > { %v1381_v61 = vadd.f32 %v1380_v16, %v1334_v21 }
 0xcc9   : > { %2149 = vst [vmem:[%s2376_s20 + $0x10] sm:$0xff] %v1381_v61 }
 0xcd0   : > { %v2153_v46 = vld [vmem:[%s2376_s20 + $0x15] ss:$0 sm:$0xff] }
 0xcd1   : > { %v1420_v50 = vmul.f32 %v2153_v46, %v1381_v61  ;;  %v1402_v0 = vmul.f32 %v2153_v46, %v2153_v46 }
 0xcd3   : > { %1421 = vadd.xlane.f32.xlu2 %v1420_v50  ;;  %1403 = vadd.xlane.f32.xlu1 %v1402_v0  ;;  %v2170_v0 = vld [vmem:[%s2384_s21 + $0x17] ss:$0 sm:$0xff] }
 0xcd4   : > { %v1343_v60 = vpop.xlane.xlu1 %1342 }
 0xcd5   : > { %v1344_v1 = vsub.f32 %v2748_v7, %v1343_v60 }
 0xcd7   : > { %v1345_v25 = vmul.f32 %v1344_v1, %v1321_v31 }
 0xcd9   : > { %v1346_v3 = vsel %vm1303_vm11, %v1345_v25, 0.0  ;;  %vm1397_vm11 = vcmask 179368  }
 0xcda   : > { %v1347_v63 = vadd.f32 %v1346_v3, %v1300_v44  ;;  %vm1426_vm9 = vmand %vm1397_vm11, %vm502_vm8 }
 0xcdc   : > { %v1388_v4 = vmul.f32 %v2145_v43, %v1347_v63 }
 0xcde   : > { %1389 = vadd.xlane.f32.xlu0 %v1388_v4 }
 0xd46   : > { %v1404_v6 = vpop.xlane.xlu1 %1403  ;;  %v1422_v15 = vpop.xlane.xlu2 %1421 }
 0xd47   : > { %v1405_v35 = vsub.f32 %v2154_v5, %v1404_v6  ;;  %v1423_v24 = vsub.f32 %v2705_v53, %v1422_v15 }
 0xd49   : > { %2291 = vrsqrt.f32 %v1405_v35  ;;  %vm1412_vm10 = vweird.f32 %v1405_v35 }
 0xd4f   : > { %v2292_v9 = vpop.eup %2291 }
 0xd50   : > { %v1407_v58 = vmul.f32 %v2292_v9, %v1405_v35  ;;  %vm1413_vm14 = vweird.f32 %v2292_v9 }
 0xd51   : > { %v1390_v12 = vpop.xlane.xlu0 %1389  ;;  %vm1414_vm15 = vmor %vm1412_vm10, %vm1413_vm14 }
 0xd52   : > { %v1408_v11 = vmul.f32 %v2292_v9, %v1407_v58  ;;  %v1391_v14 = vsub.f32 %v2748_v7, %v1390_v12 }
 0xd54   : > { %v1409_v17 = vmul.f32 0.5, %v1408_v11  ;;  %v1392_v19 = vmul.f32 %v1391_v14, %v1368_v59 }
 0xd56   : > { %v1410_v18 = vsub.f32 1.5, %v1409_v17  ;;  %v1393_v29 = vsel %vm1350_vm3, %v1392_v19, 0.0  ;;  %v2178_v19 = vld [vmem:[%s2384_s21 + $0x18] ss:$0 sm:$0xff] }
 0xd57   : > { %v1394_v26 = vadd.f32 %v1393_v29, %v1347_v63 }
 0xd58   : > { %v1411_v22 = vmul.f32 %v2292_v9, %v1410_v18 }
 0xd59   : > { %v1435_v8 = vmul.f32 %v2153_v46, %v1394_v26 }
 0xd5a   : > { %v1415_v37 = vsel %vm1414_vm15, %v2292_v9, %v1411_v22 }
 0xd5b   : > { %v1424_v27 = vmul.f32 %v1423_v24, %v1415_v37  ;;  %1436 = vadd.xlane.f32.xlu0 %v1435_v8 }
 0xd5d   : > { %v1427_v33 = vsel %vm1426_vm9, %v1424_v27, 0.0 }
 0xd5e   : > { %v1428_v28 = vadd.f32 %v1427_v33, %v1381_v61 }
 0xd60   : > { %2157 = vst [vmem:[%s2376_s20 + $0x10] sm:$0xff] %v1428_v28 }
 0xd67   : > { %v2161_v52 = vld [vmem:[%s2376_s20 + $0x16] ss:$0 sm:$0xff] }
 0xd68   : > { %v1467_v31 = vmul.f32 %v2161_v52, %v1428_v28  ;;  %v1449_v10 = vmul.f32 %v2161_v52, %v2161_v52 }
 0xd6a   : > { %1468 = vadd.xlane.f32.xlu2 %v1467_v31  ;;  %1450 = vadd.xlane.f32.xlu1 %v1449_v10 }
 0xdce   : > { %v1437_v34 = vpop.xlane.xlu0 %1436 }
 0xdcf   : > { %v1438_v21 = vsub.f32 %v2748_v7, %v1437_v34 }
 0xdd1   : > { %v1439_v43 = vmul.f32 %v1438_v21, %v1415_v37 }
 0xdd3   : > { %v1440_v36 = vsel %vm1397_vm11, %v1439_v43, 0.0  ;;  %vm1473_vm11 = vmand %vm1444_vm0, %vm572_vm4 }
 0xdd4   : > { %v1441_v39 = vadd.f32 %v1440_v36, %v1394_v26 }
 0xdd6   : > { %v1482_v40 = vmul.f32 %v2161_v52, %v1441_v39 }
 0xdd8   : > { %1483 = vadd.xlane.f32.xlu0 %v1482_v40  ;;  %v2183_v40 = vld [vmem:[%s2384_s21 + $0x19] ss:$0 sm:$0xff] }
 0xddd   : > { %v1451_v41 = vpop.xlane.xlu1 %1450  ;;  %v1469_v62 = vpop.xlane.xlu2 %1468 }
 0xdde   : > { %v1452_v42 = vsub.f32 %v2162_v32, %v1451_v41  ;;  %v1470_v20 = vsub.f32 %v2705_v53, %v1469_v62 }
 0xde0   : > { %2293 = vrsqrt.f32 %v1452_v42  ;;  %vm1459_vm7 = vweird.f32 %v1452_v42 }
 0xde6   : > { %v2294_v44 = vpop.eup %2293 }
 0xde7   : > { %v1454_v45 = vmul.f32 %v2294_v44, %v1452_v42  ;;  %vm1460_vm3 = vweird.f32 %v2294_v44 }
 0xde8   : > { %vm1461_vm14 = vmor %vm1459_vm7, %vm1460_vm3  ;;  %vm1491_vm3 = vcmask 195768  }
 0xde9   : > { %v1455_v47 = vmul.f32 %v2294_v44, %v1454_v45 }
 0xdeb   : > { %v1456_v48 = vmul.f32 0.5, %v1455_v47 }
 0xded   : > { %v1457_v49 = vsub.f32 1.5, %v1456_v48 }
 0xdef   : > { %v1458_v51 = vmul.f32 %v2294_v44, %v1457_v49 }
 0xdf1   : > { %v1462_v54 = vsel %vm1461_vm14, %v2294_v44, %v1458_v51 }
 0xdf2   : > { %v1471_v55 = vmul.f32 %v1470_v20, %v1462_v54 }
 0xdf4   : > { %v1474_v23 = vsel %vm1473_vm11, %v1471_v55, 0.0  ;;  %vm1538_vm11 = vcmask 203968  }
 0xdf5   : > { %v2824_v56 = vadd.f32 %v1474_v23, %v1428_v28 }
 0xdf7   : > { %2165 = vst [vmem:[%s2376_s20 + $0x10] sm:$0xff] %v2824_v56 }
 0xdfe   : > { %v2829_v57 = vld [vmem:[%s2376_s20 + $0x17] ss:$0 sm:$0xff] }
 0xdff   : > { %v1496_v59 = vmul.f32 %v2829_v57, %v2829_v57 }
 0xe01   : > { %1497 = vadd.xlane.f32.xlu1 %v1496_v59 }
 0xe4b   : > { %v1484_v30 = vpop.xlane.xlu0 %1483 }
 0xe4c   : > { %v1485_v53 = vsub.f32 %v2748_v7, %v1484_v30 }
 0xe4e   : > { %v1486_v16 = vmul.f32 %v1485_v53, %v1462_v54 }
 0xe50   : > { %v1487_v61 = vsel %vm1444_vm0, %v1486_v16, 0.0  ;;  %v2188_v16 = vld [vmem:[%s2384_s21 + $0x1a] ss:$0 sm:$0xff] }
 0xe51   : > { %v1488_v46 = vadd.f32 %v1487_v61, %v1441_v39 }
 0xe53   : > { %v1529_v50 = vmul.f32 %v2829_v57, %v1488_v46 }
 0xe55   : > { %1530 = vadd.xlane.f32.xlu2 %v1529_v50 }
 0xe74   : > { %v1498_v60 = vpop.xlane.xlu1 %1497 }
 0xe75   : > { %v1499_v1 = vsub.f32 %v2170_v0, %v1498_v60 }
 0xe77   : > { %2295 = vrsqrt.f32 %v1499_v1  ;;  %vm1506_vm15 = vweird.f32 %v1499_v1 }
 0xe7d   : > { %v2296_v25 = vpop.eup %2295 }
 0xe7e   : > { %v1501_v3 = vmul.f32 %v2296_v25, %v1499_v1  ;;  %vm1507_vm10 = vweird.f32 %v2296_v25 }
 0xe7f   : > { %vm1508_vm9 = vmor %vm1506_vm15, %vm1507_vm10  ;;  %vm1570_vm15 = vcmask 212168  }
 0xe80   : > { %v1502_v63 = vmul.f32 %v2296_v25, %v1501_v3 }
 0xe82   : > { %v1503_v4 = vmul.f32 0.5, %v1502_v63 }
 0xe84   : > { %v1504_v5 = vsub.f32 1.5, %v1503_v4 }
 0xe86   : > { %v1505_v6 = vmul.f32 %v2296_v25, %v1504_v5 }
 0xe88   : > { %v2838_v58 = vsel %vm1508_vm9, %v2296_v25, %v1505_v6 }
 0xec8   : > { %v1531_v35 = vpop.xlane.xlu2 %1530 }
 0xec9   : > { %v1532_v9 = vsub.f32 %v2748_v7, %v1531_v35 }
 0xecb   : > { %v1533_v11 = vmul.f32 %v1532_v9, %v2838_v58 }
 0xecd   : > { %v1534_v12 = vsel %vm1491_vm3, %v1533_v11, 0.0 }
 0xece   : > { %v1535_v17 = vadd.f32 %v1534_v12, %v1488_v46 }
 0xed0   : > { %2176 = vst [vmem:[%s2376_s20 + $0x18] sm:$0xff] %v1535_v17 }
 0xed7   : > { %v2177_v14 = vld [vmem:[%s2376_s20 + $0x18] ss:$0 sm:$0xff] }
 0xed8   : > { %v1561_v15 = vmul.f32 %v2177_v14, %v1535_v17  ;;  %v1543_v18 = vmul.f32 %v2177_v14, %v2177_v14  ;;  %v2193_v14 = vld [vmem:[%s2384_s21 + $0x1b] ss:$0 sm:$0xff] }
 0xeda   : > { %1562 = vadd.xlane.f32.xlu1 %v1561_v15  ;;  %1544 = vadd.xlane.f32.xlu0 %v1543_v18 }
 0xf4d   : > { %v1545_v22 = vpop.xlane.xlu0 %1544  ;;  %v1563_v8 = vpop.xlane.xlu1 %1562 }
 0xf4e   : > { %v1546_v29 = vsub.f32 %v2178_v19, %v1545_v22  ;;  %v1564_v52 = vsub.f32 %v2748_v7, %v1563_v8 }
 0xf50   : > { %2297 = vrsqrt.f32 %v1546_v29  ;;  %vm1553_vm7 = vweird.f32 %v1546_v29 }
 0xf56   : > { %v2298_v24 = vpop.eup %2297 }
 0xf57   : > { %v1548_v26 = vmul.f32 %v2298_v24, %v1546_v29  ;;  %vm1554_vm0 = vweird.f32 %v2298_v24 }
 0xf58   : > { %vm1555_vm14 = vmor %vm1553_vm7, %vm1554_vm0 }
 0xf59   : > { %v1549_v37 = vmul.f32 %v2298_v24, %v1548_v26  ;;  %vm1599_vm7 = vmand %vm1570_vm15, %vm222_vm6 }
 0xf5b   : > { %v1550_v27 = vmul.f32 0.5, %v1549_v37 }
 0xf5d   : > { %v1551_v33 = vsub.f32 1.5, %v1550_v27 }
 0xf5f   : > { %v1552_v28 = vmul.f32 %v2298_v24, %v1551_v33 }
 0xf61   : > { %v1556_v31 = vsel %vm1555_vm14, %v2298_v24, %v1552_v28  ;;  %vm1604_vm14 = vcmask 220368  }
 0xf62   : > { %v1565_v10 = vmul.f32 %v1564_v52, %v1556_v31  ;;  %vm1633_vm15 = vmand %vm1604_vm14, %vm292_vm12  ;;  %vm1672_vm14 = vcmask 236768  }
 0xf64   : > { %v1566_v34 = vsel %vm1538_vm11, %v1565_v10, 0.0 }
 0xf65   : > { %v1567_v21 = vadd.f32 %v1566_v34, %v1535_v17 }
 0xf67   : > { %2181 = vst [vmem:[%s2376_s20 + $0x18] sm:$0xff] %v1567_v21 }
 0xf6e   : > { %v2182_v43 = vld [vmem:[%s2376_s20 + $0x19] ss:$0 sm:$0xff] }
 0xf6f   : > { %v1593_v36 = vmul.f32 %v2182_v43, %v1567_v21  ;;  %v1575_v39 = vmul.f32 %v2182_v43, %v2182_v43  ;;  %v2198_v43 = vld [vmem:[%s2384_s21 + $0x1c] ss:$0 sm:$0xff] }
 0xf71   : > { %1594 = vadd.xlane.f32.xlu0 %v1593_v36  ;;  %1576 = vadd.xlane.f32.xlu2 %v1575_v39 }
 0xfe4   : > { %v1577_v32 = vpop.xlane.xlu2 %1576  ;;  %v1595_v48 = vpop.xlane.xlu0 %1594 }
 0xfe5   : > { %v1578_v41 = vsub.f32 %v2183_v40, %v1577_v32  ;;  %v1596_v51 = vsub.f32 %v2748_v7, %v1595_v48 }
 0xfe7   : > { %2299 = vrsqrt.f32 %v1578_v41  ;;  %vm1585_vm9 = vweird.f32 %v1578_v41 }
 0xfed   : > { %v2300_v42 = vpop.eup %2299 }
 0xfee   : > { %v1580_v44 = vmul.f32 %v2300_v42, %v1578_v41  ;;  %vm1586_vm10 = vweird.f32 %v2300_v42 }
 0xfef   : > { %vm1587_vm0 = vmor %vm1585_vm9, %vm1586_vm10  ;;  %vm1638_vm9 = vcmask 228568  }
 0xff0   : > { %v1581_v45 = vmul.f32 %v2300_v42, %v1580_v44 }
 0xff2   : > { %v1582_v47 = vmul.f32 0.5, %v1581_v45 }
 0xff4   : > { %v1583_v62 = vsub.f32 1.5, %v1582_v47 }
 0xff6   : > { %v1584_v49 = vmul.f32 %v2300_v42, %v1583_v62 }
 0xff8   : > { %v1588_v20 = vsel %vm1587_vm0, %v2300_v42, %v1584_v49 }
 0xff9   : > { %v1597_v54 = vmul.f32 %v1596_v51, %v1588_v20 }
 0xffb   : > { %v1600_v55 = vsel %vm1599_vm7, %v1597_v54, 0.0 }
 0xffc   : > { %v1601_v23 = vadd.f32 %v1600_v55, %v1567_v21 }
 0xffe   : > { %2186 = vst [vmem:[%s2376_s20 + $0x18] sm:$0xff] %v1601_v23 }
0x1005   : > { %v2187_v59 = vld [vmem:[%s2376_s20 + $0x1a] ss:$0 sm:$0xff] }
0x1006   : > { %v1627_v30 = vmul.f32 %v2187_v59, %v1601_v23  ;;  %v1609_v53 = vmul.f32 %v2187_v59, %v2187_v59  ;;  %v2203_v59 = vld [vmem:[%s2384_s21 + $0x1d] ss:$0 sm:$0xff] }
0x1008   : > { %1628 = vadd.xlane.f32.xlu2 %v1627_v30  ;;  %1610 = vadd.xlane.f32.xlu1 %v1609_v53 }
0x107b   : > { %v1611_v61 = vpop.xlane.xlu1 %1610  ;;  %v1629_v25 = vpop.xlane.xlu2 %1628 }
0x107c   : > { %v1612_v46 = vsub.f32 %v2188_v16, %v1611_v61  ;;  %v1630_v4 = vsub.f32 %v2748_v7, %v1629_v25 }
0x107e   : > { %2301 = vrsqrt.f32 %v1612_v46  ;;  %vm1619_vm11 = vweird.f32 %v1612_v46 }
0x1084   : > { %v2302_v50 = vpop.eup %2301 }
0x1085   : > { %v1614_v0 = vmul.f32 %v2302_v50, %v1612_v46  ;;  %vm1620_vm6 = vweird.f32 %v2302_v50 }
0x1086   : > { %vm1621_vm10 = vmor %vm1619_vm11, %vm1620_vm6 }
0x1087   : > { %v1615_v60 = vmul.f32 %v2302_v50, %v1614_v0  ;;  %vm1667_vm6 = vmand %vm1638_vm9, %vm362_vm2 }
0x1089   : > { %v1616_v1 = vmul.f32 0.5, %v1615_v60 }
0x108b   : > { %v1617_v3 = vsub.f32 1.5, %v1616_v1 }
0x108d   : > { %v1618_v63 = vmul.f32 %v2302_v50, %v1617_v3 }
0x108f   : > { %v1622_v5 = vsel %vm1621_vm10, %v2302_v50, %v1618_v63 }
0x1090   : > { %v1631_v6 = vmul.f32 %v1630_v4, %v1622_v5 }
0x1092   : > { %v1634_v35 = vsel %vm1633_vm15, %v1631_v6, 0.0  ;;  %vm1701_vm15 = vmand %vm1672_vm14, %vm432_vm13 }
0x1093   : > { %v1635_v9 = vadd.f32 %v1634_v35, %v1601_v23 }
0x1095   : > { %2191 = vst [vmem:[%s2376_s20 + $0x18] sm:$0xff] %v1635_v9 }
0x109c   : > { %v2192_v11 = vld [vmem:[%s2376_s20 + $0x1b] ss:$0 sm:$0xff] }
0x109d   : > { %v1661_v12 = vmul.f32 %v2192_v11, %v1635_v9  ;;  %v1643_v17 = vmul.f32 %v2192_v11, %v2192_v11  ;;  %v2105_v11 = vld [vmem:[%s2376_s20 + $0x8] sm:$0xff] }
0x109f   : > { %1662 = vadd.xlane.f32.xlu1 %v1661_v12  ;;  %1644 = vadd.xlane.f32.xlu0 %v1643_v17  ;;  %v636_v12 = vld [vmem:[%s2376_s20] sm:$0xff] }
0x10a0   : > { %v2313_v17 = vld [vmem:[%s2376_s20 + $0x7] ss:$0 sm:$0xff] }
0x1112   : > { %v1645_v15 = vpop.xlane.xlu0 %1644  ;;  %v1663_v26 = vpop.xlane.xlu1 %1662 }
0x1113   : > { %v1646_v18 = vsub.f32 %v2193_v14, %v1645_v15  ;;  %v1664_v8 = vsub.f32 %v2748_v7, %v1663_v26  ;;  %v637_v14 = vmul.f32 %v2313_v17, %v636_v12  ;;  %v2208_v15 = vld [vmem:[%s2384_s21 + $0x1e] ss:$0 sm:$0xff] }
0x1115   : > { %2303 = vrsqrt.f32 %v1646_v18  ;;  %vm1653_vm0 = vweird.f32 %v1646_v18 }
0x111b   : > { %v2304_v19 = vpop.eup %2303 }
0x111c   : > { %v1648_v22 = vmul.f32 %v2304_v19, %v1646_v18  ;;  %vm1654_vm12 = vweird.f32 %v2304_v19 }
0x111d   : > { %vm1655_vm7 = vmor %vm1653_vm0, %vm1654_vm12  ;;  %vm1706_vm12 = vcmask 244968  }
0x111e   : > { %v1649_v29 = vmul.f32 %v2304_v19, %v1648_v22 }
0x1120   : > { %v1650_v24 = vmul.f32 0.5, %v1649_v29  ;;  %v2104_v29 = vld [vmem:[%s2384_s21 + $0x8] sm:$0xff] }
0x1122   : > { %v1651_v37 = vsub.f32 1.5, %v1650_v24  ;;  %v635_v24 = vld [vmem:[%s2384_s21] sm:$0xff] }
0x1124   : > { %v1652_v27 = vmul.f32 %v2304_v19, %v1651_v37 }
0x1126   : > { %v1656_v33 = vsel %vm1655_vm7, %v2304_v19, %v1652_v27  ;;  %vm1735_vm7 = vmand %vm1706_vm12, %vm502_vm8  ;;  %vm642_vm8 = vcmask 1047559  }
0x1127   : > { %v1665_v28 = vmul.f32 %v1664_v8, %v1656_v33 }
0x1129   : > { %v1668_v52 = vsel %vm1667_vm6, %v1665_v28, 0.0  ;;  %vm1133_vm6 = vmand %vm1104_vm1, %vm642_vm8  ;;  %vm1740_vm1 = vcmask 253168  }
0x112a   : > { %v1669_v31 = vadd.f32 %v1668_v52, %v1635_v9 }
0x112c   : > { %2196 = vst [vmem:[%s2376_s20 + $0x18] sm:$0xff] %v1669_v31 }
0x1133   : > { %v2197_v10 = vld [vmem:[%s2376_s20 + $0x1c] ss:$0 sm:$0xff] }
0x1134   : > { %v1695_v34 = vmul.f32 %v2197_v10, %v1669_v31  ;;  %v1677_v21 = vmul.f32 %v2197_v10, %v2197_v10 }
0x1136   : > { %1696 = vadd.xlane.f32.xlu0 %v1695_v34  ;;  %1678 = vadd.xlane.f32.xlu2 %v1677_v21 }
0x11a9   : > { %v1679_v36 = vpop.xlane.xlu2 %1678  ;;  %v1697_v44 = vpop.xlane.xlu0 %1696 }
0x11aa   : > { %v1680_v39 = vsub.f32 %v2198_v43, %v1679_v36  ;;  %v1698_v48 = vsub.f32 %v2748_v7, %v1697_v44 }
0x11ac   : > { %2305 = vrsqrt.f32 %v1680_v39  ;;  %vm1687_vm11 = vweird.f32 %v1680_v39 }
0x11b2   : > { %v2306_v40 = vpop.eup %2305 }
0x11b3   : > { %v1682_v32 = vmul.f32 %v2306_v40, %v1680_v39  ;;  %vm1688_vm2 = vweird.f32 %v2306_v40  ;;  %v2209_v39 = vld [vmem:[%s2384_s21 + $0x18] sm:$0xff] }
0x11b4   : > { %vm1689_vm10 = vmor %vm1687_vm11, %vm1688_vm2 }
0x11b5   : > { %v1683_v41 = vmul.f32 %v2306_v40, %v1682_v32  ;;  %vm643_vm2 = vmand %vm616_vm5, %vm642_vm8 }
0x11b7   : > { %v1684_v42 = vmul.f32 0.5, %v1683_v41 }
0x11b9   : > { %v1685_v45 = vsub.f32 1.5, %v1684_v42 }
0x11bb   : > { %v1686_v47 = vmul.f32 %v2306_v40, %v1685_v45 }
0x11bd   : > { %v1690_v62 = vsel %vm1689_vm10, %v2306_v40, %v1686_v47  ;;  %vm1769_vm10 = vmand %vm1740_vm1, %vm572_vm4 }
0x11be   : > { %v1699_v49 = vmul.f32 %v1698_v48, %v1690_v62  ;;  %v1514_v62 = vmul.f32 %v2829_v57, %v2824_v56  ;;  %vm1520_vm4 = vmand %vm1491_vm3, %vm642_vm8 }
0x11c0   : > { %v1702_v51 = vsel %vm1701_vm15, %v1699_v49, 0.0  ;;  %v2213_v49 = vld [vmem:[%s2384_s21 + $0x1f] ss:$0 sm:$0xff] }
0x11c1   : > { %v1703_v20 = vadd.f32 %v1702_v51, %v1669_v31 }
0x11c3   : > { %2201 = vst [vmem:[%s2376_s20 + $0x18] sm:$0xff] %v1703_v20 }
0x11ca   : > { %v2202_v54 = vld [vmem:[%s2376_s20 + $0x1d] ss:$0 sm:$0xff] }
0x11cb   : > { %v1729_v55 = vmul.f32 %v2202_v54, %v1703_v20  ;;  %v1711_v23 = vmul.f32 %v2202_v54, %v2202_v54  ;;  %v2171_v54 = vld [vmem:[%s2384_s21 + $0x10] sm:$0xff] }
0x11cd   : > { %1730 = vadd.xlane.f32.xlu2 %v1729_v55  ;;  %1712 = vadd.xlane.f32.xlu1 %v1711_v23 }
0x1240   : > { %v1713_v30 = vpop.xlane.xlu1 %1712  ;;  %v1731_v0 = vpop.xlane.xlu2 %1730 }
0x1241   : > { %v1714_v53 = vsub.f32 %v2203_v59, %v1713_v30  ;;  %v1732_v25 = vsub.f32 %v2748_v7, %v1731_v0  ;;  %v1127_v7 = vmul.f32 %v2105_v11, %v2739_v38 }
0x1243   : > { %2307 = vrsqrt.f32 %v1714_v53  ;;  %vm1721_vm9 = vweird.f32 %v1714_v53 }
0x1249   : > { %v2308_v16 = vpop.eup %2307 }
0x124a   : > { %v1716_v61 = vmul.f32 %v2308_v16, %v1714_v53  ;;  %vm1722_vm13 = vweird.f32 %v2308_v16 }
0x124b   : > { %vm1723_vm0 = vmor %vm1721_vm9, %vm1722_vm13  ;;  %vm1774_vm13 = vcmask 261368  }
0x124c   : > { %v1717_v46 = vmul.f32 %v2308_v16, %v1716_v61  ;;  %vm1803_vm3 = vmand %vm1774_vm13, %vm642_vm8 }
0x124e   : > { %v1718_v50 = vmul.f32 0.5, %v1717_v46 }
0x1250   : > { %v1719_v60 = vsub.f32 1.5, %v1718_v50 }
0x1252   : > { %v1720_v1 = vmul.f32 %v2308_v16, %v1719_v60 }
0x1254   : > { %v1724_v3 = vsel %vm1723_vm0, %v2308_v16, %v1720_v1 }
0x1255   : > { %v1733_v63 = vmul.f32 %v1732_v25, %v1724_v3 }
0x1257   : > { %v1736_v4 = vsel %vm1735_vm7, %v1733_v63, 0.0 }
0x1258   : > { %v1737_v5 = vadd.f32 %v1736_v4, %v1703_v20 }
0x125a   : > { %2206 = vst [vmem:[%s2376_s20 + $0x18] sm:$0xff] %v1737_v5 }
0x1261   : > { %v2207_v6 = vld [vmem:[%s2376_s20 + $0x1e] ss:$0 sm:$0xff] }
0x1262   : > { %v1763_v35 = vmul.f32 %v2207_v6, %v1737_v5  ;;  %v1745_v9 = vmul.f32 %v2207_v6, %v2207_v6 }
0x1264   : > { %1764 = vadd.xlane.f32.xlu1 %v1763_v35  ;;  %1746 = vadd.xlane.f32.xlu0 %v1745_v9 }
0x126c   : > { %1128 = vadd.xlane.f32.xlu1 %v1127_v7  ;;  %638 = vadd.xlane.f32.xlu0 %v637_v14 }
0x12d7   : > { %v1765_v18 = vpop.xlane.xlu1 %1764  ;;  %v1747_v19 = vpop.xlane.xlu0 %1746 }
0x12d8   : > { %v1748_v22 = vsub.f32 %v2208_v15, %v1747_v19 }
0x12da   : > { %2309 = vrsqrt.f32 %v1748_v22  ;;  %vm1755_vm14 = vweird.f32 %v1748_v22 }
0x12df   : > { %v1129_v26 = vpop.xlane.xlu1 %1128  ;;  %v639_v37 = vpop.xlane.xlu0 %638 }
0x12e0   : > { %v2310_v27 = vpop.eup %2309  ;;  %v1130_v38 = vsub.f32 %v2104_v29, %v1129_v26  ;;  %v640_v8 = vsub.f32 %v635_v24, %v639_v37 }
0x12e1   : > { %v1750_v33 = vmul.f32 %v2310_v27, %v1748_v22  ;;  %vm1756_vm5 = vweird.f32 %v2310_v27 }
0x12e2   : > { %v1131_v28 = vmul.f32 %v1130_v38, %v2756_v2  ;;  %v641_v52 = vmul.f32 %v640_v8, %v2558_v13  ;;  %v1766_v2 = vsub.f32 %v2209_v39, %v1765_v18  ;;  %vm1757_vm11 = vmor %vm1755_vm14, %vm1756_vm5 }
0x12e3   : > { %v1751_v31 = vmul.f32 %v2310_v27, %v1750_v33 }
0x12e4   : > { %v1134_v10 = vsel %vm1133_vm6, %v1131_v28, 0.0  ;;  %v644_v34 = vsel %vm643_vm2, %v641_v52, 0.0 }
0x12e5   : > { %v1752_v21 = vmul.f32 0.5, %v1751_v31  ;;  %v1135_v43 = vadd.f32 %v2105_v11, %v1134_v10  ;;  %v645_v36 = vadd.f32 %v644_v34, %v636_v12 }
0x12e7   : > { %v1753_v40 = vsub.f32 1.5, %v1752_v21  ;;  %2106 = vst [vmem:[%s2376_s20 + $0x8] sm:$0xff] %v1135_v43 }
0x12e8   : > { %1856 = vst [vmem:[%s2890_s25 + $0x8] sm:$0xff] %v1135_v43 }
0x12e9   : > { %v1754_v13 = vmul.f32 %v2310_v27, %v1753_v40  ;;  %646 = vst [vmem:[%s2376_s20] sm:$0xff] %v645_v36 }
0x12ea   : > { %1854 = vst [vmem:[%s2890_s25] sm:$0xff] %v645_v36 }
0x12eb   : > { %v1758_v32 = vsel %vm1757_vm11, %v2310_v27, %v1754_v13 }
0x12ec   : > { %v1767_v41 = vmul.f32 %v1766_v2, %v1758_v32 }
0x12ee   : > { %v1770_v42 = vsel %vm1769_vm10, %v1767_v41, 0.0 }
0x12ef   : > { %v1771_v44 = vadd.f32 %v1770_v42, %v1737_v5 }
0x12f1   : > { %2211 = vst [vmem:[%s2376_s20 + $0x18] sm:$0xff] %v1771_v44 }
0x12f8   : > { %v2212_v45 = vld [vmem:[%s2376_s20 + $0x1f] ss:$0 sm:$0xff] }
0x12f9   : > { %v1797_v47 = vmul.f32 %v2212_v45, %v1771_v44  ;;  %v1779_v48 = vmul.f32 %v2212_v45, %v2212_v45 }
0x12fb   : > { %1798 = vadd.xlane.f32.xlu0 %v1797_v47  ;;  %1780 = vadd.xlane.f32.xlu2 %v1779_v48 }
0x1303   : > { %1515 = vadd.xlane.f32.xlu2 %v1514_v62 }
0x136e   : > { %v1781_v51 = vpop.xlane.xlu2 %1780  ;;  %v1799_v0 = vpop.xlane.xlu0 %1798 }
0x136f   : > { %v1782_v20 = vsub.f32 %v2213_v49, %v1781_v51  ;;  %v1800_v1 = vsub.f32 %v2209_v39, %v1799_v0 }
0x1371   : > { %2311 = vrsqrt.f32 %v1782_v20  ;;  %vm1789_vm12 = vweird.f32 %v1782_v20 }
0x1376   : > { %v1516_v55 = vpop.xlane.xlu2 %1515 }
0x1377   : > { %v2312_v23 = vpop.eup %2311  ;;  %v1517_v59 = vsub.f32 %v2171_v54, %v1516_v55 }
0x1378   : > { %v1784_v30 = vmul.f32 %v2312_v23, %v1782_v20  ;;  %vm1790_vm15 = vweird.f32 %v2312_v23 }
0x1379   : > { %v1518_v53 = vmul.f32 %v1517_v59, %v2838_v58  ;;  %vm1791_vm9 = vmor %vm1789_vm12, %vm1790_vm15 }
0x137a   : > { %v1785_v16 = vmul.f32 %v2312_v23, %v1784_v30 }
0x137b   : > { %v1521_v61 = vsel %vm1520_vm4, %v1518_v53, 0.0 }
0x137c   : > { %v1786_v57 = vmul.f32 0.5, %v1785_v16  ;;  %v1522_v46 = vadd.f32 %v1521_v61, %v2824_v56 }
0x137e   : > { %v1787_v50 = vsub.f32 1.5, %v1786_v57  ;;  %2173 = vst [vmem:[%s2376_s20 + $0x10] sm:$0xff] %v1522_v46 }
0x137f   : > { %1858 = vst [vmem:[%s2890_s25 + $0x10] sm:$0xff] %v1522_v46 }
0x1380   : > { %v1788_v60 = vmul.f32 %v2312_v23, %v1787_v50 }
0x1382   : > { %v1792_v25 = vsel %vm1791_vm9, %v2312_v23, %v1788_v60 }
0x1383   : > { %v1801_v58 = vmul.f32 %v1800_v1, %v1792_v25 }
0x1385   : > { %v1804_v3 = vsel %vm1803_vm3, %v1801_v58, 0.0 }
0x1386   : > { %v1805_v63 = vadd.f32 %v1804_v3, %v1771_v44 }
0x1388   : > { %2216 = vst [vmem:[%s2376_s20 + $0x18] sm:$0xff] %v1805_v63 }
0x1389   : > { %1860 = vst [vmem:[%s2890_s25 + $0x18] sm:$0xff] %v1805_v63 }
0x138a PF: > { %s7_s8 = sadd.s32 1, %s2336_s8   ;;  %s2924_s6 = smov %s2332_s7 }
0x138b   : > { %p4_p5 = scmp.ge.s32.totalorder %s7_s8, 4   ;;  %s2925_s7 = smov %s2927_s10 }
0x138d   :  { %6 = sbr.rel (!%p4_p5) target bundleno = 2 (0x2), region = 399 }

// kernel: custom-call.6
= control target key start
LH: loop header
LB: loop body
LE: loop exit
PB: predicated region body
PF: predicated region fallthrough
CT: control target
= control target key end

     0   :  { %s1113_s6 = smov 0   ;;  %s1115_s7 = smov 0   ;;  %s1351_s0 = inlined_call_operand.vmem [shape: f32[2,16,1,32,32], index: 0, kind: input, shape index: {}]   ;;  %s1352_s1 = inlined_call_operand.vmem [shape: f32[2,16,1,32,32], index: 1, kind: output, shape index: {}]  }
   0x1   :  { %s1117_s8 = smov 0   ;;  %s1119_s9 = smov 0  }
   0x2   :  { %s1121_s10 = smov 0  }
   0x3 LB: > { %s989_s11 = sadd.s32 4294967295, %s1099_s10   ;;  %s36_s12 = sadd.s32 1, %s1091_s8  ;;  %s1099_s10 = sphi %s1121_s10, %s7_s10   ;;  %s1095_s9 = sphi %s1119_s9, %s1356_s9   ;;  %s1091_s8 = sphi %s1117_s8, %s1355_s8   ;;  %s1087_s7 = sphi %s1115_s7, %s1354_s7   ;;  %s1083_s6 = sphi %s1113_s6, %s1353_s6  }
   0x4   : > { %p38_p0 = scmp.ge.s32.totalorder %s36_s12, 16  ;;  %s40_s13 = sadd.s32 1, %s1095_s9 }
   0x5   : > { %p991_p2 = scmp.ge.s32.totalorder %s1099_s10, 32 }
   0x6   : > { %s1358_s12 = smov (%p38_p0, %s36_s12), 0  ;;  %s1360_s13 = smov (!%p38_p0, %s40_s13), %s1095_s9 }
   0x7   : > { %p42_p1 = scmp.ge.s32.totalorder %s1360_s13, 2  ;;  %54 = sbr.rel (%p991_p2) target bundleno = 19 (0x13), region = 16 }
   0x8   : > { %s56_s14 = sand.u32 (!%p991_p2), 1, %s1099_s10   ;;  %s993_s15 = sshll.u32 (!%p991_p2), %s1091_s8, 2 }
   0x9   : > { %s1362_s13 = smov (%p42_p1, %s1360_s13), 0  ;;  %s992_s16 = sshll.u32 (!%p991_p2), %s56_s14, 5 }
   0xa   : > { %s994_s17 = sshll.u32 (!%p991_p2), %s1095_s9, 6  ;;  %s58_s23 = scalar_lea.vmem (!%p991_p2), [#allocation0], %s992_s16 }
   0xb   : > { %s65_s18 = sadd.s32 (!%p991_p2), %s994_s17, %s993_s15 }
   0xc   : > { %s995_s19 = sshll.u32 %s65_s18, 3 }
   0xd   : > { %s67_s22 = scalar_lea.vmem %s1351_s0, %s995_s19 }
   0xe   : > { %v102_v0 = vld [vmem:[%s67_s22] sm:$0xff]  ;;  %v104_v1 = vld [vmem:[%s67_s22 + $0x8] sm:$0xff]  ;;  %v106_v2 = vld [vmem:[%s67_s22 + $0x10] sm:$0xff] }
   0xf   : > { %103 = vst [vmem:[%s58_s23] sm:$0xff] %v102_v0  ;;  %v108_v3 = vld [vmem:[%s67_s22 + $0x18] sm:$0xff] }
  0x10   : > { %105 = vst [vmem:[%s58_s23 + $0x8] sm:$0xff] %v104_v1 }
  0x11   : > { %107 = vst [vmem:[%s58_s23 + $0x10] sm:$0xff] %v106_v2 }
  0x12   : > { %109 = vst [vmem:[%s58_s23 + $0x18] sm:$0xff] %v108_v3 }
  0x13 PF: > { %p996_p3 = scmp.ge.s32.totalorder %s1099_s10, 1  ;;  %p114_p4 = scmp.lt.s32.totalorder %s1099_s10, 33 }
  0x15   : > { %p115_p5 = pnand %p996_p3, %p114_p4 }
  0x17   : > { %118 = sbr.rel (%p115_p5) target bundleno = 3880 (0xf28), region = 54 }
  0x1c   : > { %s121_s24 = sand.u32 1, %s989_s11   ;;  %v132_v4 = vlaneseq  ;;  %v1101_v22 = vmov -1.0   ;;  %v1102_v1 = vmov 0.0   ;;  %s1006_s27 = sshll.u32 %s1083_s6, 2 }
  0x1d   : > { %s997_s25 = sshll.u32 %s121_s24, 5  ;;  %s1007_s28 = sshll.u32 %s1087_s7, 6 }
  0x1e   : > { %v1157_v5 = vand.u32 127, %v132_v4  ;;  %v1159_v6 = vshrl.u32 %v132_v4, 7  ;;  %s1161_s26 = scalar_lea.vmem [#allocation0], %s997_s25  ;;  %s868_s29 = sadd.s32 %s1007_s28, %s1006_s27 }
  0x1f   : > { %v139_v7 = vld [vmem:[%s1161_s26] sm:$0xff]  ;;  %v999_v44 = vld [vmem:[%s1161_s26 + $0x8] sm:$0xff]  ;;  %s1008_s30 = sshll.u32 %s868_s29, 3 }
  0x20   : > { %vm138_vm0 = vcmp.eq.s32.totalorder %v1159_v6, %v1157_v5  ;;  %vm134_vm1 = vcmp.lt.s32.totalorder %v1157_v5, 32  ;;  %vm143_vm2 = vcmp.ge.s32.totalorder %v1159_v6, %v1157_v5  ;;  %vm257_vm8 = vcmp.eq.s32.totalorder %v1157_v5, 0  ;;  %s870_s4 = scalar_lea.vmem %s1352_s1, %s1008_s30 }
  0x21   : > { %v140_v8 = vsel %vm138_vm0, %v139_v7, 0.0  ;;  %vm144_vm3 = vmand %vm143_vm2, %vm134_vm1  ;;  %vm254_vm9 = vcmp.eq.s32.totalorder %v1157_v5, %v1159_v6  ;;  %v258_v23 = vsel %vm257_vm8, 1.0, %v1101_v22  ;;  %vm286_vm10 = vcmp.eq.s32.totalorder %v1157_v5, 1 }
  0x22   : > { %141 = vadd.xlane.f32.xlu0 %v140_v8  ;;  %v145_v17 = vsel %vm144_vm3, %v139_v7, 0.0  ;;  %v259_v24 = vsel %vm254_vm9, %v258_v23, 0.0  ;;  %vm296_vm11 = vcmp.eq.s32.totalorder %v1157_v5, 2  ;;  %vm306_vm12 = vcmp.eq.s32.totalorder %v1157_v5, 3 }
  0x23   : > { %v166_v43 = vadd.s32 8, %v1159_v6  ;;  %vm316_vm14 = vcmp.eq.s32.totalorder %v1157_v5, 4  ;;  %vm326_vm8 = vcmp.eq.s32.totalorder %v1157_v5, 5  ;;  %vm336_vm9 = vcmp.eq.s32.totalorder %v1157_v5, 6 }
  0x25   : > { %vm167_vm13 = vcmp.eq.s32.totalorder %v166_v43, %v1157_v5  ;;  %vm172_vm15 = vcmp.ge.s32.totalorder %v166_v43, %v1157_v5 }
  0x26   : > { %v169_v45 = vsel %vm167_vm13, %v999_v44, 0.0  ;;  %vm173_vm3 = vmand %vm172_vm15, %vm134_vm1  ;;  %vm384_vm13 = vcmp.eq.s32.totalorder %v1157_v5, 10  ;;  %vm412_vm15 = vcmp.eq.s32.totalorder %v1157_v5, 12 }
  0x27   : > { %v174_v60 = vsel %vm173_vm3, %v999_v44, 0.0  ;;  %vm426_vm3 = vcmp.eq.s32.totalorder %v1157_v5, 13 }
  0x95   : > { %v1166_v9 = vpop.xlane.xlu0 %141 }
  0x96   : > { %1053 = vrcp.f32 %v1166_v9  ;;  %v157_v13 = vand.u32 2147483648, %v1166_v9  ;;  %v155_v15 = vand.u32 2147483647, %v1166_v9  ;;  %vm151_vm5 = vweird.f32 %v1166_v9 }
  0x98   : > { %v158_v18 = vor.u32 1.1754944e-38, %v157_v13  ;;  %vm156_vm7 = vcmp.eq.f32.partialorder %v155_v15, 8.507059e+37 }
  0x9c   : > { %v1054_v10 = vpop.eup %1053 }
  0x9d   : > { %v147_v11 = vmul.f32 %v1054_v10, %v1166_v9  ;;  %vm152_vm4 = vweird.f32 %v1054_v10 }
  0x9e   : > { %vm153_vm6 = vmor %vm151_vm5, %vm152_vm4 }
  0x9f   : > { %v148_v12 = vsub.f32 1.0, %v147_v11 }
  0xa1   : > { %v149_v14 = vmul.f32 %v1054_v10, %v148_v12 }
  0xa3   : > { %v150_v16 = vadd.f32 %v1054_v10, %v149_v14 }
  0xa5   : > { %v154_v19 = vsel %vm153_vm6, %v1054_v10, %v150_v16 }
  0xa6   : > { %v1180_v20 = vsel %vm156_vm7, %v158_v18, %v154_v19  ;;  %vm265_vm7 = vcmp.eq.s32.totalorder %v1157_v5, %v166_v43 }
  0xa7   : > { %v160_v21 = vmul.f32 %v1180_v20, %v145_v17  ;;  %v266_v2 = vsel %vm265_vm7, -1.0, %v1102_v1 }
  0xa9   : > { %161 = vst [vmem:[#allocation2] sm:$0xff] %v160_v21 }
  0xb0   : > { %v282_v25 = vld [vmem:[#allocation2 + $0x1] ss:$0 sm:$0xff]  ;;  %v292_v28 = vld [vmem:[#allocation2 + $0x2] ss:$0 sm:$0xff]  ;;  %v302_v33 = vld [vmem:[#allocation2 + $0x3] ss:$0 sm:$0xff] }
  0xb1   : > { %v283_v26 = vxor.u32 2147483648, %v282_v25  ;;  %v293_v30 = vxor.u32 2147483648, %v292_v28  ;;  %v303_v35 = vxor.u32 2147483648, %v302_v33  ;;  %v312_v38 = vld [vmem:[#allocation2 + $0x4] ss:$0 sm:$0xff] }
  0xb2   : > { %v313_v40 = vxor.u32 2147483648, %v312_v38  ;;  %v322_v46 = vld [vmem:[#allocation2 + $0x5] ss:$0 sm:$0xff]  ;;  %v332_v0 = vld [vmem:[#allocation2 + $0x6] ss:$0 sm:$0xff] }
  0xb3   : > { %v287_v27 = vmul.f32 %v283_v26, %v259_v24  ;;  %v323_v48 = vxor.u32 2147483648, %v322_v46  ;;  %v333_v7 = vxor.u32 2147483648, %v332_v0  ;;  %v342_v13 = vld [vmem:[#allocation2 + $0x7] ss:$0 sm:$0xff] }
  0xb4   : > { %v343_v15 = vxor.u32 2147483648, %v342_v13 }
  0xb5   : > { %288 = vadd.xlane.f32.xlu0 %v287_v27 }
 0x128   : > { %v289_v29 = vpop.xlane.xlu0 %288 }
 0x129   : > { %v290_v31 = vsel %vm286_vm10, %v289_v29, %v259_v24  ;;  %vm346_vm10 = vcmp.eq.s32.totalorder %v1157_v5, 7 }
 0x12a   : > { %v297_v32 = vmul.f32 %v293_v30, %v290_v31 }
 0x12c   : > { %298 = vadd.xlane.f32.xlu1 %v297_v32 }
 0x19f   : > { %v299_v34 = vpop.xlane.xlu1 %298 }
 0x1a0   : > { %v300_v36 = vsel %vm296_vm11, %v299_v34, %v290_v31  ;;  %vm356_vm11 = vcmp.eq.s32.totalorder %v1157_v5, 8 }
 0x1a1   : > { %v307_v37 = vmul.f32 %v303_v35, %v300_v36 }
 0x1a3   : > { %308 = vadd.xlane.f32.xlu1 %v307_v37 }
 0x1ab   : > { %170 = vadd.xlane.f32.xlu1 %v169_v45 }
 0x216   : > { %v309_v39 = vpop.xlane.xlu1 %308 }
 0x217   : > { %v310_v41 = vsel %vm306_vm12, %v309_v39, %v300_v36  ;;  %vm370_vm12 = vcmp.eq.s32.totalorder %v1157_v5, 9 }
 0x218   : > { %v317_v42 = vmul.f32 %v313_v40, %v310_v41 }
 0x21a   : > { %318 = vadd.xlane.f32.xlu2 %v317_v42 }
 0x21e   : > { %v1193_v51 = vpop.xlane.xlu1 %170 }
 0x21f   : > { %1055 = vrcp.f32 %v1193_v51  ;;  %v186_v54 = vand.u32 2147483648, %v1193_v51  ;;  %vm180_vm0 = vweird.f32 %v1193_v51  ;;  %v184_v56 = vand.u32 2147483647, %v1193_v51 }
 0x221   : > { %v187_v58 = vor.u32 1.1754944e-38, %v186_v54  ;;  %vm185_vm6 = vcmp.eq.f32.partialorder %v184_v56, 8.507059e+37 }
 0x225   : > { %v1056_v52 = vpop.eup %1055 }
 0x226   : > { %v176_v53 = vmul.f32 %v1056_v52, %v1193_v51  ;;  %vm181_vm2 = vweird.f32 %v1056_v52 }
 0x227   : > { %vm182_vm4 = vmor %vm180_vm0, %vm181_vm2 }
 0x228   : > { %v177_v55 = vsub.f32 1.0, %v176_v53 }
 0x22a   : > { %v178_v57 = vmul.f32 %v1056_v52, %v177_v55 }
 0x22c   : > { %v179_v59 = vadd.f32 %v1056_v52, %v178_v57 }
 0x22e   : > { %v183_v61 = vsel %vm182_vm4, %v1056_v52, %v179_v59 }
 0x22f   : > { %v1205_v62 = vsel %vm185_vm6, %v187_v58, %v183_v61  ;;  %v1000_v61 = vld [vmem:[%s1161_s26 + $0x10] sm:$0xff] }
 0x230   : > { %v189_v63 = vmul.f32 %v1205_v62, %v174_v60  ;;  %v195_v60 = vadd.s32 16, %v1159_v6 }
 0x232   : > { %190 = vst [vmem:[#allocation2 + $0x8] sm:$0xff] %v189_v63  ;;  %vm196_vm2 = vcmp.eq.s32.totalorder %v195_v60, %v1157_v5  ;;  %vm201_vm4 = vcmp.ge.s32.totalorder %v195_v60, %v1157_v5 }
 0x233   : > { %v198_v63 = vsel %vm196_vm2, %v1000_v61, 0.0  ;;  %vm504_vm2 = vcmp.eq.s32.totalorder %v1157_v5, 18 }
 0x239   : > { %v352_v3 = vld [vmem:[#allocation2 + $0x8] ss:$0 sm:$0xff]  ;;  %v366_v22 = vld [vmem:[#allocation2 + $0x9] ss:$0 sm:$0xff]  ;;  %v380_v30 = vld [vmem:[#allocation2 + $0xa] ss:$0 sm:$0xff] }
 0x23a   : > { %v353_v8 = vxor.u32 2147483648, %v352_v3  ;;  %v367_v24 = vxor.u32 2147483648, %v366_v22  ;;  %v381_v32 = vxor.u32 2147483648, %v380_v30  ;;  %v394_v38 = vld [vmem:[#allocation2 + $0xb] ss:$0 sm:$0xff] }
 0x23b   : > { %v395_v40 = vxor.u32 2147483648, %v394_v38  ;;  %v408_v46 = vld [vmem:[#allocation2 + $0xc] ss:$0 sm:$0xff]  ;;  %v422_v55 = vld [vmem:[#allocation2 + $0xd] ss:$0 sm:$0xff] }
 0x23c   : > { %v361_v12 = vmul.f32 %v353_v8, %v266_v2  ;;  %v423_v57 = vxor.u32 2147483648, %v422_v55 }
 0x23e   : > { %362 = vadd.xlane.f32.xlu1 %v361_v12 }
 0x28d   : > { %v319_v47 = vpop.xlane.xlu2 %318 }
 0x28e   : > { %v320_v49 = vsel %vm316_vm14, %v319_v47, %v310_v41  ;;  %vm398_vm14 = vcmp.eq.s32.totalorder %v1157_v5, 11 }
 0x28f   : > { %v327_v50 = vmul.f32 %v323_v48, %v320_v49  ;;  %v409_v48 = vxor.u32 2147483648, %v408_v46 }
 0x291   : > { %328 = vadd.xlane.f32.xlu2 %v327_v50 }
 0x2b1   : > { %v363_v23 = vpop.xlane.xlu1 %362 }
 0x2b2   : > { %v364_v25 = vsel %vm356_vm11, %v363_v23, %v266_v2 }
 0x2b3   : > { %v375_v26 = vmul.f32 %v367_v24, %v364_v25 }
 0x304   : > { %v329_v4 = vpop.xlane.xlu2 %328 }
 0x305   : > { %v330_v10 = vsel %vm326_vm8, %v329_v4, %v320_v49  ;;  %v436_v4 = vld [vmem:[#allocation2 + $0xe] ss:$0 sm:$0xff]  ;;  %vm202_vm8 = vmand %vm201_vm4, %vm134_vm1  ;;  %vm540_vm4 = vcmp.eq.s32.totalorder %v1157_v5, 20 }
 0x306   : > { %v337_v11 = vmul.f32 %v333_v7, %v330_v10  ;;  %v203_v22 = vsel %vm202_vm8, %v1000_v61, 0.0 }
 0x308   : > { %338 = vadd.xlane.f32.xlu0 %v337_v11 }
 0x37b   : > { %v339_v14 = vpop.xlane.xlu0 %338 }
 0x37c   : > { %v340_v16 = vsel %vm336_vm9, %v339_v14, %v330_v10 }
 0x37d   : > { %v347_v17 = vmul.f32 %v343_v15, %v340_v16 }
 0x37f   : > { %348 = vadd.xlane.f32.xlu2 %v347_v17 }
 0x3f2   : > { %v349_v18 = vpop.xlane.xlu2 %348 }
 0x3f3   : > { %v350_v19 = vsel %vm346_vm10, %v349_v18, %v340_v16 }
 0x3f4   : > { %v357_v21 = vmul.f32 %v353_v8, %v350_v19  ;;  %v437_v8 = vxor.u32 2147483648, %v436_v4 }
 0x3f6   : > { %358 = vadd.xlane.f32.xlu0 %v357_v21 }
 0x3fe   : > { %376 = vadd.xlane.f32.xlu0 %v375_v26 }
 0x469   : > { %v359_v27 = vpop.xlane.xlu0 %358 }
 0x46a   : > { %v360_v28 = vsel %vm356_vm11, %v359_v27, %v350_v19  ;;  %vm440_vm11 = vcmp.eq.s32.totalorder %v1157_v5, 14 }
 0x46b   : > { %v371_v29 = vmul.f32 %v367_v24, %v360_v28 }
 0x46d   : > { %372 = vadd.xlane.f32.xlu2 %v371_v29  ;;  %v450_v29 = vld [vmem:[#allocation2 + $0xf] ss:$0 sm:$0xff] }
 0x471   : > { %v377_v31 = vpop.xlane.xlu0 %376 }
 0x472   : > { %v378_v33 = vsel %vm370_vm12, %v377_v31, %v364_v25  ;;  %v451_v31 = vxor.u32 2147483648, %v450_v29 }
 0x473   : > { %v389_v34 = vmul.f32 %v381_v32, %v378_v33 }
 0x475   : > { %390 = vadd.xlane.f32.xlu2 %v389_v34 }
 0x4e0   : > { %v373_v35 = vpop.xlane.xlu2 %372 }
 0x4e1   : > { %v374_v36 = vsel %vm370_vm12, %v373_v35, %v360_v28  ;;  %vm272_vm12 = vcmp.eq.s32.totalorder %v1157_v5, %v195_v60 }
 0x4e2   : > { %v385_v37 = vmul.f32 %v381_v32, %v374_v36 }
 0x4e4   : > { %386 = vadd.xlane.f32.xlu1 %v385_v37 }
 0x4e8   : > { %v391_v39 = vpop.xlane.xlu2 %390 }
 0x4e9   : > { %v392_v41 = vsel %vm384_vm13, %v391_v39, %v378_v33 }
 0x4ea   : > { %v403_v42 = vmul.f32 %v395_v40, %v392_v41 }
 0x4ec   : > { %404 = vadd.xlane.f32.xlu1 %v403_v42 }
 0x557   : > { %v387_v43 = vpop.xlane.xlu1 %386 }
 0x558   : > { %v388_v44 = vsel %vm384_vm13, %v387_v43, %v374_v36  ;;  %v273_v36 = vsel %vm272_vm12, -1.0, %v1102_v1  ;;  %vm454_vm13 = vcmp.eq.s32.totalorder %v1157_v5, 15 }
 0x559   : > { %v399_v45 = vmul.f32 %v395_v40, %v388_v44 }
 0x55b   : > { %400 = vadd.xlane.f32.xlu0 %v399_v45 }
 0x55f   : > { %v405_v47 = vpop.xlane.xlu1 %404 }
 0x560   : > { %v406_v49 = vsel %vm398_vm14, %v405_v47, %v392_v41 }
 0x561   : > { %v417_v50 = vmul.f32 %v409_v48, %v406_v49 }
 0x563   : > { %418 = vadd.xlane.f32.xlu0 %v417_v50 }
 0x5ce   : > { %v401_v52 = vpop.xlane.xlu0 %400 }
 0x5cf   : > { %v402_v53 = vsel %vm398_vm14, %v401_v52, %v388_v44  ;;  %vm468_vm14 = vcmp.eq.s32.totalorder %v1157_v5, 16 }
 0x5d0   : > { %v413_v54 = vmul.f32 %v409_v48, %v402_v53 }
 0x5d2   : > { %414 = vadd.xlane.f32.xlu2 %v413_v54 }
 0x5d6   : > { %v419_v56 = vpop.xlane.xlu0 %418 }
 0x5d7   : > { %v420_v58 = vsel %vm412_vm15, %v419_v56, %v406_v49 }
 0x5d8   : > { %v431_v59 = vmul.f32 %v423_v57, %v420_v58 }
 0x5da   : > { %432 = vadd.xlane.f32.xlu2 %v431_v59 }
 0x5e2   : > { %199 = vadd.xlane.f32.xlu2 %v198_v63 }
 0x645   : > { %v415_v0 = vpop.xlane.xlu2 %414 }
 0x646   : > { %v416_v2 = vsel %vm412_vm15, %v415_v0, %v402_v53  ;;  %vm486_vm15 = vcmp.eq.s32.totalorder %v1157_v5, 17 }
 0x647   : > { %v427_v3 = vmul.f32 %v423_v57, %v416_v2 }
 0x649   : > { %428 = vadd.xlane.f32.xlu1 %v427_v3 }
 0x64d   : > { %v433_v7 = vpop.xlane.xlu2 %432 }
 0x64e   : > { %v434_v10 = vsel %vm426_vm3, %v433_v7, %v420_v58 }
 0x64f   : > { %v445_v11 = vmul.f32 %v437_v8, %v434_v10 }
 0x651   : > { %446 = vadd.xlane.f32.xlu1 %v445_v11 }
 0x655   : > { %v1224_v12 = vpop.xlane.xlu2 %199 }
 0x656   : > { %1057 = vrcp.f32 %v1224_v12  ;;  %v215_v15 = vand.u32 2147483648, %v1224_v12  ;;  %vm209_vm6 = vweird.f32 %v1224_v12  ;;  %v213_v17 = vand.u32 2147483647, %v1224_v12 }
 0x658   : > { %v216_v19 = vor.u32 1.1754944e-38, %v215_v15  ;;  %vm214_vm10 = vcmp.eq.f32.partialorder %v213_v17, 8.507059e+37 }
 0x65c   : > { %v1058_v13 = vpop.eup %1057 }
 0x65d   : > { %v205_v14 = vmul.f32 %v1058_v13, %v1224_v12  ;;  %vm210_vm7 = vweird.f32 %v1058_v13 }
 0x65e   : > { %vm211_vm9 = vmor %vm209_vm6, %vm210_vm7  ;;  %vm558_vm7 = vcmp.eq.s32.totalorder %v1157_v5, 21 }
 0x65f   : > { %v206_v16 = vsub.f32 1.0, %v205_v14 }
 0x661   : > { %v207_v18 = vmul.f32 %v1058_v13, %v206_v16 }
 0x663   : > { %v208_v21 = vadd.f32 %v1058_v13, %v207_v18 }
 0x665   : > { %v212_v23 = vsel %vm211_vm9, %v1058_v13, %v208_v21  ;;  %vm576_vm9 = vcmp.eq.s32.totalorder %v1157_v5, 22 }
 0x666   : > { %v1236_v24 = vsel %vm214_vm10, %v216_v19, %v212_v23 }
 0x667   : > { %v218_v25 = vmul.f32 %v1236_v24, %v203_v22 }
 0x669   : > { %219 = vst [vmem:[#allocation2 + $0x10] sm:$0xff] %v218_v25 }
 0x670   : > { %v464_v33 = vld [vmem:[#allocation2 + $0x10] ss:$0 sm:$0xff]  ;;  %v482_v44 = vld [vmem:[#allocation2 + $0x11] ss:$0 sm:$0xff]  ;;  %v500_v56 = vld [vmem:[#allocation2 + $0x12] ss:$0 sm:$0xff] }
 0x671   : > { %v465_v35 = vxor.u32 2147483648, %v464_v33  ;;  %v483_v45 = vxor.u32 2147483648, %v482_v44  ;;  %v501_v58 = vxor.u32 2147483648, %v500_v56  ;;  %v518_v7 = vld [vmem:[#allocation2 + $0x13] ss:$0 sm:$0xff] }
 0x672   : > { %v536_v21 = vld [vmem:[#allocation2 + $0x14] ss:$0 sm:$0xff]  ;;  %v554_v33 = vld [vmem:[#allocation2 + $0x15] ss:$0 sm:$0xff]  ;;  %v572_v44 = vld [vmem:[#allocation2 + $0x16] ss:$0 sm:$0xff] }
 0x673   : > { %v477_v37 = vmul.f32 %v465_v35, %v273_v36  ;;  %v537_v23 = vxor.u32 2147483648, %v536_v21 }
 0x6bc   : > { %v429_v26 = vpop.xlane.xlu1 %428 }
 0x6bd   : > { %v430_v27 = vsel %vm426_vm3, %v429_v26, %v416_v2  ;;  %vm522_vm3 = vcmp.eq.s32.totalorder %v1157_v5, 19 }
 0x6be   : > { %v441_v28 = vmul.f32 %v437_v8, %v430_v27 }
 0x6c0   : > { %442 = vadd.xlane.f32.xlu0 %v441_v28 }
 0x6c4   : > { %v447_v30 = vpop.xlane.xlu1 %446 }
 0x6c5   : > { %v448_v32 = vsel %vm440_vm11, %v447_v30, %v434_v10  ;;  %v519_v10 = vxor.u32 2147483648, %v518_v7 }
 0x6c6   : > { %v459_v34 = vmul.f32 %v451_v31, %v448_v32 }
 0x6c8   : > { %460 = vadd.xlane.f32.xlu1 %v459_v34 }
 0x6d0   : > { %478 = vadd.xlane.f32.xlu1 %v477_v37 }
 0x733   : > { %v443_v38 = vpop.xlane.xlu0 %442 }
 0x734   : > { %v444_v39 = vsel %vm440_vm11, %v443_v38, %v430_v27 }
 0x735   : > { %v455_v40 = vmul.f32 %v451_v31, %v444_v39 }
 0x737   : > { %456 = vadd.xlane.f32.xlu0 %v455_v40 }
 0x73b   : > { %v461_v41 = vpop.xlane.xlu1 %460 }
 0x73c   : > { %v462_v42 = vsel %vm454_vm13, %v461_v41, %v448_v32 }
 0x73d   : > { %v473_v43 = vmul.f32 %v465_v35, %v462_v42 }
 0x73f   : > { %474 = vadd.xlane.f32.xlu0 %v473_v43 }
 0x743   : > { %v479_v46 = vpop.xlane.xlu1 %478 }
 0x744   : > { %v480_v47 = vsel %vm468_vm14, %v479_v46, %v273_v36  ;;  %v573_v46 = vxor.u32 2147483648, %v572_v44 }
 0x745   : > { %v495_v48 = vmul.f32 %v483_v45, %v480_v47 }
 0x747   : > { %496 = vadd.xlane.f32.xlu1 %v495_v48 }
 0x7aa   : > { %v457_v49 = vpop.xlane.xlu0 %456 }
 0x7ab   : > { %v458_v50 = vsel %vm454_vm13, %v457_v49, %v444_v39 }
 0x7ac   : > { %v469_v52 = vmul.f32 %v465_v35, %v458_v50  ;;  %v555_v35 = vxor.u32 2147483648, %v554_v33 }
 0x7ae   : > { %470 = vadd.xlane.f32.xlu2 %v469_v52 }
 0x7b2   : > { %v475_v53 = vpop.xlane.xlu0 %474 }
 0x7b3   : > { %v476_v54 = vsel %vm468_vm14, %v475_v53, %v462_v42 }
 0x7b4   : > { %v491_v55 = vmul.f32 %v483_v45, %v476_v54 }
 0x7b6   : > { %492 = vadd.xlane.f32.xlu0 %v491_v55 }
 0x7ba   : > { %v497_v57 = vpop.xlane.xlu1 %496 }
 0x7bb   : > { %v498_v59 = vsel %vm486_vm15, %v497_v57, %v480_v47 }
 0x7bc   : > { %v513_v60 = vmul.f32 %v501_v58, %v498_v59 }
 0x7be   : > { %514 = vadd.xlane.f32.xlu1 %v513_v60  ;;  %v590_v60 = vld [vmem:[#allocation2 + $0x17] ss:$0 sm:$0xff] }
 0x821   : > { %v471_v61 = vpop.xlane.xlu2 %470 }
 0x822   : > { %v472_v63 = vsel %vm468_vm14, %v471_v61, %v458_v50  ;;  %v1001_v61 = vld [vmem:[%s1161_s26 + $0x18] sm:$0xff] }
 0x823   : > { %v487_v0 = vmul.f32 %v483_v45, %v472_v63 }
 0x825   : > { %488 = vadd.xlane.f32.xlu2 %v487_v0  ;;  %v591_v0 = vxor.u32 2147483648, %v590_v60 }
 0x829   : > { %v493_v2 = vpop.xlane.xlu0 %492 }
 0x82a   : > { %v494_v3 = vsel %vm486_vm15, %v493_v2, %v476_v54 }
 0x82b   : > { %v509_v4 = vmul.f32 %v501_v58, %v494_v3 }
 0x82d   : > { %510 = vadd.xlane.f32.xlu0 %v509_v4 }
 0x831   : > { %v515_v8 = vpop.xlane.xlu1 %514 }
 0x832   : > { %v516_v11 = vsel %vm504_vm2, %v515_v8, %v498_v59  ;;  %v224_v59 = vadd.s32 24, %v1159_v6 }
 0x833   : > { %v531_v13 = vmul.f32 %v519_v10, %v516_v11 }
 0x834   : > { %vm225_vm8 = vcmp.eq.s32.totalorder %v224_v59, %v1157_v5  ;;  %vm230_vm10 = vcmp.ge.s32.totalorder %v224_v59, %v1157_v5 }
 0x835   : > { %532 = vadd.xlane.f32.xlu1 %v531_v13  ;;  %vm231_vm13 = vmand %vm230_vm10, %vm134_vm1  ;;  %vm279_vm1 = vcmp.eq.s32.totalorder %v1157_v5, %v224_v59  ;;  %vm722_vm10 = vcmp.eq.s32.totalorder %v1157_v5, 29 }
 0x898   : > { %v489_v14 = vpop.xlane.xlu2 %488 }
 0x899   : > { %v490_v15 = vsel %vm486_vm15, %v489_v14, %v472_v63 }
 0x89a   : > { %v505_v16 = vmul.f32 %v501_v58, %v490_v15 }
 0x89c   : > { %506 = vadd.xlane.f32.xlu2 %v505_v16 }
 0x8a0   : > { %v511_v17 = vpop.xlane.xlu0 %510 }
 0x8a1   : > { %v512_v18 = vsel %vm504_vm2, %v511_v17, %v494_v3  ;;  %v227_v3 = vsel %vm225_vm8, %v1001_v61, 0.0  ;;  %vm678_vm8 = vcmp.eq.s32.totalorder %v1157_v5, 27 }
 0x8a2   : > { %v527_v19 = vmul.f32 %v519_v10, %v512_v18 }
 0x8a4   : > { %528 = vadd.xlane.f32.xlu0 %v527_v19 }
 0x8a8   : > { %v533_v22 = vpop.xlane.xlu1 %532 }
 0x8a9   : > { %v534_v25 = vsel %vm522_vm3, %v533_v22, %v516_v11 }
 0x8aa   : > { %v549_v26 = vmul.f32 %v537_v23, %v534_v25 }
 0x8ac   : > { %550 = vadd.xlane.f32.xlu1 %v549_v26 }
 0x90f   : > { %v507_v27 = vpop.xlane.xlu2 %506 }
 0x910   : > { %v508_v28 = vsel %vm504_vm2, %v507_v27, %v490_v15  ;;  %vm594_vm2 = vcmp.eq.s32.totalorder %v1157_v5, 23 }
 0x911   : > { %v523_v29 = vmul.f32 %v519_v10, %v508_v28 }
 0x913   : > { %524 = vadd.xlane.f32.xlu2 %v523_v29 }
 0x917   : > { %v529_v30 = vpop.xlane.xlu0 %528 }
 0x918   : > { %v530_v31 = vsel %vm522_vm3, %v529_v30, %v512_v18 }
 0x919   : > { %v545_v32 = vmul.f32 %v537_v23, %v530_v31 }
 0x91b   : > { %546 = vadd.xlane.f32.xlu0 %v545_v32 }
 0x91f   : > { %v551_v34 = vpop.xlane.xlu1 %550 }
 0x920   : > { %v552_v36 = vsel %vm540_vm4, %v551_v34, %v534_v25  ;;  %v232_v25 = vsel %vm231_vm13, %v1001_v61, 0.0  ;;  %vm766_vm13 = vcmp.eq.s32.totalorder %v1157_v5, 31 }
 0x921   : > { %v567_v37 = vmul.f32 %v555_v35, %v552_v36 }
 0x923   : > { %568 = vadd.xlane.f32.xlu1 %v567_v37 }
 0x986   : > { %v525_v38 = vpop.xlane.xlu2 %524 }
 0x987   : > { %v526_v39 = vsel %vm522_vm3, %v525_v38, %v508_v28  ;;  %vm612_vm3 = vcmp.eq.s32.totalorder %v1157_v5, 24 }
 0x988   : > { %v541_v40 = vmul.f32 %v537_v23, %v526_v39 }
 0x98a   : > { %542 = vadd.xlane.f32.xlu2 %v541_v40  ;;  %v280_v40 = vsel %vm279_vm1, -1.0, %v1102_v1 }
 0x98e   : > { %v547_v41 = vpop.xlane.xlu0 %546 }
 0x98f   : > { %v548_v42 = vsel %vm540_vm4, %v547_v41, %v530_v31 }
 0x990   : > { %v563_v43 = vmul.f32 %v555_v35, %v548_v42 }
 0x992   : > { %564 = vadd.xlane.f32.xlu0 %v563_v43 }
 0x996   : > { %v569_v45 = vpop.xlane.xlu1 %568 }
 0x997   : > { %v570_v47 = vsel %vm558_vm7, %v569_v45, %v552_v36 }
 0x998   : > { %v585_v48 = vmul.f32 %v573_v46, %v570_v47 }
 0x99a   : > { %586 = vadd.xlane.f32.xlu1 %v585_v48 }
 0x9fd   : > { %v543_v49 = vpop.xlane.xlu2 %542 }
 0x9fe   : > { %v544_v50 = vsel %vm540_vm4, %v543_v49, %v526_v39  ;;  %vm634_vm4 = vcmp.eq.s32.totalorder %v1157_v5, 25 }
 0x9ff   : > { %v559_v52 = vmul.f32 %v555_v35, %v544_v50 }
 0xa01   : > { %560 = vadd.xlane.f32.xlu2 %v559_v52 }
 0xa05   : > { %v565_v53 = vpop.xlane.xlu0 %564 }
 0xa06   : > { %v566_v54 = vsel %vm558_vm7, %v565_v53, %v548_v42 }
 0xa07   : > { %v581_v55 = vmul.f32 %v573_v46, %v566_v54 }
 0xa09   : > { %582 = vadd.xlane.f32.xlu0 %v581_v55 }
 0xa0d   : > { %v587_v7 = vpop.xlane.xlu1 %586 }
 0xa0e   : > { %v588_v8 = vsel %vm576_vm9, %v587_v7, %v570_v47 }
 0xa0f   : > { %v603_v10 = vmul.f32 %v591_v0, %v588_v8 }
 0xa74   : > { %v561_v56 = vpop.xlane.xlu2 %560 }
 0xa75   : > { %v562_v57 = vsel %vm558_vm7, %v561_v56, %v544_v50  ;;  %vm656_vm7 = vcmp.eq.s32.totalorder %v1157_v5, 26 }
 0xa76   : > { %v577_v58 = vmul.f32 %v573_v46, %v562_v57 }
 0xa78   : > { %578 = vadd.xlane.f32.xlu2 %v577_v58 }
 0xa7c   : > { %v583_v63 = vpop.xlane.xlu0 %582 }
 0xa7d   : > { %v584_v2 = vsel %vm576_vm9, %v583_v63, %v566_v54 }
 0xa7e   : > { %v599_v4 = vmul.f32 %v591_v0, %v584_v2 }
 0xa80   : > { %228 = vadd.xlane.f32.xlu2 %v227_v3  ;;  %600 = vadd.xlane.f32.xlu1 %v599_v4 }
 0xa88   : > { %604 = vadd.xlane.f32.xlu2 %v603_v10 }
 0xaeb   : > { %v579_v11 = vpop.xlane.xlu2 %578 }
 0xaec   : > { %v580_v6 = vsel %vm576_vm9, %v579_v11, %v562_v57  ;;  %vm700_vm9 = vcmp.eq.s32.totalorder %v1157_v5, 28 }
 0xaed   : > { %v595_v13 = vmul.f32 %v591_v0, %v580_v6 }
 0xaef   : > { %596 = vadd.xlane.f32.xlu0 %v595_v13 }
 0xaf3   : > { %v1285_v14 = vpop.xlane.xlu2 %228  ;;  %v601_v29 = vpop.xlane.xlu1 %600 }
 0xaf4   : > { %1059 = vrcp.f32 %v1285_v14  ;;  %v244_v17 = vand.u32 2147483648, %v1285_v14  ;;  %vm238_vm11 = vweird.f32 %v1285_v14  ;;  %v242_v19 = vand.u32 2147483647, %v1285_v14 }
 0xaf5   : > { %v602_v33 = vsel %vm594_vm2, %v601_v29, %v584_v2 }
 0xaf6   : > { %v245_v22 = vor.u32 1.1754944e-38, %v244_v17  ;;  %vm243_vm15 = vcmp.eq.f32.partialorder %v242_v19, 8.507059e+37 }
 0xafa   : > { %v1060_v15 = vpop.eup %1059 }
 0xafb   : > { %v234_v16 = vmul.f32 %v1060_v15, %v1285_v14  ;;  %vm239_vm12 = vweird.f32 %v1060_v15  ;;  %v605_v30 = vpop.xlane.xlu2 %604 }
 0xafc   : > { %vm240_vm14 = vmor %vm238_vm11, %vm239_vm12  ;;  %v606_v34 = vsel %vm594_vm2, %v605_v30, %v588_v8  ;;  %vm744_vm12 = vcmp.eq.s32.totalorder %v1157_v5, 30 }
 0xafd   : > { %v235_v18 = vsub.f32 1.0, %v234_v16 }
 0xaff   : > { %v236_v21 = vmul.f32 %v1060_v15, %v235_v18 }
 0xb01   : > { %v237_v23 = vadd.f32 %v1060_v15, %v236_v21 }
 0xb03   : > { %v241_v26 = vsel %vm240_vm14, %v1060_v15, %v237_v23 }
 0xb04   : > { %v1297_v27 = vsel %vm243_vm15, %v245_v22, %v241_v26 }
 0xb05   : > { %v247_v28 = vmul.f32 %v1297_v27, %v232_v25 }
 0xb07   : > { %248 = vst [vmem:[#allocation2 + $0x18] sm:$0xff] %v247_v28 }
 0xb0e   : > { %v608_v31 = vld [vmem:[#allocation2 + $0x18] ss:$0 sm:$0xff]  ;;  %v630_v42 = vld [vmem:[#allocation2 + $0x19] ss:$0 sm:$0xff]  ;;  %v652_v56 = vld [vmem:[#allocation2 + $0x1a] ss:$0 sm:$0xff] }
 0xb0f   : > { %v609_v32 = vxor.u32 2147483648, %v608_v31  ;;  %v631_v45 = vxor.u32 2147483648, %v630_v42  ;;  %v653_v59 = vxor.u32 2147483648, %v652_v56  ;;  %v674_v11 = vld [vmem:[#allocation2 + $0x1b] ss:$0 sm:$0xff] }
 0xb10   : > { %v675_v15 = vxor.u32 2147483648, %v674_v11  ;;  %v696_v29 = vld [vmem:[#allocation2 + $0x1c] ss:$0 sm:$0xff] }
 0xb11   : > { %v621_v35 = vmul.f32 %v609_v32, %v606_v34  ;;  %v617_v36 = vmul.f32 %v609_v32, %v602_v33  ;;  %v625_v41 = vmul.f32 %v609_v32, %v280_v40 }
 0xb13   : > { %622 = vadd.xlane.f32.xlu2 %v621_v35  ;;  %618 = vadd.xlane.f32.xlu1 %v617_v36 }
 0xb62   : > { %v597_v37 = vpop.xlane.xlu0 %596 }
 0xb63   : > { %v598_v38 = vsel %vm594_vm2, %v597_v37, %v580_v6 }
 0xb64   : > { %v613_v39 = vmul.f32 %v609_v32, %v598_v38  ;;  %v697_v32 = vxor.u32 2147483648, %v696_v29 }
 0xb66   : > { %614 = vadd.xlane.f32.xlu0 %v613_v39 }
 0xb6e   : > { %626 = vadd.xlane.f32.xlu0 %v625_v41 }
 0xb86   : > { %v623_v43 = vpop.xlane.xlu2 %622  ;;  %v619_v44 = vpop.xlane.xlu1 %618 }
 0xb87   : > { %v624_v46 = vsel %vm612_vm3, %v623_v43, %v606_v34  ;;  %v620_v47 = vsel %vm612_vm3, %v619_v44, %v602_v33  ;;  %v718_v43 = vld [vmem:[#allocation2 + $0x1d] ss:$0 sm:$0xff] }
 0xb88   : > { %v639_v48 = vmul.f32 %v631_v45, %v620_v47  ;;  %v643_v49 = vmul.f32 %v631_v45, %v624_v46 }
 0xb8a   : > { %640 = vadd.xlane.f32.xlu2 %v639_v48  ;;  %644 = vadd.xlane.f32.xlu0 %v643_v49 }
 0xbd9   : > { %v615_v50 = vpop.xlane.xlu0 %614 }
 0xbda   : > { %v616_v52 = vsel %vm612_vm3, %v615_v50, %v598_v38 }
 0xbdb   : > { %v635_v53 = vmul.f32 %v631_v45, %v616_v52 }
 0xbdd   : > { %636 = vadd.xlane.f32.xlu1 %v635_v53 }
 0xbe1   : > { %v627_v54 = vpop.xlane.xlu0 %626 }
 0xbe2   : > { %v628_v1 = vsel %vm612_vm3, %v627_v54, %v280_v40 }
 0xbe3   : > { %v647_v55 = vmul.f32 %v631_v45, %v628_v1 }
 0xbe5   : > { %648 = vadd.xlane.f32.xlu1 %v647_v55 }
 0xbfd   : > { %v641_v57 = vpop.xlane.xlu2 %640  ;;  %v645_v58 = vpop.xlane.xlu0 %644 }
 0xbfe   : > { %v642_v60 = vsel %vm634_vm4, %v641_v57, %v620_v47  ;;  %v646_v61 = vsel %vm634_vm4, %v645_v58, %v624_v46  ;;  %v719_v46 = vxor.u32 2147483648, %v718_v43  ;;  %v740_v57 = vld [vmem:[#allocation2 + $0x1e] ss:$0 sm:$0xff] }
 0xbff   : > { %v661_v63 = vmul.f32 %v653_v59, %v642_v60  ;;  %v665_v0 = vmul.f32 %v653_v59, %v646_v61 }
 0xc01   : > { %662 = vadd.xlane.f32.xlu0 %v661_v63  ;;  %666 = vadd.xlane.f32.xlu1 %v665_v0 }
 0xc50   : > { %v637_v2 = vpop.xlane.xlu1 %636 }
 0xc51   : > { %v638_v3 = vsel %vm634_vm4, %v637_v2, %v616_v52 }
 0xc52   : > { %v657_v4 = vmul.f32 %v653_v59, %v638_v3 }
 0xc54   : > { %658 = vadd.xlane.f32.xlu2 %v657_v4 }
 0xc58   : > { %v649_v7 = vpop.xlane.xlu1 %648 }
 0xc59   : > { %v650_v8 = vsel %vm634_vm4, %v649_v7, %v628_v1 }
 0xc5a   : > { %v669_v10 = vmul.f32 %v653_v59, %v650_v8 }
 0xc5c   : > { %670 = vadd.xlane.f32.xlu2 %v669_v10 }
 0xc74   : > { %v667_v6 = vpop.xlane.xlu1 %666  ;;  %v663_v13 = vpop.xlane.xlu0 %662 }
 0xc75   : > { %v668_v16 = vsel %vm656_vm7, %v667_v6, %v646_v61  ;;  %v664_v17 = vsel %vm656_vm7, %v663_v13, %v642_v60  ;;  %v741_v60 = vxor.u32 2147483648, %v740_v57  ;;  %v762_v6 = vld [vmem:[#allocation2 + $0x1f] ss:$0 sm:$0xff] }
 0xc76   : > { %v687_v18 = vmul.f32 %v675_v15, %v668_v16  ;;  %v683_v19 = vmul.f32 %v675_v15, %v664_v17 }
 0xc78   : > { %688 = vadd.xlane.f32.xlu2 %v687_v18  ;;  %684 = vadd.xlane.f32.xlu1 %v683_v19 }
 0xcc7   : > { %v659_v21 = vpop.xlane.xlu2 %658 }
 0xcc8   : > { %v660_v22 = vsel %vm656_vm7, %v659_v21, %v638_v3 }
 0xcc9   : > { %v679_v23 = vmul.f32 %v675_v15, %v660_v22 }
 0xccb   : > { %680 = vadd.xlane.f32.xlu0 %v679_v23 }
 0xccf   : > { %v671_v25 = vpop.xlane.xlu2 %670 }
 0xcd0   : > { %v672_v26 = vsel %vm656_vm7, %v671_v25, %v650_v8 }
 0xcd1   : > { %v691_v28 = vmul.f32 %v675_v15, %v672_v26 }
 0xcd3   : > { %692 = vadd.xlane.f32.xlu0 %v691_v28 }
 0xceb   : > { %v689_v30 = vpop.xlane.xlu2 %688  ;;  %v685_v31 = vpop.xlane.xlu1 %684 }
 0xcec   : > { %v690_v33 = vsel %vm678_vm8, %v689_v30, %v668_v16  ;;  %v686_v34 = vsel %vm678_vm8, %v685_v31, %v664_v17  ;;  %v763_v16 = vxor.u32 2147483648, %v762_v6 }
 0xced   : > { %v709_v35 = vmul.f32 %v697_v32, %v690_v33  ;;  %v705_v36 = vmul.f32 %v697_v32, %v686_v34 }
 0xcef   : > { %710 = vadd.xlane.f32.xlu0 %v709_v35  ;;  %706 = vadd.xlane.f32.xlu2 %v705_v36 }
 0xd3e   : > { %v681_v37 = vpop.xlane.xlu0 %680 }
 0xd3f   : > { %v682_v38 = vsel %vm678_vm8, %v681_v37, %v660_v22 }
 0xd40   : > { %v701_v39 = vmul.f32 %v697_v32, %v682_v38 }
 0xd42   : > { %702 = vadd.xlane.f32.xlu1 %v701_v39 }
 0xd46   : > { %v693_v40 = vpop.xlane.xlu0 %692 }
 0xd47   : > { %v694_v41 = vsel %vm678_vm8, %v693_v40, %v672_v26 }
 0xd48   : > { %v713_v42 = vmul.f32 %v697_v32, %v694_v41 }
 0xd4a   : > { %714 = vadd.xlane.f32.xlu1 %v713_v42 }
 0xd62   : > { %v707_v44 = vpop.xlane.xlu2 %706  ;;  %v711_v45 = vpop.xlane.xlu0 %710 }
 0xd63   : > { %v708_v47 = vsel %vm700_vm9, %v707_v44, %v686_v34  ;;  %v712_v48 = vsel %vm700_vm9, %v711_v45, %v690_v33 }
 0xd64   : > { %v727_v49 = vmul.f32 %v719_v46, %v708_v47  ;;  %v731_v50 = vmul.f32 %v719_v46, %v712_v48 }
 0xd66   : > { %728 = vadd.xlane.f32.xlu0 %v727_v49  ;;  %732 = vadd.xlane.f32.xlu1 %v731_v50 }
 0xdb5   : > { %v703_v52 = vpop.xlane.xlu1 %702 }
 0xdb6   : > { %v704_v53 = vsel %vm700_vm9, %v703_v52, %v682_v38 }
 0xdb7   : > { %v723_v54 = vmul.f32 %v719_v46, %v704_v53 }
 0xdb9   : > { %724 = vadd.xlane.f32.xlu2 %v723_v54 }
 0xdbd   : > { %v715_v1 = vpop.xlane.xlu1 %714 }
 0xdbe   : > { %v716_v55 = vsel %vm700_vm9, %v715_v1, %v694_v41 }
 0xdbf   : > { %v735_v56 = vmul.f32 %v719_v46, %v716_v55 }
 0xdc1   : > { %736 = vadd.xlane.f32.xlu2 %v735_v56 }
 0xdd9   : > { %v733_v58 = vpop.xlane.xlu1 %732  ;;  %v729_v59 = vpop.xlane.xlu0 %728 }
 0xdda   : > { %v734_v61 = vsel %vm722_vm10, %v733_v58, %v712_v48  ;;  %v730_v63 = vsel %vm722_vm10, %v729_v59, %v708_v47 }
 0xddb   : > { %v753_v0 = vmul.f32 %v741_v60, %v734_v61  ;;  %v749_v2 = vmul.f32 %v741_v60, %v730_v63 }
 0xddd   : > { %754 = vadd.xlane.f32.xlu2 %v753_v0  ;;  %750 = vadd.xlane.f32.xlu1 %v749_v2 }
 0xe2c   : > { %v725_v3 = vpop.xlane.xlu2 %724 }
 0xe2d   : > { %v726_v4 = vsel %vm722_vm10, %v725_v3, %v704_v53 }
 0xe2e   : > { %v745_v7 = vmul.f32 %v741_v60, %v726_v4 }
 0xe30   : > { %746 = vadd.xlane.f32.xlu0 %v745_v7 }
 0xe34   : > { %v737_v8 = vpop.xlane.xlu2 %736 }
 0xe35   : > { %v738_v10 = vsel %vm722_vm10, %v737_v8, %v716_v55 }
 0xe36   : > { %v757_v11 = vmul.f32 %v741_v60, %v738_v10 }
 0xe38   : > { %758 = vadd.xlane.f32.xlu0 %v757_v11 }
 0xe50   : > { %v755_v13 = vpop.xlane.xlu2 %754  ;;  %v751_v15 = vpop.xlane.xlu1 %750 }
 0xe51   : > { %v756_v17 = vsel %vm744_vm12, %v755_v13, %v734_v61  ;;  %v752_v18 = vsel %vm744_vm12, %v751_v15, %v730_v63 }
 0xe52   : > { %v775_v19 = vmul.f32 %v763_v16, %v756_v17  ;;  %v771_v21 = vmul.f32 %v763_v16, %v752_v18 }
 0xe54   : > { %776 = vadd.xlane.f32.xlu0 %v775_v19  ;;  %772 = vadd.xlane.f32.xlu2 %v771_v21 }
 0xea3   : > { %v747_v22 = vpop.xlane.xlu0 %746 }
 0xea4   : > { %v748_v23 = vsel %vm744_vm12, %v747_v22, %v726_v4 }
 0xea5   : > { %v767_v25 = vmul.f32 %v763_v16, %v748_v23 }
 0xea7   : > { %768 = vadd.xlane.f32.xlu1 %v767_v25 }
 0xeab   : > { %v759_v26 = vpop.xlane.xlu0 %758 }
 0xeac   : > { %v760_v28 = vsel %vm744_vm12, %v759_v26, %v738_v10 }
 0xead   : > { %v779_v29 = vmul.f32 %v763_v16, %v760_v28 }
 0xeaf   : > { %780 = vadd.xlane.f32.xlu1 %v779_v29 }
 0xec7   : > { %v773_v30 = vpop.xlane.xlu2 %772  ;;  %v777_v31 = vpop.xlane.xlu0 %776 }
 0xec8   : > { %v774_v32 = vsel %vm766_vm13, %v773_v30, %v752_v18  ;;  %v778_v33 = vsel %vm766_vm13, %v777_v31, %v756_v17 }
 0xec9   : > { %v815_v34 = vmul.f32 %v774_v32, %v1205_v62  ;;  %v834_v35 = vmul.f32 %v778_v33, %v1236_v24 }
 0xecb   : > { %v817_v36 = vsel %vm180_vm0, %v774_v32, %v815_v34  ;;  %v836_v37 = vsel %vm209_vm6, %v778_v33, %v834_v35 }
 0xecc   : > { %908 = vst [vmem:[%s870_s4 + $0x8] sm:$0xff] %v817_v36 }
 0xecd   : > { %910 = vst [vmem:[%s870_s4 + $0x10] sm:$0xff] %v836_v37 }
 0xf1a   : > { %v769_v38 = vpop.xlane.xlu1 %768 }
 0xf1b   : > { %v770_v39 = vsel %vm766_vm13, %v769_v38, %v748_v23 }
 0xf1c   : > { %v797_v62 = vmul.f32 %v770_v39, %v1180_v20 }
 0xf1e   : > { %v799_v24 = vsel %vm151_vm5, %v770_v39, %v797_v62 }
 0xf1f   : > { %906 = vst [vmem:[%s870_s4] sm:$0xff] %v799_v24 }
 0xf22   : > { %v781_v40 = vpop.xlane.xlu1 %780 }
 0xf23   : > { %v782_v51 = vsel %vm766_vm13, %v781_v40, %v760_v28 }
 0xf24   : > { %v853_v41 = vmul.f32 %v782_v51, %v1297_v27 }
 0xf26   : > { %v855_v12 = vsel %vm238_vm11, %v782_v51, %v853_v41 }
 0xf27   : > { %912 = vst [vmem:[%s870_s4 + $0x18] sm:$0xff] %v855_v12 }
 0xf28 PF: > { %s7_s10 = sadd.s32 1, %s1099_s10   ;;  %s1353_s6 = smov %s1091_s8 }
 0xf29   : > { %p4_p6 = scmp.ge.s32.totalorder %s7_s10, 34   ;;  %s1354_s7 = smov %s1095_s9 }
 0xf2a   : > { %s1355_s8 = smov %s1358_s12  ;;  %s1356_s9 = smov %s1362_s13 }
 0xf2b   :  { %6 = sbr.rel (!%p4_p6) target bundleno = 3 (0x3), region = 158 }

// kernel: gi_linear_weights_forward.1
= control target key start
LH: loop header
LB: loop body
LE: loop exit
PB: predicated region body
PF: predicated region fallthrough
CT: control target
= control target key end

     0   :  { %s812_s12 = smov 0   ;;  %s814_s13 = smov 0   ;;  %s928_s0 = inlined_call_operand.vmem [shape: bf16[2,32,640], index: 0, kind: input, shape index: {}]   ;;  %s929_s1 = inlined_call_operand.vmem [shape: bf16[16,640], index: 1, kind: input, shape index: {}]   ;;  %s930_s2 = inlined_call_operand.vmem [shape: f32[2,32,32], index: 2, kind: output, shape index: {0}]   ;;  %s931_s3 = inlined_call_operand.vmem [shape: f32[2,32,16], index: 3, kind: output, shape index: {1}]  }
   0x1   :  { %s816_s14 = smov 0  }
   0x2 LB: > { %s26_s15 = sadd.s32 1, %s786_s13  ;;  %p654_p0 = scmp.ge.s32.totalorder %s790_s14, 1  ;;  %s790_s14 = sphi %s816_s14, %s14_s14   ;;  %s786_s13 = sphi %s814_s13, %s933_s13   ;;  %s782_s12 = sphi %s812_s12, %s932_s12  }
   0x3   : > { %p28_p1 = scmp.ge.s32.totalorder %s26_s15, 2  ;;  %p170_p2 = scmp.lt.s32.totalorder %s790_s14, 3 }
   0x5   : > { %s935_s15 = smov (%p28_p1, %s26_s15), 0  ;;  %p171_p3 = pnand %p654_p0, %p170_p2 }
   0x6   : > { %p209_p4 = scmp.lt.s32.totalorder (!%p171_p3), %s782_s12, 1 }
   0x7   : > { %174 = sbr.rel (%p171_p3) target bundleno = 248 (0xf8), region = 28 }
   0xc   : > { %s937_s12 = smov (!%p209_p4, %s782_s12), 1  ;;  %v702_v11 = vld [vmem:[%s929_s1] sm:$0xf]  ;;  %v736_v18 = vld [vmem:[%s929_s1 + $0x10] sm:$0xf0]  ;;  %vm521_vm0 = vcmask 261120  }
   0xd   : > { %s743_s16 = smul.u32 80, %s937_s12  ;;  %v703_v23 = vor.u32 %v736_v18, %v702_v11  ;;  %v718_v27 = vld [vmem:[%s929_s1 + $0x10] sm:$0xf]  ;;  %v738_v28 = vld [vmem:[%s929_s1 + $0x20] sm:$0xf0]  ;;  %s722_s17 = sshll.u32 %s937_s12, 5 }
   0xe   : > { %v734_v32 = vld [vmem:[%s929_s1 + $0x4] sm:$0xf]  ;;  %v704_v33 = vld [vmem:[%s929_s1 + $0x14] sm:$0xf0]  ;;  %v710_v34 = vld [vmem:[%s929_s1 + $0x8] sm:$0xf]  ;;  %v719_v38 = vor.u32 %v738_v28, %v718_v27  ;;  %s228_s20 = scalar_lea.vmem %s930_s2, %s722_s17  ;;  %s233_s23 = scalar_lea.vmem %s931_s3, %s722_s17 }
   0xf   : > { %s836_s19 = scalar_lea.vmem %s928_s0, %s743_s16  ;;  %v737_v35 = vld [vmem:[%s929_s1 + $0x18] sm:$0xf0]  ;;  %v735_v36 = vld [vmem:[%s929_s1 + $0xc] sm:$0xf]  ;;  %v712_v37 = vld [vmem:[%s929_s1 + $0x1c] sm:$0xf0]  ;;  %v707_v42 = vor.u32 %v734_v32, %v704_v33 }
  0x10   : > { %v682_v0 = vld [vmem:[%s836_s19 + $0x28] sm:$0xf]  ;;  %v731_v1 = vld [vmem:[%s836_s19 + $0x38] sm:$0xf0]  ;;  %v729_v2 = vld [vmem:[%s836_s19 + $0x2c] sm:$0xf]  ;;  %v711_v43 = vor.u32 %v737_v35, %v710_v34  ;;  %v715_v44 = vor.u32 %v735_v36, %v712_v37 }
  0x11   : > { %v841_v3 = vor.u32 %v731_v1, %v682_v0  ;;  %v684_v4 = vld [vmem:[%s836_s19 + $0x3c] sm:$0xf0]  ;;  %v726_v7 = vld [vmem:[%s836_s19 + $0x10] sm:$0xf0]  ;;  %v724_v8 = vld [vmem:[%s836_s19 + $0x4] sm:$0xf] }
  0x12   : > { %v844_v5 = vor.u32 %v729_v2, %v684_v4  ;;  %v662_v6 = vld [vmem:[%s836_s19] sm:$0xf]  ;;  %v664_v9 = vld [vmem:[%s836_s19 + $0x14] sm:$0xf0]  ;;  %v690_v10 = vld [vmem:[%s836_s19 + $0x30] sm:$0xf] }
  0x13   : > { %739 = vmatpush.bf16.xpose.msra.mxu2 %v841_v3  ;;  %311 = vmatpush.bf16.xpose.msra.mxu0 %v841_v3  ;;  %v732_v12 = vld [vmem:[%s836_s19 + $0x40] sm:$0xf0]  ;;  %v730_v13 = vld [vmem:[%s836_s19 + $0x34] sm:$0xf]  ;;  %v692_v14 = vld [vmem:[%s836_s19 + $0x44] sm:$0xf0]  ;;  %v663_v15 = vor.u32 %v726_v7, %v662_v6  ;;  %v667_v19 = vor.u32 %v724_v8, %v664_v9 }
  0x14   : > { %741 = vmatpush.bf16.xpose.msra.mxu3 %v844_v5  ;;  %330 = vmatpush.bf16.xpose.msra.mxu1 %v844_v5  ;;  %v698_v16 = vld [vmem:[%s836_s19 + $0x38] sm:$0xf]  ;;  %v733_v17 = vld [vmem:[%s836_s19 + $0x48] sm:$0xf0]  ;;  %v691_v20 = vor.u32 %v732_v12, %v690_v10  ;;  %v695_v21 = vor.u32 %v730_v13, %v692_v14  ;;  %v670_v24 = vld [vmem:[%s836_s19 + $0x8] sm:$0xf] }
  0x15   : > { %v699_v22 = vor.u32 %v733_v17, %v698_v16  ;;  %v727_v25 = vld [vmem:[%s836_s19 + $0x18] sm:$0xf0]  ;;  %v725_v26 = vld [vmem:[%s836_s19 + $0xc] sm:$0xf]  ;;  %v672_v29 = vld [vmem:[%s836_s19 + $0x1c] sm:$0xf0] }
  0x16   : > { %v678_v30 = vld [vmem:[%s836_s19 + $0x10] sm:$0xf]  ;;  %v728_v31 = vld [vmem:[%s836_s19 + $0x20] sm:$0xf0]  ;;  %v671_v39 = vor.u32 %v727_v25, %v670_v24  ;;  %v675_v40 = vor.u32 %v725_v26, %v672_v29  ;;  %vm526_vm1 = vcmask 130048  }
  0x17   : > { %v679_v41 = vor.u32 %v728_v31, %v678_v30 }
  0x1b   : > { %740 = vmatpush.bf16.xpose.msra.mxu2 %v663_v15  ;;  %312 = vmatpush.bf16.xpose.msra.mxu0 %v663_v15 }
  0x1c   : > { %742 = vmatpush.bf16.xpose.msra.mxu3 %v667_v19  ;;  %331 = vmatpush.bf16.xpose.msra.mxu1 %v667_v19 }
  0x22   : > { %318 = vmatmul.bf16.vlgmr.msra.gmra.mxu2 %v841_v3  ;;  %313 = vmatmul.bf16.vlgmr.msra.gmra.mxu0 %v663_v15 }
  0x23   : > { %349 = vmatpush.bf16.xpose.msrb.mxu2 %v691_v20  ;;  %387 = vmatpush.bf16.xpose.msrb.mxu0 %v699_v22 }
  0x24   : > { %368 = vmatpush.bf16.xpose.msrb.mxu3 %v695_v21  ;;  %433 = vmatpush.bf16.xpose.msrb.mxu1 %v703_v23 }
  0x25   : > { %337 = vmatmul.bf16.vlgmr.msra.gmra.mxu3 %v844_v5  ;;  %332 = vmatmul.bf16.vlgmr.msra.gmra.mxu1 %v667_v19 }
  0x2b   : > { %350 = vmatpush.bf16.xpose.msrb.mxu2 %v671_v39  ;;  %388 = vmatpush.bf16.xpose.msrb.mxu0 %v679_v41 }
  0x2c   : > { %509 = vmatpush.bf16.xpose.msra.mxu1 %v719_v38  ;;  %369 = vmatpush.bf16.xpose.msrb.mxu3 %v675_v40 }
  0x32   : > { %351 = vmatmul.bf16.vlgmr.msrb.gmra.mxu2 %v671_v39  ;;  %389 = vmatmul.bf16.vlgmr.msrb.gmra.mxu0 %v679_v41 }
  0x33   : > { %452 = vmatpush.bf16.xpose.msra.mxu2 %v707_v42  ;;  %490 = vmatpush.bf16.xpose.msra.mxu0 %v715_v44 }
  0x34   : > { %471 = vmatpush.bf16.xpose.msra.mxu3 %v711_v43 }
  0x35   : > { %370 = vmatmul.bf16.vlgmr.msrb.gmra.mxu3 %v675_v40  ;;  %434 = vmatmul.bf16.vlgmr.msrb.gmra.mxu1 %v663_v15 }
  0x42   : > { %356 = vmatmul.bf16.gmra.mxu2 %v691_v20  ;;  %394 = vmatmul.bf16.gmra.mxu0 %v699_v22 }
  0x45   : > { %375 = vmatmul.bf16.gmra.mxu3 %v695_v21  ;;  %439 = vmatmul.bf16.gmra.mxu1 %v841_v3 }
  0x52   : > { %453 = vmatmul.bf16.vlgmr.msra.gmra.mxu2 %v667_v19  ;;  %491 = vmatmul.bf16.vlgmr.msra.gmra.mxu0 %v675_v40 }
  0x55   : > { %472 = vmatmul.bf16.vlgmr.msra.gmra.mxu3 %v671_v39  ;;  %510 = vmatmul.bf16.vlgmr.msra.gmra.mxu1 %v679_v41 }
  0x62   : > { %458 = vmatmul.bf16.gmra.mxu2 %v844_v5  ;;  %496 = vmatmul.bf16.gmra.mxu0 %v695_v21 }
  0x65   : > { %477 = vmatmul.bf16.gmra.mxu3 %v691_v20  ;;  %515 = vmatmul.bf16.gmra.mxu1 %v699_v22 }
  0x9f   : > { %v314_v45 = vpop.f32.mrf.mxu0 }
  0xa2   : > { %v333_v46 = vpop.f32.mrf.mxu1 }
  0xa3   : > { %v334_v55 = vadd.f32 %v333_v46, %v314_v45 }
  0xa5   : > { %v319_v47 = vpop.f32.mrf.mxu2 }
  0xa7   : > { %v316_v49 = vpop.f32.mrf.mxu0 }
  0xa8   : > { %v338_v48 = vpop.f32.mrf.mxu3 }
  0xa9   : > { %v339_v7 = vadd.f32 %v338_v48, %v319_v47 }
  0xaa   : > { %v335_v50 = vpop.f32.mrf.mxu1 }
  0xab   : > { %v336_v63 = vadd.f32 %v335_v50, %v316_v49 }
  0xad   : > { %v321_v51 = vpop.f32.mrf.mxu2 }
  0xaf   : > { %v390_v53 = vpop.f32.mrf.mxu0 }
  0xb0   : > { %v340_v52 = vpop.f32.mrf.mxu3 }
  0xb1   : > { %v341_v15 = vadd.f32 %v340_v52, %v321_v51 }
  0xb2   : > { %v435_v54 = vpop.f32.mrf.mxu1 }
  0xb5   : > { %v352_v56 = vpop.f32.mrf.mxu2 }
  0xb6   : > { %v353_v57 = vadd.f32 %v352_v56, %v334_v55 }
  0xb7   : > { %v392_v59 = vpop.f32.mrf.mxu0 }
  0xb8   : > { %v371_v58 = vpop.f32.mrf.mxu3 }
  0xb9   : > { %v372_v60 = vadd.f32 %v371_v58, %v353_v57 }
  0xba   : > { %v437_v61 = vpop.f32.mrf.mxu1 }
  0xbb   : > { %v391_v62 = vadd.f32 %v390_v53, %v372_v60 }
  0xbd   : > { %522 = vst.msk [vmem:[%s228_s20] sm:$0xff] %vm521_vm0, %v391_v62  ;;  %v354_v0 = vpop.f32.mrf.mxu2 }
  0xbe   : > { %v355_v1 = vadd.f32 %v354_v0, %v336_v63 }
  0xbf   : > { %v395_v3 = vpop.f32.mrf.mxu0 }
  0xc0   : > { %v373_v2 = vpop.f32.mrf.mxu3 }
  0xc1   : > { %v374_v4 = vadd.f32 %v373_v2, %v355_v1 }
  0xc2   : > { %v440_v5 = vpop.f32.mrf.mxu1 }
  0xc3   : > { %v393_v6 = vadd.f32 %v392_v59, %v374_v4 }
  0xc5   : > { %523 = vst.msk [vmem:[%s228_s20 + $0x8] sm:$0xff] %vm521_vm0, %v393_v6  ;;  %v357_v8 = vpop.f32.mrf.mxu2 }
  0xc6   : > { %v358_v9 = vadd.f32 %v357_v8, %v339_v7 }
  0xc7   : > { %v397_v12 = vpop.f32.mrf.mxu0 }
  0xc8   : > { %v376_v10 = vpop.f32.mrf.mxu3 }
  0xc9   : > { %v377_v11 = vadd.f32 %v376_v10, %v358_v9 }
  0xca   : > { %v442_v14 = vpop.f32.mrf.mxu1 }
  0xcb   : > { %v396_v13 = vadd.f32 %v395_v3, %v377_v11 }
  0xcd   : > { %524 = vst.msk [vmem:[%s228_s20 + $0x10] sm:$0xff] %vm521_vm0, %v396_v13  ;;  %v359_v16 = vpop.f32.mrf.mxu2 }
  0xce   : > { %v360_v17 = vadd.f32 %v359_v16, %v341_v15 }
  0xcf   : > { %v492_v21 = vpop.f32.mrf.mxu0 }
  0xd0   : > { %v378_v18 = vpop.f32.mrf.mxu3 }
  0xd1   : > { %v379_v19 = vadd.f32 %v378_v18, %v360_v17 }
  0xd2   : > { %v511_v22 = vpop.f32.mrf.mxu1 }
  0xd3   : > { %v398_v20 = vadd.f32 %v397_v12, %v379_v19 }
  0xd5   : > { %525 = vst.msk [vmem:[%s228_s20 + $0x18] sm:$0xff] %vm521_vm0, %v398_v20  ;;  %v454_v23 = vpop.f32.mrf.mxu2 }
  0xd6   : > { %v455_v24 = vadd.f32 %v454_v23, %v435_v54 }
  0xd7   : > { %v494_v29 = vpop.f32.mrf.mxu0 }
  0xd8   : > { %v473_v25 = vpop.f32.mrf.mxu3 }
  0xd9   : > { %v474_v26 = vadd.f32 %v473_v25, %v455_v24 }
  0xda   : > { %v513_v33 = vpop.f32.mrf.mxu1 }
  0xdb   : > { %v493_v27 = vadd.f32 %v492_v21, %v474_v26 }
  0xdd   : > { %v512_v28 = vadd.f32 %v511_v22, %v493_v27  ;;  %v456_v30 = vpop.f32.mrf.mxu2 }
  0xde   : > { %v457_v31 = vadd.f32 %v456_v30, %v437_v61 }
  0xdf   : > { %527 = vst.msk [vmem:[%s233_s23] sm:$0xff] %vm526_vm1, %v512_v28  ;;  %v497_v40 = vpop.f32.mrf.mxu0 }
  0xe0   : > { %v475_v32 = vpop.f32.mrf.mxu3 }
  0xe1   : > { %v476_v34 = vadd.f32 %v475_v32, %v457_v31 }
  0xe2   : > { %v516_v42 = vpop.f32.mrf.mxu1 }
  0xe3   : > { %v495_v35 = vadd.f32 %v494_v29, %v476_v34 }
  0xe5   : > { %v514_v36 = vadd.f32 %v513_v33, %v495_v35  ;;  %v459_v37 = vpop.f32.mrf.mxu2 }
  0xe6   : > { %v460_v38 = vadd.f32 %v459_v37, %v440_v5 }
  0xe7   : > { %528 = vst.msk [vmem:[%s233_s23 + $0x8] sm:$0xff] %vm526_vm1, %v514_v36  ;;  %v499_v49 = vpop.f32.mrf.mxu0 }
  0xe8   : > { %v478_v39 = vpop.f32.mrf.mxu3 }
  0xe9   : > { %v479_v41 = vadd.f32 %v478_v39, %v460_v38 }
  0xea   : > { %v518_v51 = vpop.f32.mrf.mxu1 }
  0xeb   : > { %v498_v43 = vadd.f32 %v497_v40, %v479_v41 }
  0xed   : > { %v517_v44 = vadd.f32 %v516_v42, %v498_v43  ;;  %v461_v45 = vpop.f32.mrf.mxu2 }
  0xee   : > { %v462_v46 = vadd.f32 %v461_v45, %v442_v14 }
  0xef   : > { %529 = vst.msk [vmem:[%s233_s23 + $0x10] sm:$0xff] %vm526_vm1, %v517_v44 }
  0xf0   : > { %v480_v47 = vpop.f32.mrf.mxu3 }
  0xf1   : > { %v481_v48 = vadd.f32 %v480_v47, %v462_v46 }
  0xf3   : > { %v500_v50 = vadd.f32 %v499_v49, %v481_v48 }
  0xf5   : > { %v519_v52 = vadd.f32 %v518_v51, %v500_v50 }
  0xf7   : > { %530 = vst.msk [vmem:[%s233_s23 + $0x18] sm:$0xff] %vm526_vm1, %v519_v52 }
  0xf8 PF: > { %s14_s14 = sadd.s32 1, %s790_s14   ;;  %s932_s12 = smov %s786_s13 }
  0xf9   : > { %p11_p5 = scmp.ge.s32.totalorder %s14_s14, 4   ;;  %s933_s13 = smov %s935_s15 }
  0xfb   :  { %13 = sbr.rel (!%p11_p5) target bundleno = 2 (0x2), region = 73 }

</bundles_post_ra>
